<compile_context>
chip_gen: v5e
topology: v5e:2x2
jax: 0.10.0
libtpu: 0.0.40
codegen_flags: <defaults>
</compile_context>

<pallas_src>
import functools

import jax
import jax.numpy as jnp
from jax.experimental import pallas as pl
from jax.experimental.pallas import tpu as pltpu


LANE = 128  # pad narrow output widths to full 128-lane stores


# -----------------------------------------------------------------------------
# Fused (X @ W) + shift [+ ReLU] kernel.  BN scale and conv bias are pre-folded
# into W / shift at parameter-preparation time.  X, W are bf16; f32 epilogue.
# -----------------------------------------------------------------------------
def _matmul_bias_kernel(x_ref, w_ref, shift_ref, o_ref, *, relu):
    y = jnp.dot(x_ref[...], w_ref[...], preferred_element_type=jnp.float32)
    y = y + shift_ref[...]
    if relu:
        y = jnp.maximum(y, 0.0)
    o_ref[...] = y.astype(o_ref.dtype)


def fused_matmul_bias(x, w, shift, *, relu, tm, out_dtype=jnp.bfloat16):
    """(x @ w) + shift [, relu].  x:(M,K) bf16, w:(K,N) bf16, shift:(1,N) f32."""
    M, K = x.shape
    N = w.shape[1]
    grid_m = pl.cdiv(M, tm)
    M_pad = grid_m * tm
    if M_pad != M:
        x = jnp.pad(x, ((0, M_pad - M), (0, 0)))

    out = pl.pallas_call(
        functools.partial(_matmul_bias_kernel, relu=relu),
        out_shape=jax.ShapeDtypeStruct((M_pad, N), out_dtype),
        grid_spec=pltpu.PrefetchScalarGridSpec(
            num_scalar_prefetch=0,
            grid=(grid_m,),
            in_specs=[
                pl.BlockSpec((tm, K), lambda i: (i, 0)),   # X tile (streamed)
                pl.BlockSpec((K, N), lambda i: (0, 0)),    # resident weight
                pl.BlockSpec((1, N), lambda i: (0, 0)),    # per-channel shift
            ],
            out_specs=pl.BlockSpec((tm, N), lambda i: (i, 0)),
        ),
        compiler_params=pltpu.CompilerParams(
            dimension_semantics=("parallel",)),
    )(x, w, shift)
    return out[:M]


# -----------------------------------------------------------------------------
# Fused FC tail: flatten(NHWC) @ W1 + b1, ReLU, @ W2 + b2   (one pallas_call).
# Dropout layers are identity in eval mode.
# -----------------------------------------------------------------------------
def _fc_tail_kernel(x_ref, w1_ref, b1_ref, w2_ref, b2_ref, o_ref):
    h = jnp.dot(x_ref[...], w1_ref[...], preferred_element_type=jnp.float32)
    h = jnp.maximum(h + b1_ref[...], 0.0)
    y = jnp.dot(h.astype(w2_ref.dtype), w2_ref[...],
                preferred_element_type=jnp.float32)
    o_ref[...] = (y + b2_ref[...]).astype(o_ref.dtype)


def fc_tail(x, w1, b1, w2, b2):
    """x:(Mp,K) bf16, w1:(K,H) bf16, w2:(H,Np) bf16, b1/b2:(1,·) f32."""
    Mp, K = x.shape
    H = w1.shape[1]
    Np = w2.shape[1]
    return pl.pallas_call(
        _fc_tail_kernel,
        out_shape=jax.ShapeDtypeStruct((Mp, Np), jnp.float32),
        grid_spec=pltpu.PrefetchScalarGridSpec(
            num_scalar_prefetch=0,
            grid=(1,),
            in_specs=[
                pl.BlockSpec((Mp, K), lambda i: (0, 0)),
                pl.BlockSpec((K, H), lambda i: (0, 0)),
                pl.BlockSpec((1, H), lambda i: (0, 0)),
                pl.BlockSpec((H, Np), lambda i: (0, 0)),
                pl.BlockSpec((1, Np), lambda i: (0, 0)),
            ],
            out_specs=pl.BlockSpec((Mp, Np), lambda i: (0, 0)),
        ),
        compiler_params=pltpu.CompilerParams(
            dimension_semantics=("arbitrary",)),
    )(x, w1, b1, w2, b2)


# -----------------------------------------------------------------------------
# Conv3x3 + BN(eval, folded) + ReLU via im2col glue + lane-padded fused matmul.
# -----------------------------------------------------------------------------
def conv3x3(x_nhwc, w_mat, shift, *, stride, cout, tm):
    """x_nhwc:(B,H,W,Cin) bf16; w_mat:(9*Cin,128) bf16; shift:(1,128) f32."""
    B, H, W, Cin = x_nhwc.shape
    Ho = (H + 2 - 3) // stride + 1
    Wo = (W + 2 - 3) // stride + 1
    xp = jnp.pad(x_nhwc, ((0, 0), (1, 1), (1, 1), (0, 0)))
    # TODO(synk): im2col could be fused into the kernel with halo BlockSpecs to
    # avoid materializing the patch matrix; kept in the wrapper for robustness.
    cols = [xp[:, dy:dy + stride * Ho:stride, dx:dx + stride * Wo:stride, :]
            for dy in range(3) for dx in range(3)]
    patches = jnp.concatenate(cols, axis=-1).reshape(B * Ho * Wo, 9 * Cin)
    y = fused_matmul_bias(patches, w_mat, shift, relu=True, tm=tm)
    return y[:, :cout].reshape(B, Ho, Wo, cout)


# -----------------------------------------------------------------------------
# Full model forward (takes pre-processed params).
# -----------------------------------------------------------------------------
def model_forward(x_nchw, p):
    B = x_nchw.shape[0]
    # NCHW -> NHWC (Cin == 1, so this is layout-free) + bf16 for the MXU.
    x = jnp.transpose(x_nchw, (0, 2, 3, 1)).astype(jnp.bfloat16)

    x = conv3x3(x, p["w1c"], p["s1"], stride=1, cout=32, tm=784)    # (B,28,28,32)
    x = conv3x3(x, p["w2c"], p["s2"], stride=1, cout=64, tm=784)    # (B,28,28,64)
    x = conv3x3(x, p["w3c"], p["s3"], stride=2, cout=128, tm=200)   # (B,14,14,128)

    # MaxPool2d(2): strided elementwise max of 4 NHWC slices (pure VPU, no
    # transpose, no extra kernel launch).
    x = jnp.maximum(jnp.maximum(x[:, 0::2, 0::2, :], x[:, 0::2, 1::2, :]),
                    jnp.maximum(x[:, 1::2, 0::2, :], x[:, 1::2, 1::2, :]))
    # Dropout(0.25): identity in eval mode.

    # NHWC flatten is a free reshape; fc1's weight rows were pre-permuted from
    # torch's NCHW-flatten order so no activation transpose is needed.
    x = x.reshape(B, 7 * 7 * 128)
    Mp = max(8, ((B + 7) // 8) * 8)          # pad M only to 8 (not 128)
    if Mp != B:
        x = jnp.pad(x, ((0, Mp - B), (0, 0)))

    # Flatten -> fc1 -> ReLU -> (Dropout=id) -> classifier, one pallas_call.
    logits = fc_tail(x, p["wf1"], p["bf1"], p["wf2"], p["bf2"])
    return logits[:B, :10]


# -----------------------------------------------------------------------------
# One-time parameter preprocessing (out of the per-call path).
# -----------------------------------------------------------------------------
def prepare_params(params, eps=1e-5):
    def conv_block(w, b, gamma, beta, mean, var):
        cout, cin, kh, kw = w.shape
        s = gamma / jnp.sqrt(var + eps)                 # BN fold (eval mode)
        # torch (Cout,Cin,kh,kw) -> ((dy,dx,cin), Cout), matching patch order.
        w_mat = jnp.transpose(w, (2, 3, 1, 0)).reshape(kh * kw * cin, cout)
        w_mat = w_mat * s[None, :]                      # fold BN scale into W
        shift = beta - mean * s + b * s                 # conv bias through BN
        if cout < LANE:                                 # lane-dense output pad
            w_mat = jnp.pad(w_mat, ((0, 0), (0, LANE - cout)))
            shift = jnp.pad(shift, (0, LANE - cout))
        return (w_mat.astype(jnp.bfloat16),
                shift.reshape(1, -1).astype(jnp.float32))

    p = {}
    p["w1c"], p["s1"] = conv_block(*params["conv1"])
    p["w2c"], p["s2"] = conv_block(*params["conv2"])
    p["w3c"], p["s3"] = conv_block(*params["conv3"])

    w1, b1 = params["fc1"]                              # (128, 6272), (128,)
    # torch flattens (C,H,W); our activations flatten as (H,W,C). Permute the
    # 6272 weight rows once: (c,h,w) -> (h,w,c).
    w1t = jnp.transpose(w1).reshape(128, 7, 7, 128)     # (c, h, w, out)
    w1t = jnp.transpose(w1t, (1, 2, 0, 3)).reshape(7 * 7 * 128, 128)
    p["wf1"] = w1t.astype(jnp.bfloat16)
    p["bf1"] = b1.reshape(1, 128).astype(jnp.float32)

    w2, b2 = params["fc2"]                              # (10, 128), (10,)
    p["wf2"] = jnp.pad(jnp.transpose(w2), ((0, 0), (0, LANE - 10))
                       ).astype(jnp.bfloat16)           # (128, 128) lane-padded
    p["bf2"] = jnp.pad(b2, (0, LANE - 10)).reshape(1, LANE).astype(jnp.float32)
    return p


# -----------------------------------------------------------------------------
# Deterministic parameter init (synthetic — matches PyTorch shapes).
# -----------------------------------------------------------------------------
def init_params(key):
    keys = iter(jax.random.split(key, 24))

    def conv_block(cin, cout):
        w = 0.05 * jax.random.normal(next(keys), (cout, cin, 3, 3), jnp.float32)
        b = 0.05 * jax.random.normal(next(keys), (cout,), jnp.float32)
        gamma = 1.0 + 0.1 * jax.random.normal(next(keys), (cout,), jnp.float32)
        beta = 0.1 * jax.random.normal(next(keys), (cout,), jnp.float32)
        mean = 0.1 * jax.random.normal(next(keys), (cout,), jnp.float32)
        var = 0.9 + 0.1 * jnp.abs(jax.random.normal(next(keys), (cout,), jnp.float32))
        return (w, b, gamma, beta, mean, var)

    return {
        "conv1": conv_block(1, 32),
        "conv2": conv_block(32, 64),
        "conv3": conv_block(64, 128),
        "fc1": (0.02 * jax.random.normal(next(keys), (128, 7 * 7 * 128), jnp.float32),
                0.02 * jax.random.normal(next(keys), (128,), jnp.float32)),
        "fc2": (0.02 * jax.random.normal(next(keys), (10, 128), jnp.float32),
                0.02 * jax.random.normal(next(keys), (10,), jnp.float32)),
    }


if __name__ == "__main__":
    key = jax.random.PRNGKey(0)
    pkey, xkey = jax.random.split(key)
    params = init_params(pkey)
    prepared = prepare_params(params)   # one-time: BN fold, layouts, padding

    # Input must be (B, 1, 28, 28) for the 7*7*128 flatten to line up.
    x = jax.random.normal(xkey, (2, 1, 28, 28), jnp.float32)

    fwd = jax.jit(model_forward)
    logits = fwd(x, prepared)
    jax.block_until_ready(logits)

    assert logits.shape == (2, 10), logits.shape
    assert bool(jnp.all(jnp.isfinite(logits)))
    print("KERNEL_OK")
</pallas_src>

<mosaic_0001>
module attributes {stable_mosaic.version = 11 : i64} {
  func.func @_matmul_bias_kernel(%arg0: i32, %arg1: memref<784x9xbf16, #tpu.memory_space<vmem>>, %arg2: memref<9x128xbf16, #tpu.memory_space<vmem>>, %arg3: memref<1x128xf32, #tpu.memory_space<vmem>>, %arg4: memref<784x128xbf16, #tpu.memory_space<vmem>>) attributes {dimension_semantics = [#tpu.dimension_semantics<parallel>], iteration_bounds = array<i64: 2>, scalar_prefetch = 0 : i64, scratch_operands = 0 : i64, tpu.core_type = #tpu.core_type<tc>, window_params = [{transform_indices = @transform_0, window_bounds = array<i64: 784, 9>}, {pipeline_mode = #tpu.pipeline_mode<synchronous>, transform_indices = @transform_1, window_bounds = array<i64: 9, 128>}, {pipeline_mode = #tpu.pipeline_mode<synchronous>, transform_indices = @transform_2, window_bounds = array<i64: 1, 128>}, {transform_indices = @transform_3, window_bounds = array<i64: 784, 128>}]} {
    %c0 = arith.constant 0 : index
    %c0_0 = arith.constant 0 : index
    %0 = vector.load %arg1[%c0, %c0_0] : memref<784x9xbf16, #tpu.memory_space<vmem>>, vector<784x9xbf16>
    %c0_1 = arith.constant 0 : index
    %c0_2 = arith.constant 0 : index
    %1 = vector.load %arg2[%c0_1, %c0_2] : memref<9x128xbf16, #tpu.memory_space<vmem>>, vector<9x128xbf16>
    %cst = arith.constant dense<0.000000e+00> : vector<784x128xf32>
    %2 = tpu.matmul %0, %1, %cst {dimension_numbers = #tpu.dot_dimension_numbers<[1], [0], [0], [1], [0, 0, 1, 1], [], []>} : vector<784x9xbf16>, vector<9x128xbf16>, vector<784x128xf32> -> vector<784x128xf32>
    %c0_3 = arith.constant 0 : index
    %c0_4 = arith.constant 0 : index
    %3 = vector.load %arg3[%c0_3, %c0_4] : memref<1x128xf32, #tpu.memory_space<vmem>>, vector<1x128xf32>
    %4 = vector.broadcast %3 : vector<1x128xf32> to vector<784x128xf32>
    %5 = arith.addf %2, %4 : vector<784x128xf32>
    %cst_5 = arith.constant 0.000000e+00 : f32
    %6 = vector.broadcast %cst_5 : f32 to vector<784x128xf32>
    %7 = arith.maximumf %5, %6 : vector<784x128xf32>
    %8 = arith.truncf %7 : vector<784x128xf32> to vector<784x128xbf16>
    %c0_6 = arith.constant 0 : index
    %c0_7 = arith.constant 0 : index
    %9 = vector.load %arg4[%c0_6, %c0_7] : memref<784x128xbf16, #tpu.memory_space<vmem>>, vector<784x128xbf16>
    tpu.vector_store %arg4[%c0_6, %c0_7], %8 {strides = array<i32>} : memref<784x128xbf16, #tpu.memory_space<vmem>>, vector<784x128xbf16>,
    return
  }
  func.func @transform_0(%arg0: i32) -> (i32, i32) {
    %c0_i32 = arith.constant 0 : i32
    %c0_i32_0 = arith.constant 0 : i32
    return %arg0, %c0_i32 : i32, i32
  }
  func.func @transform_1(%arg0: i32) -> (i32, i32) {
    %c0_i32 = arith.constant 0 : i32
    %c0_i32_0 = arith.constant 0 : i32
    %c0_i32_1 = arith.constant 0 : i32
    return %c0_i32, %c0_i32_0 : i32, i32
  }
  func.func @transform_2(%arg0: i32) -> (i32, i32) {
    %c0_i32 = arith.constant 0 : i32
    %c0_i32_0 = arith.constant 0 : i32
    %c0_i32_1 = arith.constant 0 : i32
    return %c0_i32, %c0_i32_0 : i32, i32
  }
  func.func @transform_3(%arg0: i32) -> (i32, i32) {
    %c0_i32 = arith.constant 0 : i32
    %c0_i32_0 = arith.constant 0 : i32
    return %arg0, %c0_i32 : i32, i32
  }
}

module attributes {stable_mosaic.version = 11 : i64} {
  func.func @_matmul_bias_kernel(%arg0: i32, %arg1: memref<784x288xbf16, #tpu.memory_space<vmem>>, %arg2: memref<288x128xbf16, #tpu.memory_space<vmem>>, %arg3: memref<1x128xf32, #tpu.memory_space<vmem>>, %arg4: memref<784x128xbf16, #tpu.memory_space<vmem>>) attributes {dimension_semantics = [#tpu.dimension_semantics<parallel>], iteration_bounds = array<i64: 2>, scalar_prefetch = 0 : i64, scratch_operands = 0 : i64, tpu.core_type = #tpu.core_type<tc>, window_params = [{transform_indices = @transform_0, window_bounds = array<i64: 784, 288>}, {pipeline_mode = #tpu.pipeline_mode<synchronous>, transform_indices = @transform_1, window_bounds = array<i64: 288, 128>}, {pipeline_mode = #tpu.pipeline_mode<synchronous>, transform_indices = @transform_2, window_bounds = array<i64: 1, 128>}, {transform_indices = @transform_3, window_bounds = array<i64: 784, 128>}]} {
    %c0 = arith.constant 0 : index
    %c0_0 = arith.constant 0 : index
    %0 = vector.load %arg1[%c0, %c0_0] : memref<784x288xbf16, #tpu.memory_space<vmem>>, vector<784x288xbf16>
    %c0_1 = arith.constant 0 : index
    %c0_2 = arith.constant 0 : index
    %1 = vector.load %arg2[%c0_1, %c0_2] : memref<288x128xbf16, #tpu.memory_space<vmem>>, vector<288x128xbf16>
    %cst = arith.constant dense<0.000000e+00> : vector<784x128xf32>
    %2 = tpu.matmul %0, %1, %cst {dimension_numbers = #tpu.dot_dimension_numbers<[1], [0], [0], [1], [0, 0, 1, 1], [], []>} : vector<784x288xbf16>, vector<288x128xbf16>, vector<784x128xf32> -> vector<784x128xf32>
    %c0_3 = arith.constant 0 : index
    %c0_4 = arith.constant 0 : index
    %3 = vector.load %arg3[%c0_3, %c0_4] : memref<1x128xf32, #tpu.memory_space<vmem>>, vector<1x128xf32>
    %4 = vector.broadcast %3 : vector<1x128xf32> to vector<784x128xf32>
    %5 = arith.addf %2, %4 : vector<784x128xf32>
    %cst_5 = arith.constant 0.000000e+00 : f32
    %6 = vector.broadcast %cst_5 : f32 to vector<784x128xf32>
    %7 = arith.maximumf %5, %6 : vector<784x128xf32>
    %8 = arith.truncf %7 : vector<784x128xf32> to vector<784x128xbf16>
    %c0_6 = arith.constant 0 : index
    %c0_7 = arith.constant 0 : index
    %9 = vector.load %arg4[%c0_6, %c0_7] : memref<784x128xbf16, #tpu.memory_space<vmem>>, vector<784x128xbf16>
    tpu.vector_store %arg4[%c0_6, %c0_7], %8 {strides = array<i32>} : memref<784x128xbf16, #tpu.memory_space<vmem>>, vector<784x128xbf16>,
    return
  }
  func.func @transform_0(%arg0: i32) -> (i32, i32) {
    %c0_i32 = arith.constant 0 : i32
    %c0_i32_0 = arith.constant 0 : i32
    return %arg0, %c0_i32 : i32, i32
  }
  func.func @transform_1(%arg0: i32) -> (i32, i32) {
    %c0_i32 = arith.constant 0 : i32
    %c0_i32_0 = arith.constant 0 : i32
    %c0_i32_1 = arith.constant 0 : i32
    return %c0_i32, %c0_i32_0 : i32, i32
  }
  func.func @transform_2(%arg0: i32) -> (i32, i32) {
    %c0_i32 = arith.constant 0 : i32
    %c0_i32_0 = arith.constant 0 : i32
    %c0_i32_1 = arith.constant 0 : i32
    return %c0_i32, %c0_i32_0 : i32, i32
  }
  func.func @transform_3(%arg0: i32) -> (i32, i32) {
    %c0_i32 = arith.constant 0 : i32
    %c0_i32_0 = arith.constant 0 : i32
    return %arg0, %c0_i32 : i32, i32
  }
}

module attributes {stable_mosaic.version = 11 : i64} {
  func.func @_matmul_bias_kernel(%arg0: i32, %arg1: memref<200x576xbf16, #tpu.memory_space<vmem>>, %arg2: memref<576x128xbf16, #tpu.memory_space<vmem>>, %arg3: memref<1x128xf32, #tpu.memory_space<vmem>>, %arg4: memref<200x128xbf16, #tpu.memory_space<vmem>>) attributes {dimension_semantics = [#tpu.dimension_semantics<parallel>], iteration_bounds = array<i64: 2>, scalar_prefetch = 0 : i64, scratch_operands = 0 : i64, tpu.core_type = #tpu.core_type<tc>, window_params = [{transform_indices = @transform_0, window_bounds = array<i64: 200, 576>}, {pipeline_mode = #tpu.pipeline_mode<synchronous>, transform_indices = @transform_1, window_bounds = array<i64: 576, 128>}, {pipeline_mode = #tpu.pipeline_mode<synchronous>, transform_indices = @transform_2, window_bounds = array<i64: 1, 128>}, {transform_indices = @transform_3, window_bounds = array<i64: 200, 128>}]} {
    %c0 = arith.constant 0 : index
    %c0_0 = arith.constant 0 : index
    %0 = vector.load %arg1[%c0, %c0_0] : memref<200x576xbf16, #tpu.memory_space<vmem>>, vector<200x576xbf16>
    %c0_1 = arith.constant 0 : index
    %c0_2 = arith.constant 0 : index
    %1 = vector.load %arg2[%c0_1, %c0_2] : memref<576x128xbf16, #tpu.memory_space<vmem>>, vector<576x128xbf16>
    %cst = arith.constant dense<0.000000e+00> : vector<200x128xf32>
    %2 = tpu.matmul %0, %1, %cst {dimension_numbers = #tpu.dot_dimension_numbers<[1], [0], [0], [1], [0, 0, 1, 1], [], []>} : vector<200x576xbf16>, vector<576x128xbf16>, vector<200x128xf32> -> vector<200x128xf32>
    %c0_3 = arith.constant 0 : index
    %c0_4 = arith.constant 0 : index
    %3 = vector.load %arg3[%c0_3, %c0_4] : memref<1x128xf32, #tpu.memory_space<vmem>>, vector<1x128xf32>
    %4 = vector.broadcast %3 : vector<1x128xf32> to vector<200x128xf32>
    %5 = arith.addf %2, %4 : vector<200x128xf32>
    %cst_5 = arith.constant 0.000000e+00 : f32
    %6 = vector.broadcast %cst_5 : f32 to vector<200x128xf32>
    %7 = arith.maximumf %5, %6 : vector<200x128xf32>
    %8 = arith.truncf %7 : vector<200x128xf32> to vector<200x128xbf16>
    %c0_6 = arith.constant 0 : index
    %c0_7 = arith.constant 0 : index
    %9 = vector.load %arg4[%c0_6, %c0_7] : memref<200x128xbf16, #tpu.memory_space<vmem>>, vector<200x128xbf16>
    tpu.vector_store %arg4[%c0_6, %c0_7], %8 {strides = array<i32>} : memref<200x128xbf16, #tpu.memory_space<vmem>>, vector<200x128xbf16>,
    return
  }
  func.func @transform_0(%arg0: i32) -> (i32, i32) {
    %c0_i32 = arith.constant 0 : i32
    %c0_i32_0 = arith.constant 0 : i32
    return %arg0, %c0_i32 : i32, i32
  }
  func.func @transform_1(%arg0: i32) -> (i32, i32) {
    %c0_i32 = arith.constant 0 : i32
    %c0_i32_0 = arith.constant 0 : i32
    %c0_i32_1 = arith.constant 0 : i32
    return %c0_i32, %c0_i32_0 : i32, i32
  }
  func.func @transform_2(%arg0: i32) -> (i32, i32) {
    %c0_i32 = arith.constant 0 : i32
    %c0_i32_0 = arith.constant 0 : i32
    %c0_i32_1 = arith.constant 0 : i32
    return %c0_i32, %c0_i32_0 : i32, i32
  }
  func.func @transform_3(%arg0: i32) -> (i32, i32) {
    %c0_i32 = arith.constant 0 : i32
    %c0_i32_0 = arith.constant 0 : i32
    return %arg0, %c0_i32 : i32, i32
  }
}

module attributes {stable_mosaic.version = 11 : i64} {
  func.func @_fc_tail_kernel(%arg0: i32, %arg1: memref<8x6272xbf16, #tpu.memory_space<vmem>>, %arg2: memref<6272x128xbf16, #tpu.memory_space<vmem>>, %arg3: memref<1x128xf32, #tpu.memory_space<vmem>>, %arg4: memref<128x128xbf16, #tpu.memory_space<vmem>>, %arg5: memref<1x128xf32, #tpu.memory_space<vmem>>, %arg6: memref<8x128xf32, #tpu.memory_space<vmem>>) attributes {dimension_semantics = [#tpu.dimension_semantics<arbitrary>], iteration_bounds = array<i64: 1>, scalar_prefetch = 0 : i64, scratch_operands = 0 : i64, tpu.core_type = #tpu.core_type<tc>, window_params = [{pipeline_mode = #tpu.pipeline_mode<synchronous>, transform_indices = @transform_0, window_bounds = array<i64: 8, 6272>}, {pipeline_mode = #tpu.pipeline_mode<synchronous>, transform_indices = @transform_1, window_bounds = array<i64: 6272, 128>}, {pipeline_mode = #tpu.pipeline_mode<synchronous>, transform_indices = @transform_2, window_bounds = array<i64: 1, 128>}, {pipeline_mode = #tpu.pipeline_mode<synchronous>, transform_indices = @transform_3, window_bounds = array<i64: 128, 128>}, {pipeline_mode = #tpu.pipeline_mode<synchronous>, transform_indices = @transform_4, window_bounds = array<i64: 1, 128>}, {pipeline_mode = #tpu.pipeline_mode<synchronous>, transform_indices = @transform_5, window_bounds = array<i64: 8, 128>}]} {
    %c0 = arith.constant 0 : index
    %c0_0 = arith.constant 0 : index
    %0 = vector.load %arg1[%c0, %c0_0] : memref<8x6272xbf16, #tpu.memory_space<vmem>>, vector<8x6272xbf16>
    %c0_1 = arith.constant 0 : index
    %c0_2 = arith.constant 0 : index
    %1 = vector.load %arg2[%c0_1, %c0_2] : memref<6272x128xbf16, #tpu.memory_space<vmem>>, vector<6272x128xbf16>
    %cst = arith.constant dense<0.000000e+00> : vector<8x128xf32>
    %2 = tpu.matmul %0, %1, %cst {dimension_numbers = #tpu.dot_dimension_numbers<[1], [0], [0], [1], [0, 0, 1, 1], [], []>} : vector<8x6272xbf16>, vector<6272x128xbf16>, vector<8x128xf32> -> vector<8x128xf32>
    %c0_3 = arith.constant 0 : index
    %c0_4 = arith.constant 0 : index
    %3 = vector.load %arg3[%c0_3, %c0_4] : memref<1x128xf32, #tpu.memory_space<vmem>>, vector<1x128xf32>
    %4 = vector.broadcast %3 : vector<1x128xf32> to vector<8x128xf32>
    %5 = arith.addf %2, %4 : vector<8x128xf32>
    %cst_5 = arith.constant 0.000000e+00 : f32
    %6 = vector.broadcast %cst_5 : f32 to vector<8x128xf32>
    %7 = arith.maximumf %5, %6 : vector<8x128xf32>
    %8 = arith.truncf %7 : vector<8x128xf32> to vector<8x128xbf16>
    %c0_6 = arith.constant 0 : index
    %c0_7 = arith.constant 0 : index
    %9 = vector.load %arg4[%c0_6, %c0_7] : memref<128x128xbf16, #tpu.memory_space<vmem>>, vector<128x128xbf16>
    %cst_8 = arith.constant dense<0.000000e+00> : vector<8x128xf32>
    %10 = tpu.matmul %8, %9, %cst_8 {dimension_numbers = #tpu.dot_dimension_numbers<[1], [0], [0], [1], [0, 0, 1, 1], [], []>} : vector<8x128xbf16>, vector<128x128xbf16>, vector<8x128xf32> -> vector<8x128xf32>
    %c0_9 = arith.constant 0 : index
    %c0_10 = arith.constant 0 : index
    %11 = vector.load %arg5[%c0_9, %c0_10] : memref<1x128xf32, #tpu.memory_space<vmem>>, vector<1x128xf32>
    %12 = vector.broadcast %11 : vector<1x128xf32> to vector<8x128xf32>
    %13 = arith.addf %10, %12 : vector<8x128xf32>
    %c0_11 = arith.constant 0 : index
    %c0_12 = arith.constant 0 : index
    %14 = vector.load %arg6[%c0_11, %c0_12] : memref<8x128xf32, #tpu.memory_space<vmem>>, vector<8x128xf32>
    tpu.vector_store %arg6[%c0_11, %c0_12], %13 {strides = array<i32>} : memref<8x128xf32, #tpu.memory_space<vmem>>, vector<8x128xf32>,
    return
  }
  func.func @transform_0(%arg0: i32) -> (i32, i32) {
    %c0_i32 = arith.constant 0 : i32
    %c0_i32_0 = arith.constant 0 : i32
    %c0_i32_1 = arith.constant 0 : i32
    return %c0_i32, %c0_i32_0 : i32, i32
  }
  func.func @transform_1(%arg0: i32) -> (i32, i32) {
    %c0_i32 = arith.constant 0 : i32
    %c0_i32_0 = arith.constant 0 : i32
    %c0_i32_1 = arith.constant 0 : i32
    return %c0_i32, %c0_i32_0 : i32, i32
  }
  func.func @transform_2(%arg0: i32) -> (i32, i32) {
    %c0_i32 = arith.constant 0 : i32
    %c0_i32_0 = arith.constant 0 : i32
    %c0_i32_1 = arith.constant 0 : i32
    return %c0_i32, %c0_i32_0 : i32, i32
  }
  func.func @transform_3(%arg0: i32) -> (i32, i32) {
    %c0_i32 = arith.constant 0 : i32
    %c0_i32_0 = arith.constant 0 : i32
    %c0_i32_1 = arith.constant 0 : i32
    return %c0_i32, %c0_i32_0 : i32, i32
  }
  func.func @transform_4(%arg0: i32) -> (i32, i32) {
    %c0_i32 = arith.constant 0 : i32
    %c0_i32_0 = arith.constant 0 : i32
    %c0_i32_1 = arith.constant 0 : i32
    return %c0_i32, %c0_i32_0 : i32, i32
  }
  func.func @transform_5(%arg0: i32) -> (i32, i32) {
    %c0_i32 = arith.constant 0 : i32
    %c0_i32_0 = arith.constant 0 : i32
    %c0_i32_1 = arith.constant 0 : i32
    return %c0_i32, %c0_i32_0 : i32, i32
  }
}

</mosaic_0001>

<bundles_post_ra>
// kernel: model_forward.4
= control target key start
LH: loop header
LB: loop body
LE: loop exit
PB: predicated region body
PF: predicated region fallthrough
CT: control target
= control target key end

     0   :  { %8 = vsyncpa [#allocation3], 0  ;;  %s2387_s0 = inlined_call_operand.vmem [shape: bf16[1568,9], index: 0, kind: input, shape index: {}]   ;;  %s2388_s1 = inlined_call_operand.hbm [shape: bf16[9,128], index: 1, kind: input, shape index: {}]   ;;  %s2389_s2 = inlined_call_operand.hbm [shape: f32[1,128], index: 2, kind: input, shape index: {}]   ;;  %s2390_s3 = inlined_call_operand.vmem [shape: bf16[1568,128], index: 3, kind: output, shape index: {}]  }
   0x1   :  { %9 = vsyncpa [#allocation5], 0  ;;  %s2084_s12 = smov 0  }
   0x2 LB: > { %s125_s15 = sshll.u32 %s2388_s1, 4  ;;  %s1342_s16 = sadd.s32 4294967295, %s2057_s12   ;;  %s2057_s12 = sphi %s2084_s12, %s15_s12   ;;  %s126_s15 = int_to_ptr.hbm [resolvable:$true] %s125_s15 }
   0x3   : > { %p1344_p0 = scmp.ge.s32.totalorder %s2057_s12, 1  ;;  %p114_p1 = scmp.lt.s32.totalorder %s2057_s12, 3 }
   0x4   : > { %p2095_p2 = scmp.eq.s32.totalorder %s1342_s16, 0  ;;  %s2059_s19 = smov [#allocation2]  }
   0x5   : > { %p2099_p3 = pnand %p1344_p0, %p114_p1  ;;  %s127_s20 = sshll.u32 %s2059_s19, 4  ;;  %s128_s20 = int_to_ptr.vmem [resolvable:$true] %s127_s20 }
   0x6   : > { %s140_s23 = sshll.u32 %s2389_s2, 4  ;;  %s2060_s24 = smov [#allocation4]   ;;  %s141_s23 = int_to_ptr.hbm [resolvable:$true] %s140_s23 }
   0x7   : > { %p1958_p4 = pneg %p2099_p3  ;;  %s142_s25 = sshll.u32 %s2060_s24, 4  ;;  %s143_s25 = int_to_ptr.vmem [resolvable:$true] %s142_s25 }
   0x8   : > { %s2061_s26 = smov 64   ;;  %s2062_s27 = smov 4  }
   0x9   : > { %p1959_p5 = pnand %p2095_p2, %p1958_p4  ;;  %164 = sbr.rel (%p2099_p3) target bundleno = 366 (0x16e), region = 32 }
   0xb   : > { %1961 = dma.hbm_to_vmem [thread:$0]  (!%p1959_p5), %s126_s15, 128, %s128_s20, [#allocation3], %s2061_s26, %s2061_s26, %s2062_s27  }
   0xc   : > { %1964 = dma.hbm_to_vmem [thread:$0]  (!%p1959_p5), %s141_s23, 16, %s143_s25, [#allocation5]  }
   0xe   : > { %2048 = dma.done.wait (%p2095_p2), [#allocation3], 128  }
   0xf   : > { %2050 = vsyncadd (%p2095_p2), [#allocation3], 4294967168 }
  0x10   : > { %2052 = dma.done.wait (%p2095_p2), [#allocation5], 16  }
  0x11   : > { %2054 = vsyncadd (%p2095_p2), [#allocation5], 4294967280  ;;  %vm709_vm0 = vcmask 1043456   ;;  %s194_s28 = smul.u32 98, %s1342_s16  ;;  %vm710_vm1 = vcmask 1044480   ;;  %v2063_v0 = vmov 65535  }
  0x12   : > { %v711_v1 = vsel %vm709_vm0, 4294967295, %v2063_v0  ;;  %v1551_v3 = vld [vmem:[#allocation2] sm:$0xf]  ;;  %v1653_v4 = vld [vmem:[#allocation2] sm:$0x10]  ;;  %vm561_vm2 = vcmask 72704  }
  0x13   : > { %p195_p6 = scmp.lt.s32.totalorder %s194_s28, 195  ;;  %v712_v2 = vsel %vm710_vm1, %v711_v1, 0  ;;  %v1552_v5 = vor.u32 %v1653_v4, %v1551_v3  ;;  %v2197_v44 = vld [vmem:[#allocation4] ss:$0 sm:$0xff] }
  0x15   : > { %s2394_s28 = smov (!%p195_p6, %s194_s28), 195  ;;  %v714_v6 = vand.u32 %v1552_v5, %v712_v2 }
  0x16   : > { %s1351_s29 = sshll.u32 %s2394_s28, 2 }
  0x17   : > { %s2128_s5 = scalar_lea.vmem %s2387_s0, %s1351_s29  ;;  %723 = vmatpush.bf16.msra.mxu0 %v714_v6  ;;  %1947 = vmatpush.bf16.msra.mxu1 %v714_v6  ;;  %s2212_s8 = scalar_lea.vmem %s2390_s3, %s1351_s29 }
  0x18   : > { %v1604_v7 = vld [vmem:[%s2128_s5] sm:$0xff]  ;;  %v1617_v8 = vld [vmem:[%s2128_s5 + $0x68] sm:$0xff]  ;;  %v1630_v9 = vld [vmem:[%s2128_s5 + $0xd0] sm:$0xff]  ;;  %1948 = vmatpush.bf16.msra.mxu2 %v714_v6  ;;  %1949 = vmatpush.bf16.msra.mxu3 %v714_v6 }
  0x19   : > { %v1643_v10 = vld [vmem:[%s2128_s5 + $0x138] sm:$0xff]  ;;  %v1605_v11 = vld [vmem:[%s2128_s5 + $0x8] sm:$0xff]  ;;  %v1618_v12 = vld [vmem:[%s2128_s5 + $0x70] sm:$0xff] }
  0x1a   : > { %1553 = vmatmul.msk.bf16.vlgmr.msra.gmra.mxu0 %vm561_vm2, %v1604_v7  ;;  %1566 = vmatmul.msk.bf16.vlgmr.msra.gmra.mxu1 %vm561_vm2, %v1617_v8  ;;  %v1631_v13 = vld [vmem:[%s2128_s5 + $0xd8] sm:$0xff]  ;;  %v1644_v14 = vld [vmem:[%s2128_s5 + $0x140] sm:$0xff]  ;;  %v1606_v15 = vld [vmem:[%s2128_s5 + $0x10] sm:$0xff] }
  0x1b   : > { %1579 = vmatmul.msk.bf16.vlgmr.msra.gmra.mxu2 %vm561_vm2, %v1630_v9  ;;  %1592 = vmatmul.msk.bf16.vlgmr.msra.gmra.mxu3 %vm561_vm2, %v1643_v10  ;;  %v1619_v16 = vld [vmem:[%s2128_s5 + $0x78] sm:$0xff]  ;;  %v1632_v17 = vld [vmem:[%s2128_s5 + $0xe0] sm:$0xff]  ;;  %v1645_v18 = vld [vmem:[%s2128_s5 + $0x148] sm:$0xff] }
  0x1c   : > { %v1607_v19 = vld [vmem:[%s2128_s5 + $0x18] sm:$0xff]  ;;  %v1620_v20 = vld [vmem:[%s2128_s5 + $0x80] sm:$0xff]  ;;  %v1633_v21 = vld [vmem:[%s2128_s5 + $0xe8] sm:$0xff] }
  0x1d   : > { %v1646_v22 = vld [vmem:[%s2128_s5 + $0x150] sm:$0xff]  ;;  %v1608_v23 = vld [vmem:[%s2128_s5 + $0x20] sm:$0xff]  ;;  %v1621_v24 = vld [vmem:[%s2128_s5 + $0x88] sm:$0xff] }
  0x1e   : > { %v1634_v25 = vld [vmem:[%s2128_s5 + $0xf0] sm:$0xff]  ;;  %v1647_v26 = vld [vmem:[%s2128_s5 + $0x158] sm:$0xff]  ;;  %v1609_v27 = vld [vmem:[%s2128_s5 + $0x28] sm:$0xff] }
  0x1f   : > { %v1622_v28 = vld [vmem:[%s2128_s5 + $0x90] sm:$0xff]  ;;  %v1635_v29 = vld [vmem:[%s2128_s5 + $0xf8] sm:$0xff]  ;;  %v1648_v30 = vld [vmem:[%s2128_s5 + $0x160] sm:$0xff] }
  0x20   : > { %v1610_v31 = vld [vmem:[%s2128_s5 + $0x30] sm:$0xff]  ;;  %v1623_v32 = vld [vmem:[%s2128_s5 + $0x98] sm:$0xff]  ;;  %v1636_v33 = vld [vmem:[%s2128_s5 + $0x100] sm:$0xff] }
  0x21   : > { %v1649_v34 = vld [vmem:[%s2128_s5 + $0x168] sm:$0xff]  ;;  %v1611_v35 = vld [vmem:[%s2128_s5 + $0x38] sm:$0xff]  ;;  %v1624_v36 = vld [vmem:[%s2128_s5 + $0xa0] sm:$0xff] }
  0x22   : > { %v1637_v37 = vld [vmem:[%s2128_s5 + $0x108] sm:$0xff]  ;;  %v1650_v38 = vld [vmem:[%s2128_s5 + $0x170] sm:$0xff]  ;;  %v1612_v39 = vld [vmem:[%s2128_s5 + $0x40] sm:$0xff] }
  0x23   : > { %v1625_v40 = vld [vmem:[%s2128_s5 + $0xa8] sm:$0xff]  ;;  %v1638_v43 = vld [vmem:[%s2128_s5 + $0x110] sm:$0xff]  ;;  %v1651_v52 = vld [vmem:[%s2128_s5 + $0x178] sm:$0xff] }
  0x24   : > { %v1613_v61 = vld [vmem:[%s2128_s5 + $0x48] sm:$0xff]  ;;  %v1626_v62 = vld [vmem:[%s2128_s5 + $0xb0] sm:$0xff]  ;;  %v1639_v3 = vld [vmem:[%s2128_s5 + $0x118] sm:$0xff] }
  0x2a   : > { %1554 = vmatmul.msk.bf16.gmra.mxu0 %vm561_vm2, %v1605_v11  ;;  %1567 = vmatmul.msk.bf16.gmra.mxu1 %vm561_vm2, %v1618_v12 }
  0x2b   : > { %1580 = vmatmul.msk.bf16.gmra.mxu2 %vm561_vm2, %v1631_v13  ;;  %1593 = vmatmul.msk.bf16.gmra.mxu3 %vm561_vm2, %v1644_v14 }
  0x3a   : > { %1555 = vmatmul.msk.bf16.gmra.mxu0 %vm561_vm2, %v1606_v15  ;;  %1568 = vmatmul.msk.bf16.gmra.mxu1 %vm561_vm2, %v1619_v16 }
  0x3b   : > { %1581 = vmatmul.msk.bf16.gmra.mxu2 %vm561_vm2, %v1632_v17  ;;  %1594 = vmatmul.msk.bf16.gmra.mxu3 %vm561_vm2, %v1645_v18 }
  0x4a   : > { %1556 = vmatmul.msk.bf16.gmra.mxu0 %vm561_vm2, %v1607_v19  ;;  %1569 = vmatmul.msk.bf16.gmra.mxu1 %vm561_vm2, %v1620_v20  ;;  %v1652_v19 = vld [vmem:[%s2128_s5 + $0x180] sm:$0xff] }
  0x4b   : > { %1582 = vmatmul.msk.bf16.gmra.mxu2 %vm561_vm2, %v1633_v21  ;;  %1595 = vmatmul.msk.bf16.gmra.mxu3 %vm561_vm2, %v1646_v22 }
  0x5a   : > { %1557 = vmatmul.msk.bf16.gmra.mxu0 %vm561_vm2, %v1608_v23  ;;  %1570 = vmatmul.msk.bf16.gmra.mxu1 %vm561_vm2, %v1621_v24 }
  0x5b   : > { %1583 = vmatmul.msk.bf16.gmra.mxu2 %vm561_vm2, %v1634_v25  ;;  %1596 = vmatmul.msk.bf16.gmra.mxu3 %vm561_vm2, %v1647_v26 }
  0x6a   : > { %1558 = vmatmul.msk.bf16.gmra.mxu0 %vm561_vm2, %v1609_v27  ;;  %1571 = vmatmul.msk.bf16.gmra.mxu1 %vm561_vm2, %v1622_v28 }
  0x6b   : > { %1584 = vmatmul.msk.bf16.gmra.mxu2 %vm561_vm2, %v1635_v29  ;;  %1597 = vmatmul.msk.bf16.gmra.mxu3 %vm561_vm2, %v1648_v30  ;;  %v1614_v29 = vld [vmem:[%s2128_s5 + $0x50] sm:$0xff]  ;;  %v1627_v30 = vld [vmem:[%s2128_s5 + $0xb8] sm:$0xff] }
  0x7a   : > { %1559 = vmatmul.msk.bf16.gmra.mxu0 %vm561_vm2, %v1610_v31  ;;  %1572 = vmatmul.msk.bf16.gmra.mxu1 %vm561_vm2, %v1623_v32 }
  0x7b   : > { %1585 = vmatmul.msk.bf16.gmra.mxu2 %vm561_vm2, %v1636_v33  ;;  %1598 = vmatmul.msk.bf16.gmra.mxu3 %vm561_vm2, %v1649_v34 }
  0x8a   : > { %1560 = vmatmul.msk.bf16.gmra.mxu0 %vm561_vm2, %v1611_v35  ;;  %1573 = vmatmul.msk.bf16.gmra.mxu1 %vm561_vm2, %v1624_v36  ;;  %v1640_v35 = vld [vmem:[%s2128_s5 + $0x120] sm:$0xff] }
  0x8b   : > { %1586 = vmatmul.msk.bf16.gmra.mxu2 %vm561_vm2, %v1637_v37  ;;  %1599 = vmatmul.msk.bf16.gmra.mxu3 %vm561_vm2, %v1650_v38 }
  0x97   : > { %v725_v41 = vpop.f32.mrf.mxu0  ;;  %v790_v42 = vpop.f32.mrf.mxu1 }
  0x98   : > { %v726_v45 = vadd.f32 %v2197_v44, %v725_v41  ;;  %v791_v46 = vadd.f32 %v2197_v44, %v790_v42 }
  0x9a   : > { %1561 = vmatmul.msk.bf16.gmra.mxu0 %vm561_vm2, %v1612_v39  ;;  %1574 = vmatmul.msk.bf16.gmra.mxu1 %vm561_vm2, %v1625_v40  ;;  %v970_v53 = vmax.f32 %v726_v45, 0.0  ;;  %v996_v54 = vmax.f32 %v791_v46, 0.0 }
  0x9b   : > { %1587 = vmatmul.msk.bf16.gmra.mxu2 %vm561_vm2, %v1638_v43  ;;  %1600 = vmatmul.msk.bf16.gmra.mxu3 %vm561_vm2, %v1651_v52 }
  0x9e   : > { %v855_v47 = vpop.f32.mrf.mxu2  ;;  %v920_v63 = vpop.f32.mrf.mxu3 }
  0x9f   : > { %v727_v48 = vpop.f32.mrf.mxu0  ;;  %v792_v49 = vpop.f32.mrf.mxu1  ;;  %v856_v59 = vadd.f32 %v2197_v44, %v855_v47  ;;  %v921_v7 = vadd.f32 %v2197_v44, %v920_v63 }
  0xa0   : > { %v728_v50 = vadd.f32 %v2197_v44, %v727_v48  ;;  %v793_v51 = vadd.f32 %v2197_v44, %v792_v49 }
  0xa1   : > { %v1022_v4 = vmax.f32 %v856_v59, 0.0  ;;  %v1048_v14 = vmax.f32 %v921_v7, 0.0 }
  0xa2   : > { %v971_v55 = vmax.f32 %v728_v50, 0.0  ;;  %v997_v56 = vmax.f32 %v793_v51, 0.0 }
  0xa4   : > { %v1657_v57 = vpack.c.bf16 %v971_v55, %v970_v53  ;;  %v1722_v58 = vpack.c.bf16 %v997_v56, %v996_v54 }
  0xa6   : > { %1658 = vst [vmem:[%s2212_s8] sm:$0xff] %v1657_v57   ;;  %v857_v60 = vpop.f32.mrf.mxu2  ;;  %v922_v11 = vpop.f32.mrf.mxu3 }
  0xa7   : > { %1911 = vst [vmem:[%s2212_s8 + $0x68] sm:$0xff] %v1722_v58   ;;  %v858_v0 = vadd.f32 %v2197_v44, %v857_v60  ;;  %v730_v1 = vpop.f32.mrf.mxu0  ;;  %v795_v2 = vpop.f32.mrf.mxu1  ;;  %v923_v15 = vadd.f32 %v2197_v44, %v922_v11 }
  0xa8   : > { %v731_v8 = vadd.f32 %v2197_v44, %v730_v1  ;;  %v796_v9 = vadd.f32 %v2197_v44, %v795_v2 }
  0xa9   : > { %v1023_v5 = vmax.f32 %v858_v0, 0.0  ;;  %v1049_v18 = vmax.f32 %v923_v15, 0.0 }
  0xaa   : > { %1562 = vmatmul.msk.bf16.gmra.mxu0 %vm561_vm2, %v1613_v61  ;;  %1575 = vmatmul.msk.bf16.gmra.mxu1 %vm561_vm2, %v1626_v62  ;;  %v972_v20 = vmax.f32 %v731_v8, 0.0  ;;  %v998_v21 = vmax.f32 %v796_v9, 0.0  ;;  %v1615_v61 = vld [vmem:[%s2128_s5 + $0x58] sm:$0xff]  ;;  %v1628_v62 = vld [vmem:[%s2128_s5 + $0xc0] sm:$0xff] }
  0xab   : > { %v1787_v6 = vpack.c.bf16 %v1023_v5, %v1022_v4  ;;  %1588 = vmatmul.msk.bf16.gmra.mxu2 %vm561_vm2, %v1639_v3  ;;  %v1852_v24 = vpack.c.bf16 %v1049_v18, %v1048_v14  ;;  %1601 = vmatmul.msk.bf16.gmra.mxu3 %vm561_vm2, %v1652_v19  ;;  %v1641_v3 = vld [vmem:[%s2128_s5 + $0x128] sm:$0xff] }
  0xad   : > { %1924 = vst [vmem:[%s2212_s8 + $0xd0] sm:$0xff] %v1787_v6  }
  0xae   : > { %v860_v10 = vpop.f32.mrf.mxu2  ;;  %1937 = vst [vmem:[%s2212_s8 + $0x138] sm:$0xff] %v1852_v24   ;;  %v925_v31 = vpop.f32.mrf.mxu3 }
  0xaf   : > { %v732_v12 = vpop.f32.mrf.mxu0  ;;  %v797_v13 = vpop.f32.mrf.mxu1  ;;  %v861_v27 = vadd.f32 %v2197_v44, %v860_v10  ;;  %v926_v39 = vadd.f32 %v2197_v44, %v925_v31 }
  0xb0   : > { %v733_v16 = vadd.f32 %v2197_v44, %v732_v12  ;;  %v798_v17 = vadd.f32 %v2197_v44, %v797_v13 }
  0xb1   : > { %v1024_v36 = vmax.f32 %v861_v27, 0.0  ;;  %v1050_v47 = vmax.f32 %v926_v39, 0.0 }
  0xb2   : > { %v973_v22 = vmax.f32 %v733_v16, 0.0  ;;  %v999_v23 = vmax.f32 %v798_v17, 0.0 }
  0xb4   : > { %v1662_v25 = vpack.c.bf16 %v973_v22, %v972_v20  ;;  %v1727_v26 = vpack.c.bf16 %v999_v23, %v998_v21 }
  0xb6   : > { %1899 = vst [vmem:[%s2212_s8 + $0x8] sm:$0xff] %v1662_v25   ;;  %v862_v28 = vpop.f32.mrf.mxu2  ;;  %v927_v43 = vpop.f32.mrf.mxu3 }
  0xb7   : > { %1912 = vst [vmem:[%s2212_s8 + $0x70] sm:$0xff] %v1727_v26   ;;  %v863_v32 = vadd.f32 %v2197_v44, %v862_v28  ;;  %v735_v33 = vpop.f32.mrf.mxu0  ;;  %v800_v34 = vpop.f32.mrf.mxu1  ;;  %v928_v48 = vadd.f32 %v2197_v44, %v927_v43  ;;  %v1616_v28 = vld [vmem:[%s2128_s5 + $0x60] sm:$0xff] }
  0xb8   : > { %v736_v40 = vadd.f32 %v2197_v44, %v735_v33  ;;  %v801_v41 = vadd.f32 %v2197_v44, %v800_v34  ;;  %v1642_v34 = vld [vmem:[%s2128_s5 + $0x130] sm:$0xff] }
  0xb9   : > { %v1025_v37 = vmax.f32 %v863_v32, 0.0  ;;  %v1051_v51 = vmax.f32 %v928_v48, 0.0 }
  0xba   : > { %1563 = vmatmul.msk.bf16.gmra.mxu0 %vm561_vm2, %v1614_v29  ;;  %1576 = vmatmul.msk.bf16.gmra.mxu1 %vm561_vm2, %v1627_v30  ;;  %v974_v52 = vmax.f32 %v736_v40, 0.0  ;;  %v1000_v53 = vmax.f32 %v801_v41, 0.0  ;;  %v1629_v29 = vld [vmem:[%s2128_s5 + $0xc8] sm:$0xff] }
  0xbb   : > { %v1792_v38 = vpack.c.bf16 %v1025_v37, %v1024_v36  ;;  %1589 = vmatmul.msk.bf16.gmra.mxu2 %vm561_vm2, %v1640_v35  ;;  %v1857_v56 = vpack.c.bf16 %v1051_v51, %v1050_v47 }
  0xbd   : > { %1925 = vst [vmem:[%s2212_s8 + $0xd8] sm:$0xff] %v1792_v38  }
  0xbe   : > { %v865_v42 = vpop.f32.mrf.mxu2  ;;  %1938 = vst [vmem:[%s2212_s8 + $0x140] sm:$0xff] %v1857_v56   ;;  %v930_v63 = vpop.f32.mrf.mxu3 }
  0xbf   : > { %v737_v45 = vpop.f32.mrf.mxu0  ;;  %v802_v46 = vpop.f32.mrf.mxu1  ;;  %v866_v59 = vadd.f32 %v2197_v44, %v865_v42  ;;  %v931_v7 = vadd.f32 %v2197_v44, %v930_v63 }
  0xc0   : > { %v738_v49 = vadd.f32 %v2197_v44, %v737_v45  ;;  %v803_v50 = vadd.f32 %v2197_v44, %v802_v46 }
  0xc1   : > { %v1026_v4 = vmax.f32 %v866_v59, 0.0  ;;  %v1052_v14 = vmax.f32 %v931_v7, 0.0 }
  0xc2   : > { %v975_v54 = vmax.f32 %v738_v49, 0.0  ;;  %v1001_v55 = vmax.f32 %v803_v50, 0.0 }
  0xc4   : > { %v1667_v57 = vpack.c.bf16 %v975_v54, %v974_v52  ;;  %v1732_v58 = vpack.c.bf16 %v1001_v55, %v1000_v53 }
  0xc6   : > { %1900 = vst [vmem:[%s2212_s8 + $0x10] sm:$0xff] %v1667_v57   ;;  %v867_v60 = vpop.f32.mrf.mxu2  ;;  %v932_v11 = vpop.f32.mrf.mxu3 }
  0xc7   : > { %1913 = vst [vmem:[%s2212_s8 + $0x78] sm:$0xff] %v1732_v58   ;;  %v868_v0 = vadd.f32 %v2197_v44, %v867_v60  ;;  %v740_v1 = vpop.f32.mrf.mxu0  ;;  %v805_v2 = vpop.f32.mrf.mxu1  ;;  %v933_v15 = vadd.f32 %v2197_v44, %v932_v11 }
  0xc8   : > { %v741_v8 = vadd.f32 %v2197_v44, %v740_v1  ;;  %v806_v9 = vadd.f32 %v2197_v44, %v805_v2 }
  0xc9   : > { %v1027_v5 = vmax.f32 %v868_v0, 0.0  ;;  %v1053_v18 = vmax.f32 %v933_v15, 0.0 }
  0xca   : > { %1564 = vmatmul.msk.bf16.gmra.mxu0 %vm561_vm2, %v1615_v61  ;;  %1577 = vmatmul.msk.bf16.gmra.mxu1 %vm561_vm2, %v1628_v62  ;;  %v976_v19 = vmax.f32 %v741_v8, 0.0  ;;  %v1002_v20 = vmax.f32 %v806_v9, 0.0 }
  0xcb   : > { %v1797_v6 = vpack.c.bf16 %v1027_v5, %v1026_v4  ;;  %1590 = vmatmul.msk.bf16.gmra.mxu2 %vm561_vm2, %v1641_v3  ;;  %v1862_v23 = vpack.c.bf16 %v1053_v18, %v1052_v14 }
  0xcd   : > { %1926 = vst [vmem:[%s2212_s8 + $0xe0] sm:$0xff] %v1797_v6  }
  0xce   : > { %v870_v10 = vpop.f32.mrf.mxu2  ;;  %1939 = vst [vmem:[%s2212_s8 + $0x148] sm:$0xff] %v1862_v23   ;;  %v935_v30 = vpop.f32.mrf.mxu3 }
  0xcf   : > { %v742_v12 = vpop.f32.mrf.mxu0  ;;  %v807_v13 = vpop.f32.mrf.mxu1  ;;  %v871_v26 = vadd.f32 %v2197_v44, %v870_v10  ;;  %v936_v38 = vadd.f32 %v2197_v44, %v935_v30 }
  0xd0   : > { %v743_v16 = vadd.f32 %v2197_v44, %v742_v12  ;;  %v808_v17 = vadd.f32 %v2197_v44, %v807_v13 }
  0xd1   : > { %v1028_v35 = vmax.f32 %v871_v26, 0.0  ;;  %v1054_v46 = vmax.f32 %v936_v38, 0.0 }
  0xd2   : > { %v977_v21 = vmax.f32 %v743_v16, 0.0  ;;  %v1003_v22 = vmax.f32 %v808_v17, 0.0 }
  0xd4   : > { %v1672_v24 = vpack.c.bf16 %v977_v21, %v976_v19  ;;  %v1737_v25 = vpack.c.bf16 %v1003_v22, %v1002_v20 }
  0xd6   : > { %1901 = vst [vmem:[%s2212_s8 + $0x18] sm:$0xff] %v1672_v24   ;;  %v872_v27 = vpop.f32.mrf.mxu2  ;;  %v937_v42 = vpop.f32.mrf.mxu3 }
  0xd7   : > { %1914 = vst [vmem:[%s2212_s8 + $0x80] sm:$0xff] %v1737_v25   ;;  %v873_v31 = vadd.f32 %v2197_v44, %v872_v27  ;;  %v745_v32 = vpop.f32.mrf.mxu0  ;;  %v810_v33 = vpop.f32.mrf.mxu1  ;;  %v938_v47 = vadd.f32 %v2197_v44, %v937_v42 }
  0xd8   : > { %v746_v39 = vadd.f32 %v2197_v44, %v745_v32  ;;  %v811_v40 = vadd.f32 %v2197_v44, %v810_v33 }
  0xd9   : > { %v1029_v36 = vmax.f32 %v873_v31, 0.0  ;;  %v1055_v50 = vmax.f32 %v938_v47, 0.0 }
  0xda   : > { %1565 = vmatmul.msk.bf16.gmra.mxu0 %vm561_vm2, %v1616_v28  ;;  %1578 = vmatmul.msk.bf16.gmra.mxu1 %vm561_vm2, %v1629_v29  ;;  %v978_v51 = vmax.f32 %v746_v39, 0.0  ;;  %v1004_v52 = vmax.f32 %v811_v40, 0.0 }
  0xdb   : > { %v1802_v37 = vpack.c.bf16 %v1029_v36, %v1028_v35  ;;  %1591 = vmatmul.msk.bf16.gmra.mxu2 %vm561_vm2, %v1642_v34  ;;  %v1867_v55 = vpack.c.bf16 %v1055_v50, %v1054_v46 }
  0xdd   : > { %1927 = vst [vmem:[%s2212_s8 + $0xe8] sm:$0xff] %v1802_v37  }
  0xde   : > { %v875_v41 = vpop.f32.mrf.mxu2  ;;  %1940 = vst [vmem:[%s2212_s8 + $0x150] sm:$0xff] %v1867_v55   ;;  %v940_v60 = vpop.f32.mrf.mxu3 }
  0xdf   : > { %v747_v43 = vpop.f32.mrf.mxu0  ;;  %v812_v45 = vpop.f32.mrf.mxu1  ;;  %v876_v58 = vadd.f32 %v2197_v44, %v875_v41  ;;  %v941_v3 = vadd.f32 %v2197_v44, %v940_v60 }
  0xe0   : > { %v748_v48 = vadd.f32 %v2197_v44, %v747_v43  ;;  %v813_v49 = vadd.f32 %v2197_v44, %v812_v45 }
  0xe1   : > { %v1030_v0 = vmax.f32 %v876_v58, 0.0  ;;  %v1056_v10 = vmax.f32 %v941_v3, 0.0 }
  0xe2   : > { %v979_v53 = vmax.f32 %v748_v48, 0.0  ;;  %v1005_v54 = vmax.f32 %v813_v49, 0.0 }
  0xe4   : > { %v1677_v56 = vpack.c.bf16 %v979_v53, %v978_v51  ;;  %v1742_v57 = vpack.c.bf16 %v1005_v54, %v1004_v52 }
  0xe6   : > { %1902 = vst [vmem:[%s2212_s8 + $0x20] sm:$0xff] %v1677_v56   ;;  %v877_v59 = vpop.f32.mrf.mxu2  ;;  %v942_v7 = vpop.f32.mrf.mxu3 }
  0xe7   : > { %1915 = vst [vmem:[%s2212_s8 + $0x88] sm:$0xff] %v1742_v57   ;;  %v878_v61 = vadd.f32 %v2197_v44, %v877_v59  ;;  %v750_v62 = vpop.f32.mrf.mxu0  ;;  %v815_v63 = vpop.f32.mrf.mxu1  ;;  %v943_v11 = vadd.f32 %v2197_v44, %v942_v7 }
  0xe8   : > { %v751_v4 = vadd.f32 %v2197_v44, %v750_v62  ;;  %v816_v5 = vadd.f32 %v2197_v44, %v815_v63 }
  0xe9   : > { %v1031_v1 = vmax.f32 %v878_v61, 0.0  ;;  %v1057_v14 = vmax.f32 %v943_v11, 0.0 }
  0xea   : > { %v980_v15 = vmax.f32 %v751_v4, 0.0  ;;  %v1006_v16 = vmax.f32 %v816_v5, 0.0 }
  0xeb   : > { %v1807_v2 = vpack.c.bf16 %v1031_v1, %v1030_v0  ;;  %v1872_v19 = vpack.c.bf16 %v1057_v14, %v1056_v10 }
  0xed   : > { %1928 = vst [vmem:[%s2212_s8 + $0xf0] sm:$0xff] %v1807_v2  }
  0xee   : > { %v880_v6 = vpop.f32.mrf.mxu2  ;;  %1941 = vst [vmem:[%s2212_s8 + $0x158] sm:$0xff] %v1872_v19   ;;  %v945_v24 = vpop.f32.mrf.mxu3 }
  0xef   : > { %v752_v8 = vpop.f32.mrf.mxu0  ;;  %v817_v9 = vpop.f32.mrf.mxu1  ;;  %v881_v22 = vadd.f32 %v2197_v44, %v880_v6  ;;  %v946_v31 = vadd.f32 %v2197_v44, %v945_v24 }
  0xf0   : > { %v753_v12 = vadd.f32 %v2197_v44, %v752_v8  ;;  %v818_v13 = vadd.f32 %v2197_v44, %v817_v9 }
  0xf1   : > { %v1032_v28 = vmax.f32 %v881_v22, 0.0  ;;  %v1058_v38 = vmax.f32 %v946_v31, 0.0 }
  0xf2   : > { %v981_v17 = vmax.f32 %v753_v12, 0.0  ;;  %v1007_v18 = vmax.f32 %v818_v13, 0.0 }
  0xf4   : > { %v1682_v20 = vpack.c.bf16 %v981_v17, %v980_v15  ;;  %v1747_v21 = vpack.c.bf16 %v1007_v18, %v1006_v16 }
  0xf6   : > { %1903 = vst [vmem:[%s2212_s8 + $0x28] sm:$0xff] %v1682_v20   ;;  %v882_v23 = vpop.f32.mrf.mxu2  ;;  %v947_v35 = vpop.f32.mrf.mxu3 }
  0xf7   : > { %1916 = vst [vmem:[%s2212_s8 + $0x90] sm:$0xff] %v1747_v21   ;;  %v883_v25 = vadd.f32 %v2197_v44, %v882_v23  ;;  %v755_v26 = vpop.f32.mrf.mxu0  ;;  %v820_v27 = vpop.f32.mrf.mxu1  ;;  %v948_v39 = vadd.f32 %v2197_v44, %v947_v35 }
  0xf8   : > { %v756_v32 = vadd.f32 %v2197_v44, %v755_v26  ;;  %v821_v33 = vadd.f32 %v2197_v44, %v820_v27 }
  0xf9   : > { %v1033_v29 = vmax.f32 %v883_v25, 0.0  ;;  %v1059_v42 = vmax.f32 %v948_v39, 0.0 }
  0xfa   : > { %v982_v43 = vmax.f32 %v756_v32, 0.0  ;;  %v1008_v45 = vmax.f32 %v821_v33, 0.0 }
  0xfb   : > { %v1812_v30 = vpack.c.bf16 %v1033_v29, %v1032_v28  ;;  %v1877_v48 = vpack.c.bf16 %v1059_v42, %v1058_v38 }
  0xfd   : > { %1929 = vst [vmem:[%s2212_s8 + $0xf8] sm:$0xff] %v1812_v30  }
  0xfe   : > { %v885_v34 = vpop.f32.mrf.mxu2  ;;  %1942 = vst [vmem:[%s2212_s8 + $0x160] sm:$0xff] %v1877_v48   ;;  %v950_v53 = vpop.f32.mrf.mxu3 }
  0xff   : > { %v757_v36 = vpop.f32.mrf.mxu0  ;;  %v822_v37 = vpop.f32.mrf.mxu1  ;;  %v886_v51 = vadd.f32 %v2197_v44, %v885_v34  ;;  %v951_v60 = vadd.f32 %v2197_v44, %v950_v53 }
 0x100   : > { %v758_v40 = vadd.f32 %v2197_v44, %v757_v36  ;;  %v823_v41 = vadd.f32 %v2197_v44, %v822_v37 }
 0x101   : > { %v1034_v57 = vmax.f32 %v886_v51, 0.0  ;;  %v1060_v3 = vmax.f32 %v951_v60, 0.0 }
 0x102   : > { %v983_v46 = vmax.f32 %v758_v40, 0.0  ;;  %v1009_v47 = vmax.f32 %v823_v41, 0.0 }
 0x104   : > { %v1687_v49 = vpack.c.bf16 %v983_v46, %v982_v43  ;;  %v1752_v50 = vpack.c.bf16 %v1009_v47, %v1008_v45 }
 0x106   : > { %1904 = vst [vmem:[%s2212_s8 + $0x30] sm:$0xff] %v1687_v49   ;;  %v887_v52 = vpop.f32.mrf.mxu2  ;;  %v952_v0 = vpop.f32.mrf.mxu3 }
 0x107   : > { %1917 = vst [vmem:[%s2212_s8 + $0x98] sm:$0xff] %v1752_v50   ;;  %v888_v54 = vadd.f32 %v2197_v44, %v887_v52  ;;  %v760_v55 = vpop.f32.mrf.mxu0  ;;  %v825_v56 = vpop.f32.mrf.mxu1  ;;  %v953_v4 = vadd.f32 %v2197_v44, %v952_v0 }
 0x108   : > { %v761_v61 = vadd.f32 %v2197_v44, %v760_v55  ;;  %v826_v62 = vadd.f32 %v2197_v44, %v825_v56 }
 0x109   : > { %v1035_v58 = vmax.f32 %v888_v54, 0.0  ;;  %v1061_v7 = vmax.f32 %v953_v4, 0.0 }
 0x10a   : > { %v984_v8 = vmax.f32 %v761_v61, 0.0  ;;  %v1010_v9 = vmax.f32 %v826_v62, 0.0 }
 0x10b   : > { %v1817_v59 = vpack.c.bf16 %v1035_v58, %v1034_v57  ;;  %v1882_v12 = vpack.c.bf16 %v1061_v7, %v1060_v3 }
 0x10d   : > { %1930 = vst [vmem:[%s2212_s8 + $0x100] sm:$0xff] %v1817_v59  }
 0x10e   : > { %v890_v63 = vpop.f32.mrf.mxu2  ;;  %1943 = vst [vmem:[%s2212_s8 + $0x168] sm:$0xff] %v1882_v12   ;;  %v955_v17 = vpop.f32.mrf.mxu3 }
 0x10f   : > { %v762_v1 = vpop.f32.mrf.mxu0  ;;  %v827_v2 = vpop.f32.mrf.mxu1  ;;  %v891_v15 = vadd.f32 %v2197_v44, %v890_v63  ;;  %v956_v24 = vadd.f32 %v2197_v44, %v955_v17 }
 0x110   : > { %v763_v5 = vadd.f32 %v2197_v44, %v762_v1  ;;  %v828_v6 = vadd.f32 %v2197_v44, %v827_v2 }
 0x111   : > { %v1036_v21 = vmax.f32 %v891_v15, 0.0  ;;  %v1062_v31 = vmax.f32 %v956_v24, 0.0 }
 0x112   : > { %v985_v10 = vmax.f32 %v763_v5, 0.0  ;;  %v1011_v11 = vmax.f32 %v828_v6, 0.0 }
 0x114   : > { %v1692_v13 = vpack.c.bf16 %v985_v10, %v984_v8  ;;  %v1757_v14 = vpack.c.bf16 %v1011_v11, %v1010_v9 }
 0x116   : > { %1905 = vst [vmem:[%s2212_s8 + $0x38] sm:$0xff] %v1692_v13   ;;  %v892_v16 = vpop.f32.mrf.mxu2  ;;  %v957_v28 = vpop.f32.mrf.mxu3 }
 0x117   : > { %1918 = vst [vmem:[%s2212_s8 + $0xa0] sm:$0xff] %v1757_v14   ;;  %v893_v18 = vadd.f32 %v2197_v44, %v892_v16  ;;  %v765_v19 = vpop.f32.mrf.mxu0  ;;  %v830_v20 = vpop.f32.mrf.mxu1  ;;  %v958_v32 = vadd.f32 %v2197_v44, %v957_v28 }
 0x118   : > { %v766_v25 = vadd.f32 %v2197_v44, %v765_v19  ;;  %v831_v26 = vadd.f32 %v2197_v44, %v830_v20 }
 0x119   : > { %v1037_v22 = vmax.f32 %v893_v18, 0.0  ;;  %v1063_v35 = vmax.f32 %v958_v32, 0.0 }
 0x11a   : > { %v986_v36 = vmax.f32 %v766_v25, 0.0  ;;  %v1012_v37 = vmax.f32 %v831_v26, 0.0 }
 0x11b   : > { %v1822_v23 = vpack.c.bf16 %v1037_v22, %v1036_v21  ;;  %v1887_v40 = vpack.c.bf16 %v1063_v35, %v1062_v31 }
 0x11d   : > { %1931 = vst [vmem:[%s2212_s8 + $0x108] sm:$0xff] %v1822_v23  }
 0x11e   : > { %v895_v27 = vpop.f32.mrf.mxu2  ;;  %1944 = vst [vmem:[%s2212_s8 + $0x170] sm:$0xff] %v1887_v40   ;;  %v960_v46 = vpop.f32.mrf.mxu3 }
 0x11f   : > { %v767_v29 = vpop.f32.mrf.mxu0  ;;  %v832_v30 = vpop.f32.mrf.mxu1  ;;  %v896_v43 = vadd.f32 %v2197_v44, %v895_v27  ;;  %v961_v53 = vadd.f32 %v2197_v44, %v960_v46 }
 0x120   : > { %v768_v33 = vadd.f32 %v2197_v44, %v767_v29  ;;  %v833_v34 = vadd.f32 %v2197_v44, %v832_v30 }
 0x121   : > { %v1038_v50 = vmax.f32 %v896_v43, 0.0  ;;  %v1064_v60 = vmax.f32 %v961_v53, 0.0 }
 0x122   : > { %v987_v38 = vmax.f32 %v768_v33, 0.0  ;;  %v1013_v39 = vmax.f32 %v833_v34, 0.0 }
 0x124   : > { %v1697_v41 = vpack.c.bf16 %v987_v38, %v986_v36  ;;  %v1762_v42 = vpack.c.bf16 %v1013_v39, %v1012_v37 }
 0x126   : > { %1906 = vst [vmem:[%s2212_s8 + $0x40] sm:$0xff] %v1697_v41   ;;  %v897_v45 = vpop.f32.mrf.mxu2  ;;  %v962_v57 = vpop.f32.mrf.mxu3 }
 0x127   : > { %1919 = vst [vmem:[%s2212_s8 + $0xa8] sm:$0xff] %v1762_v42   ;;  %v898_v47 = vadd.f32 %v2197_v44, %v897_v45  ;;  %v770_v48 = vpop.f32.mrf.mxu0  ;;  %v835_v49 = vpop.f32.mrf.mxu1  ;;  %v963_v61 = vadd.f32 %v2197_v44, %v962_v57 }
 0x128   : > { %v771_v54 = vadd.f32 %v2197_v44, %v770_v48  ;;  %v836_v55 = vadd.f32 %v2197_v44, %v835_v49 }
 0x129   : > { %v1039_v51 = vmax.f32 %v898_v47, 0.0  ;;  %v1065_v0 = vmax.f32 %v963_v61, 0.0 }
 0x12a   : > { %v988_v1 = vmax.f32 %v771_v54, 0.0  ;;  %v1014_v2 = vmax.f32 %v836_v55, 0.0 }
 0x12b   : > { %v1827_v52 = vpack.c.bf16 %v1039_v51, %v1038_v50  ;;  %v1892_v5 = vpack.c.bf16 %v1065_v0, %v1064_v60 }
 0x12d   : > { %1932 = vst [vmem:[%s2212_s8 + $0x110] sm:$0xff] %v1827_v52  }
 0x12e   : > { %v900_v56 = vpop.f32.mrf.mxu2  ;;  %1945 = vst [vmem:[%s2212_s8 + $0x178] sm:$0xff] %v1892_v5   ;;  %v965_v10 = vpop.f32.mrf.mxu3 }
 0x12f   : > { %v772_v58 = vpop.f32.mrf.mxu0  ;;  %v837_v59 = vpop.f32.mrf.mxu1  ;;  %v901_v8 = vadd.f32 %v2197_v44, %v900_v56  ;;  %v966_v17 = vadd.f32 %v2197_v44, %v965_v10 }
 0x130   : > { %v773_v62 = vadd.f32 %v2197_v44, %v772_v58  ;;  %v838_v63 = vadd.f32 %v2197_v44, %v837_v59 }
 0x131   : > { %v1040_v14 = vmax.f32 %v901_v8, 0.0  ;;  %v1066_v24 = vmax.f32 %v966_v17, 0.0 }
 0x132   : > { %v989_v3 = vmax.f32 %v773_v62, 0.0  ;;  %v1015_v4 = vmax.f32 %v838_v63, 0.0 }
 0x134   : > { %v1702_v6 = vpack.c.bf16 %v989_v3, %v988_v1  ;;  %v1767_v7 = vpack.c.bf16 %v1015_v4, %v1014_v2 }
 0x136   : > { %1907 = vst [vmem:[%s2212_s8 + $0x48] sm:$0xff] %v1702_v6   ;;  %v902_v9 = vpop.f32.mrf.mxu2  ;;  %v967_v21 = vpop.f32.mrf.mxu3 }
 0x137   : > { %1920 = vst [vmem:[%s2212_s8 + $0xb0] sm:$0xff] %v1767_v7   ;;  %v903_v11 = vadd.f32 %v2197_v44, %v902_v9  ;;  %v775_v12 = vpop.f32.mrf.mxu0  ;;  %v840_v13 = vpop.f32.mrf.mxu1  ;;  %v968_v25 = vadd.f32 %v2197_v44, %v967_v21 }
 0x138   : > { %v776_v18 = vadd.f32 %v2197_v44, %v775_v12  ;;  %v841_v19 = vadd.f32 %v2197_v44, %v840_v13 }
 0x139   : > { %v1041_v15 = vmax.f32 %v903_v11, 0.0  ;;  %v1067_v28 = vmax.f32 %v968_v25, 0.0 }
 0x13a   : > { %v990_v29 = vmax.f32 %v776_v18, 0.0  ;;  %v1016_v30 = vmax.f32 %v841_v19, 0.0 }
 0x13b   : > { %v1832_v16 = vpack.c.bf16 %v1041_v15, %v1040_v14  ;;  %v1897_v33 = vpack.c.bf16 %v1067_v28, %v1066_v24 }
 0x13d   : > { %1933 = vst [vmem:[%s2212_s8 + $0x118] sm:$0xff] %v1832_v16  }
 0x13e   : > { %v905_v20 = vpop.f32.mrf.mxu2  ;;  %1946 = vst [vmem:[%s2212_s8 + $0x180] sm:$0xff] %v1897_v33  }
 0x13f   : > { %v777_v22 = vpop.f32.mrf.mxu0  ;;  %v842_v23 = vpop.f32.mrf.mxu1  ;;  %v906_v36 = vadd.f32 %v2197_v44, %v905_v20 }
 0x140   : > { %v778_v26 = vadd.f32 %v2197_v44, %v777_v22  ;;  %v843_v27 = vadd.f32 %v2197_v44, %v842_v23 }
 0x141   : > { %v1042_v41 = vmax.f32 %v906_v36, 0.0 }
 0x142   : > { %v991_v31 = vmax.f32 %v778_v26, 0.0  ;;  %v1017_v32 = vmax.f32 %v843_v27, 0.0 }
 0x144   : > { %v1707_v34 = vpack.c.bf16 %v991_v31, %v990_v29  ;;  %v1772_v35 = vpack.c.bf16 %v1017_v32, %v1016_v30 }
 0x146   : > { %1908 = vst [vmem:[%s2212_s8 + $0x50] sm:$0xff] %v1707_v34   ;;  %v907_v37 = vpop.f32.mrf.mxu2 }
 0x147   : > { %1921 = vst [vmem:[%s2212_s8 + $0xb8] sm:$0xff] %v1772_v35   ;;  %v908_v38 = vadd.f32 %v2197_v44, %v907_v37  ;;  %v780_v39 = vpop.f32.mrf.mxu0  ;;  %v845_v40 = vpop.f32.mrf.mxu1 }
 0x148   : > { %v781_v45 = vadd.f32 %v2197_v44, %v780_v39  ;;  %v846_v46 = vadd.f32 %v2197_v44, %v845_v40 }
 0x149   : > { %v1043_v42 = vmax.f32 %v908_v38, 0.0 }
 0x14a   : > { %v992_v52 = vmax.f32 %v781_v45, 0.0  ;;  %v1018_v53 = vmax.f32 %v846_v46, 0.0 }
 0x14b   : > { %v1837_v43 = vpack.c.bf16 %v1043_v42, %v1042_v41 }
 0x14d   : > { %1934 = vst [vmem:[%s2212_s8 + $0x120] sm:$0xff] %v1837_v43  }
 0x14e   : > { %v910_v47 = vpop.f32.mrf.mxu2 }
 0x14f   : > { %v782_v48 = vpop.f32.mrf.mxu0  ;;  %v847_v49 = vpop.f32.mrf.mxu1  ;;  %v911_v58 = vadd.f32 %v2197_v44, %v910_v47 }
 0x150   : > { %v783_v50 = vadd.f32 %v2197_v44, %v782_v48  ;;  %v848_v51 = vadd.f32 %v2197_v44, %v847_v49 }
 0x151   : > { %v1044_v63 = vmax.f32 %v911_v58, 0.0 }
 0x152   : > { %v993_v54 = vmax.f32 %v783_v50, 0.0  ;;  %v1019_v55 = vmax.f32 %v848_v51, 0.0 }
 0x154   : > { %v1712_v56 = vpack.c.bf16 %v993_v54, %v992_v52  ;;  %v1777_v57 = vpack.c.bf16 %v1019_v55, %v1018_v53 }
 0x156   : > { %1909 = vst [vmem:[%s2212_s8 + $0x58] sm:$0xff] %v1712_v56   ;;  %v912_v59 = vpop.f32.mrf.mxu2 }
 0x157   : > { %1922 = vst [vmem:[%s2212_s8 + $0xc0] sm:$0xff] %v1777_v57   ;;  %v913_v60 = vadd.f32 %v2197_v44, %v912_v59  ;;  %v785_v61 = vpop.f32.mrf.mxu0  ;;  %v850_v62 = vpop.f32.mrf.mxu1 }
 0x158   : > { %v786_v2 = vadd.f32 %v2197_v44, %v785_v61  ;;  %v851_v3 = vadd.f32 %v2197_v44, %v850_v62 }
 0x159   : > { %v1045_v0 = vmax.f32 %v913_v60, 0.0 }
 0x15a   : > { %v994_v9 = vmax.f32 %v786_v2, 0.0  ;;  %v1020_v10 = vmax.f32 %v851_v3, 0.0 }
 0x15b   : > { %v1842_v1 = vpack.c.bf16 %v1045_v0, %v1044_v63 }
 0x15d   : > { %1935 = vst [vmem:[%s2212_s8 + $0x128] sm:$0xff] %v1842_v1  }
 0x15e   : > { %v915_v4 = vpop.f32.mrf.mxu2 }
 0x15f   : > { %v787_v5 = vpop.f32.mrf.mxu0  ;;  %v852_v6 = vpop.f32.mrf.mxu1  ;;  %v916_v15 = vadd.f32 %v2197_v44, %v915_v4 }
 0x160   : > { %v788_v7 = vadd.f32 %v2197_v44, %v787_v5  ;;  %v853_v8 = vadd.f32 %v2197_v44, %v852_v6 }
 0x161   : > { %v1046_v18 = vmax.f32 %v916_v15, 0.0 }
 0x162   : > { %v995_v11 = vmax.f32 %v788_v7, 0.0  ;;  %v1021_v12 = vmax.f32 %v853_v8, 0.0 }
 0x164   : > { %v1717_v13 = vpack.c.bf16 %v995_v11, %v994_v9  ;;  %v1782_v14 = vpack.c.bf16 %v1021_v12, %v1020_v10 }
 0x166   : > { %1910 = vst [vmem:[%s2212_s8 + $0x60] sm:$0xff] %v1717_v13   ;;  %v917_v16 = vpop.f32.mrf.mxu2 }
 0x167   : > { %1923 = vst [vmem:[%s2212_s8 + $0xc8] sm:$0xff] %v1782_v14   ;;  %v918_v17 = vadd.f32 %v2197_v44, %v917_v16 }
 0x169   : > { %v1047_v19 = vmax.f32 %v918_v17, 0.0 }
 0x16b   : > { %v1847_v20 = vpack.c.bf16 %v1047_v19, %v1046_v18 }
 0x16d   : > { %1936 = vst [vmem:[%s2212_s8 + $0x130] sm:$0xff] %v1847_v20  }
 0x16e PF: > { %s15_s12 = sadd.s32 1, %s2057_s12  }
 0x16f   : > { %p12_p7 = scmp.ge.s32.totalorder %s15_s12, 4  }
 0x171   :  { %14 = sbr.rel (!%p12_p7) target bundleno = 2 (0x2), region = 71 }
 0x176   :  { %1286 = vsyncpa [#allocation3], 1 }
 0x177   :  { %1288 = vsyncpa [#allocation3 + $0x1], 1 }
 0x178   :  { %1289 = vsyncpa [#allocation5], 1 }

// kernel: model_forward.5
= control target key start
LH: loop header
LB: loop body
LE: loop exit
PB: predicated region body
PF: predicated region fallthrough
CT: control target
= control target key end

     0   :  { %s3751_s12 = smov 0   ;;  %s4491_s0 = inlined_call_operand.vmem [shape: bf16[1568,288], index: 0, kind: input, shape index: {}]   ;;  %s4492_s1 = inlined_call_operand.vmem [shape: bf16[288,128], index: 1, kind: input, shape index: {}]   ;;  %s4493_s2 = inlined_call_operand.vmem [shape: f32[1,128], index: 2, kind: input, shape index: {}]   ;;  %s4494_s3 = inlined_call_operand.vmem [shape: bf16[1568,128], index: 3, kind: output, shape index: {}]  }
   0x1 LB: > { %s2517_s13 = sadd.s32 4294967295, %s3729_s12   ;;  %p2521_p0 = scmp.ge.s32.totalorder %s3729_s12, 1  ;;  %s3729_s12 = sphi %s3751_s12, %s13_s12  }
   0x2   : > { %p139_p1 = scmp.lt.s32.totalorder %s3729_s12, 3 }
   0x4   : > { %p140_p2 = pnand %p2521_p0, %p139_p1 }
   0x5   : > { %s164_s20 = smul.u32 (!%p140_p2), 98, %s2517_s13 }
   0x6   : > { %143 = sbr.rel (%p140_p2) target bundleno = 764 (0x2fc), region = 32 }
   0x7   : > { %p165_p3 = scmp.lt.s32.totalorder (!%p140_p2), %s164_s20, 195 }
   0xb   : > { %v3389_v0 = vld [vmem:[%s4492_s1 + $0x38] sm:$0xff]  ;;  %v3770_v2 = vld [vmem:[%s4492_s1 + $0x88] sm:$0xff]  ;;  %v3388_v3 = vld [vmem:[%s4492_s1 + $0x30] sm:$0xff]  ;;  %s4496_s20 = smov (!%p165_p3, %s164_s20), 195  ;;  %vm1257_vm0 = vcmask 261120  }
   0xc   : > { %v3765_v1 = vld [vmem:[%s4492_s1 + $0x78] sm:$0xff]  ;;  %1405 = vmatpush.bf16.msra.mxu0 %v3389_v0  ;;  %3693 = vmatpush.bf16.msra.mxu3 %v3389_v0  ;;  %v3396_v4 = vld [vmem:[%s4492_s1 + $0x70] sm:$0xff]  ;;  %v3783_v5 = vld [vmem:[%s4492_s1 + $0x80] sm:$0xff]  ;;  %s3711_s29 = smul.u32 12, %s4496_s20  ;;  %s2523_s5 = sshll.u32 %s4496_s20, 2 }
   0xd   : > { %1659 = vmatpush.bf16.msra.mxu1 %v3765_v1  ;;  %1919 = vmatpush.bf16.msra.mxu2 %v3770_v2  ;;  %v3387_v6 = vld [vmem:[%s4492_s1 + $0x28] sm:$0xff]  ;;  %v3386_v11 = vld [vmem:[%s4492_s1 + $0x20] sm:$0xff]  ;;  %v3385_v13 = vld [vmem:[%s4492_s1 + $0x18] sm:$0xff]  ;;  %s3941_s9 = scalar_lea.vmem %s4494_s3, %s2523_s5 }
   0xe   : > { %v3395_v7 = vld [vmem:[%s4492_s1 + $0x68] sm:$0xff]  ;;  %s3798_s7 = scalar_lea.vmem %s4491_s0, %s3711_s29  ;;  %v3394_v12 = vld [vmem:[%s4492_s1 + $0x60] sm:$0xff]  ;;  %v3393_v14 = vld [vmem:[%s4492_s1 + $0x58] sm:$0xff] }
   0xf   : > { %v2534_v8 = vld [vmem:[%s3798_s7 + $0x8] sm:$0xf]  ;;  %v3237_v9 = vld [vmem:[%s3798_s7 + $0x10] sm:$0xf0]  ;;  %v2546_v17 = vld [vmem:[%s3798_s7 + $0x20] sm:$0xf] }
  0x10   : > { %1406 = vmatpush.bf16.msra.mxu0 %v3388_v3  ;;  %3694 = vmatpush.bf16.msra.mxu3 %v3388_v3  ;;  %v2535_v10 = vor.u32 %v3237_v9, %v2534_v8  ;;  %v3384_v15 = vld [vmem:[%s4492_s1 + $0x10] sm:$0xff]  ;;  %v3240_v18 = vld [vmem:[%s3798_s7 + $0x28] sm:$0xf0]  ;;  %v3382_v22 = vld [vmem:[%s4492_s1] sm:$0xff] }
  0x11   : > { %1660 = vmatpush.bf16.msra.mxu1 %v3396_v4  ;;  %1920 = vmatpush.bf16.msra.mxu2 %v3783_v5  ;;  %v3392_v16 = vld [vmem:[%s4492_s1 + $0x50] sm:$0xff]  ;;  %v3383_v19 = vld [vmem:[%s4492_s1 + $0x8] sm:$0xff]  ;;  %v2547_v21 = vor.u32 %v3240_v18, %v2546_v17  ;;  %v2526_v23 = vld [vmem:[%s3798_s7] sm:$0xf] }
  0x12   : > { %v3391_v20 = vld [vmem:[%s4492_s1 + $0x48] sm:$0xff]  ;;  %v2970_v25 = vld [vmem:[%s3798_s7 + $0x378] sm:$0xf]  ;;  %v3347_v26 = vld [vmem:[%s3798_s7 + $0x380] sm:$0xf0] }
  0x13   : > { %v3236_v24 = vld [vmem:[%s3798_s7 + $0x8] sm:$0xf0]  ;;  %v3390_v27 = vld [vmem:[%s4492_s1 + $0x40] sm:$0xff]  ;;  %v2528_v29 = vld [vmem:[%s3798_s7 + $0xc] sm:$0xf0]  ;;  %v2971_v31 = vor.u32 %v3347_v26, %v2970_v25 }
  0x14   : > { %1407 = vmatpush.bf16.msra.mxu0 %v3387_v6  ;;  %3695 = vmatpush.bf16.msra.mxu3 %v3387_v6  ;;  %v3235_v28 = vld [vmem:[%s3798_s7 + $0x4] sm:$0xf]  ;;  %v2527_v30 = vor.u32 %v3236_v24, %v2526_v23  ;;  %v2558_v33 = vld [vmem:[%s3798_s7 + $0x38] sm:$0xf]  ;;  %v2982_v38 = vld [vmem:[%s3798_s7 + $0x390] sm:$0xf] }
  0x15   : > { %1661 = vmatpush.bf16.msra.mxu1 %v3395_v7  ;;  %3184 = vmatmul.msk.bf16.vlgmr.msra.gmra.mxu2 %vm1257_vm0, %v2535_v10  ;;  %v2531_v32 = vor.u32 %v3235_v28, %v2528_v29  ;;  %v3243_v34 = vld [vmem:[%s3798_s7 + $0x40] sm:$0xf0]  ;;  %v2538_v36 = vld [vmem:[%s3798_s7 + $0x18] sm:$0xf]  ;;  %v3350_v39 = vld [vmem:[%s3798_s7 + $0x398] sm:$0xf0] }
  0x16   : > { %v2559_v35 = vor.u32 %v3243_v34, %v2558_v33  ;;  %v3239_v37 = vld [vmem:[%s3798_s7 + $0x20] sm:$0xf0]  ;;  %v3238_v40 = vld [vmem:[%s3798_s7 + $0x1c] sm:$0xf]  ;;  %v2540_v41 = vld [vmem:[%s3798_s7 + $0x24] sm:$0xf0]  ;;  %v2983_v43 = vor.u32 %v3350_v39, %v2982_v38 }
  0x17   : > { %v2539_v42 = vor.u32 %v3239_v37, %v2538_v36  ;;  %v2543_v44 = vor.u32 %v3238_v40, %v2540_v41  ;;  %v2570_v45 = vld [vmem:[%s3798_s7 + $0x50] sm:$0xf]  ;;  %v3246_v46 = vld [vmem:[%s3798_s7 + $0x58] sm:$0xf0]  ;;  %v2994_v50 = vld [vmem:[%s3798_s7 + $0x3a8] sm:$0xf] }
  0x18   : > { %1408 = vmatpush.bf16.msra.mxu0 %v3386_v11  ;;  %3696 = vmatpush.bf16.msra.mxu3 %v3386_v11  ;;  %v2571_v47 = vor.u32 %v3246_v46, %v2570_v45  ;;  %v2550_v48 = vld [vmem:[%s3798_s7 + $0x30] sm:$0xf]  ;;  %v3242_v49 = vld [vmem:[%s3798_s7 + $0x38] sm:$0xf0]  ;;  %v3353_v51 = vld [vmem:[%s3798_s7 + $0x3b0] sm:$0xf0] }
  0x19   : > { %1662 = vmatpush.bf16.msra.mxu1 %v3394_v12  ;;  %v3241_v52 = vld [vmem:[%s3798_s7 + $0x34] sm:$0xf]  ;;  %v2552_v53 = vld [vmem:[%s3798_s7 + $0x3c] sm:$0xf0]  ;;  %v2551_v54 = vor.u32 %v3242_v49, %v2550_v48  ;;  %v2995_v55 = vor.u32 %v3353_v51, %v2994_v50  ;;  %v2582_v57 = vld [vmem:[%s3798_s7 + $0x68] sm:$0xf] }
  0x1a   : > { %v2555_v56 = vor.u32 %v3241_v52, %v2552_v53  ;;  %v3249_v58 = vld [vmem:[%s3798_s7 + $0x70] sm:$0xf0]  ;;  %v2562_v60 = vld [vmem:[%s3798_s7 + $0x48] sm:$0xf]  ;;  %v3006_v62 = vld [vmem:[%s3798_s7 + $0x3c0] sm:$0xf] }
  0x1b   : > { %v2583_v59 = vor.u32 %v3249_v58, %v2582_v57  ;;  %v3245_v61 = vld [vmem:[%s3798_s7 + $0x50] sm:$0xf0]  ;;  %v3356_v63 = vld [vmem:[%s3798_s7 + $0x3c8] sm:$0xf0]  ;;  %v2574_v8 = vld [vmem:[%s3798_s7 + $0x60] sm:$0xf] }
  0x1c   : > { %1409 = vmatpush.bf16.msra.mxu0 %v3385_v13  ;;  %3697 = vmatpush.bf16.msra.mxu3 %v3385_v13  ;;  %v3244_v0 = vld [vmem:[%s3798_s7 + $0x4c] sm:$0xf]  ;;  %v3007_v3 = vor.u32 %v3356_v63, %v3006_v62  ;;  %v3018_v10 = vld [vmem:[%s3798_s7 + $0x3d8] sm:$0xf]  ;;  %v3359_v11 = vld [vmem:[%s3798_s7 + $0x3e0] sm:$0xf0] }
  0x1d   : > { %1663 = vmatpush.bf16.msra.mxu1 %v3393_v14  ;;  %v3252_v6 = vld [vmem:[%s3798_s7 + $0x88] sm:$0xf0]  ;;  %v2576_v13 = vld [vmem:[%s3798_s7 + $0x6c] sm:$0xf0]  ;;  %v2606_v17 = vld [vmem:[%s3798_s7 + $0x98] sm:$0xf] }
  0x1e   : > { %v3248_v9 = vld [vmem:[%s3798_s7 + $0x68] sm:$0xf0]  ;;  %v3255_v18 = vld [vmem:[%s3798_s7 + $0xa0] sm:$0xf0]  ;;  %v3362_v23 = vld [vmem:[%s3798_s7 + $0x3f8] sm:$0xf0] }
  0x1f   : > { %v3250_v24 = vld [vmem:[%s3798_s7 + $0x7c] sm:$0xf]  ;;  %v2588_v25 = vld [vmem:[%s3798_s7 + $0x84] sm:$0xf0]  ;;  %v2618_v29 = vld [vmem:[%s3798_s7 + $0xb0] sm:$0xf] }
  0x20   : > { %1410 = vmatpush.bf16.msra.mxu0 %v3384_v15  ;;  %3698 = vmatpush.bf16.msra.mxu3 %v3384_v15  ;;  %v3019_v15 = vor.u32 %v3359_v11, %v3018_v10  ;;  %v2591_v28 = vor.u32 %v3250_v24, %v2588_v25  ;;  %v3254_v33 = vld [vmem:[%s3798_s7 + $0x98] sm:$0xf0]  ;;  %v3042_v34 = vld [vmem:[%s3798_s7 + $0x408] sm:$0xf]  ;;  %v3253_v36 = vld [vmem:[%s3798_s7 + $0x94] sm:$0xf] }
  0x21   : > { %1664 = vmatpush.bf16.msra.mxu1 %v3392_v16  ;;  %v2600_v37 = vld [vmem:[%s3798_s7 + $0x9c] sm:$0xf0]  ;;  %v2630_v41 = vld [vmem:[%s3798_s7 + $0xc8] sm:$0xf]  ;;  %v3257_v45 = vld [vmem:[%s3798_s7 + $0xb0] sm:$0xf0] }
  0x22   : > { %v2603_v40 = vor.u32 %v3253_v36, %v2600_v37  ;;  %v3054_v46 = vld [vmem:[%s3798_s7 + $0x420] sm:$0xf]  ;;  %v3256_v48 = vld [vmem:[%s3798_s7 + $0xac] sm:$0xf]  ;;  %v2612_v49 = vld [vmem:[%s3798_s7 + $0xb4] sm:$0xf0] }
  0x23   : > { %v2615_v52 = vor.u32 %v3256_v48, %v2612_v49  ;;  %v2622_v58 = vld [vmem:[%s3798_s7 + $0xc0] sm:$0xf]  ;;  %v3259_v62 = vld [vmem:[%s3798_s7 + $0xc4] sm:$0xf]  ;;  %v2624_v63 = vld [vmem:[%s3798_s7 + $0xcc] sm:$0xf0] }
  0x24   : > { %1411 = vmatpush.bf16.msra.mxu0 %v3383_v19  ;;  %3699 = vmatpush.bf16.msra.mxu3 %v3383_v19  ;;  %v2607_v19 = vor.u32 %v3255_v18, %v2606_v17  ;;  %v2654_v10 = vld [vmem:[%s3798_s7 + $0xf8] sm:$0xf]  ;;  %v3267_v11 = vld [vmem:[%s3798_s7 + $0x100] sm:$0xf0]  ;;  %v3262_v24 = vld [vmem:[%s3798_s7 + $0xdc] sm:$0xf] }
  0x25   : > { %1665 = vmatpush.bf16.msra.mxu1 %v3391_v20  ;;  %3185 = vmatmul.msk.bf16.gmra.mxu2 %vm1257_vm0, %v2547_v21  ;;  %v3251_v21 = vld [vmem:[%s3798_s7 + $0x80] sm:$0xf0]  ;;  %v2636_v25 = vld [vmem:[%s3798_s7 + $0xe4] sm:$0xf0]  ;;  %v2646_v48 = vld [vmem:[%s3798_s7 + $0xf0] sm:$0xf] }
  0x26   : > { %v3266_v49 = vld [vmem:[%s3798_s7 + $0xf8] sm:$0xf0] }
  0x28   : > { %1412 = vmatpush.bf16.msra.mxu0 %v3382_v22  ;;  %3700 = vmatpush.bf16.msra.mxu3 %v3382_v22  ;;  %v3030_v22 = vld [vmem:[%s3798_s7 + $0x3f0] sm:$0xf] }
  0x29   : > { %1666 = vmatpush.bf16.msra.mxu1 %v3390_v27 }
  0x2b   : > { %1413 = vmatmul.bf16.vlgmr.msra.gmra.mxu0 %v2527_v30  ;;  %1598 = vmatmul.bf16.vlgmr.msra.gmra.mxu3 %v2971_v31  ;;  %v3258_v30 = vld [vmem:[%s3798_s7 + $0xb8] sm:$0xf0] }
  0x2c   : > { %3701 = vmatpush.bf16.msrb.mxu3 %v3765_v1  ;;  %1667 = vmatmul.bf16.vlgmr.msra.gmra.mxu1 %v2531_v32  ;;  %v2564_v1 = vld [vmem:[%s3798_s7 + $0x54] sm:$0xf0]  ;;  %v2619_v31 = vor.u32 %v3258_v30, %v2618_v29  ;;  %v2598_v32 = vld [vmem:[%s3798_s7 + $0x90] sm:$0xf] }
  0x2d   : > { %v2599_v38 = vor.u32 %v3254_v33, %v2598_v32  ;;  %v2639_v32 = vor.u32 %v3262_v24, %v2636_v25 }
  0x30   : > { %3702 = vmatpush.bf16.msrb.mxu3 %v3396_v4  ;;  %v2567_v4 = vor.u32 %v3244_v0, %v2564_v1  ;;  %v3920_v0 = vld [vmem:[%s4493_s2] ss:$0 sm:$0xff] }
  0x34   : > { %3703 = vmatpush.bf16.msrb.mxu3 %v3395_v7 }
  0x35   : > { %3186 = vmatmul.msk.bf16.gmra.mxu2 %vm1257_vm0, %v2559_v35  ;;  %v3365_v35 = vld [vmem:[%s3798_s7 + $0x410] sm:$0xf0] }
  0x36   : > { %v3043_v39 = vor.u32 %v3365_v35, %v3042_v34 }
  0x38   : > { %3704 = vmatpush.bf16.msrb.mxu3 %v3394_v12  ;;  %v3247_v12 = vld [vmem:[%s3798_s7 + $0x64] sm:$0xf] }
  0x3b   : > { %1418 = vmatmul.bf16.gmra.mxu0 %v2539_v42  ;;  %1603 = vmatmul.bf16.gmra.mxu3 %v2983_v43  ;;  %v3261_v42 = vld [vmem:[%s3798_s7 + $0xd0] sm:$0xf0] }
  0x3c   : > { %3705 = vmatpush.bf16.msrb.mxu3 %v3393_v14  ;;  %1672 = vmatmul.bf16.gmra.mxu1 %v2543_v44  ;;  %v2575_v14 = vor.u32 %v3248_v9, %v2574_v8  ;;  %v2631_v43 = vor.u32 %v3261_v42, %v2630_v41  ;;  %v2610_v44 = vld [vmem:[%s3798_s7 + $0xa8] sm:$0xf] }
  0x3d   : > { %v2611_v50 = vor.u32 %v3257_v45, %v2610_v44 }
  0x40   : > { %3706 = vmatpush.bf16.msrb.mxu3 %v3392_v16  ;;  %v2579_v16 = vor.u32 %v3247_v12, %v2576_v13 }
  0x44   : > { %3707 = vmatpush.bf16.msrb.mxu3 %v3391_v20  ;;  %v2586_v20 = vld [vmem:[%s3798_s7 + $0x78] sm:$0xf] }
  0x45   : > { %3187 = vmatmul.msk.bf16.gmra.mxu2 %vm1257_vm0, %v2571_v47  ;;  %v2587_v26 = vor.u32 %v3251_v21, %v2586_v20  ;;  %v3368_v47 = vld [vmem:[%s3798_s7 + $0x428] sm:$0xf0]  ;;  %v3263_v20 = vld [vmem:[%s3798_s7 + $0xe0] sm:$0xf0]  ;;  %v3078_v21 = vld [vmem:[%s3798_s7 + $0x450] sm:$0xf] }
  0x46   : > { %v3055_v51 = vor.u32 %v3368_v47, %v3054_v46 }
  0x48   : > { %3708 = vmatpush.bf16.msrb.mxu3 %v3390_v27  ;;  %v3031_v27 = vor.u32 %v3362_v23, %v3030_v22  ;;  %v3374_v22 = vld [vmem:[%s3798_s7 + $0x458] sm:$0xf0] }
  0x49   : > { %v3079_v30 = vor.u32 %v3374_v22, %v3078_v21  ;;  %v2660_v21 = vld [vmem:[%s3798_s7 + $0x114] sm:$0xf0] }
  0x4b   : > { %1423 = vmatmul.bf16.gmra.mxu0 %v2551_v54  ;;  %1608 = vmatmul.bf16.gmra.mxu3 %v2995_v55  ;;  %v2642_v54 = vld [vmem:[%s3798_s7 + $0xe0] sm:$0xf]  ;;  %v3264_v55 = vld [vmem:[%s3798_s7 + $0xe8] sm:$0xf0] }
  0x4c   : > { %3709 = vmatpush.bf16.msra.mxu3 %v3770_v2  ;;  %1677 = vmatmul.bf16.gmra.mxu1 %v2555_v56  ;;  %v2563_v2 = vor.u32 %v3245_v61, %v2562_v60  ;;  %v2643_v57 = vor.u32 %v3264_v55, %v2642_v54  ;;  %v3066_v60 = vld [vmem:[%s3798_s7 + $0x438] sm:$0xf]  ;;  %v3371_v61 = vld [vmem:[%s3798_s7 + $0x440] sm:$0xf0]  ;;  %v2648_v54 = vld [vmem:[%s3798_s7 + $0xfc] sm:$0xf0] }
  0x50   : > { %3710 = vmatpush.bf16.msra.mxu3 %v3783_v5  ;;  %v2594_v5 = vld [vmem:[%s3798_s7 + $0x80] sm:$0xf] }
  0x51   : > { %v2595_v7 = vor.u32 %v3252_v6, %v2594_v5 }
  0x55   : > { %3188 = vmatmul.msk.bf16.gmra.mxu2 %vm1257_vm0, %v2583_v59  ;;  %v3260_v59 = vld [vmem:[%s3798_s7 + $0xc8] sm:$0xf0] }
  0x56   : > { %v2623_v1 = vor.u32 %v3260_v59, %v2622_v58  ;;  %v2647_v58 = vor.u32 %v3266_v49, %v2646_v48  ;;  %v3346_v48 = vld [vmem:[%s3798_s7 + $0x37c] sm:$0xf]  ;;  %v2972_v49 = vld [vmem:[%s3798_s7 + $0x384] sm:$0xf0] }
  0x5b   : > { %1428 = vmatmul.bf16.gmra.mxu0 %v2563_v2  ;;  %1613 = vmatmul.bf16.gmra.mxu3 %v3007_v3  ;;  %v3067_v2 = vor.u32 %v3371_v61, %v3066_v60 }
  0x5c   : > { %1682 = vmatmul.bf16.gmra.mxu1 %v2567_v4  ;;  %v2627_v4 = vor.u32 %v3259_v62, %v2624_v63 }
  0x65   : > { %3189 = vmatmul.msk.bf16.gmra.mxu2 %vm1257_vm0, %v2595_v7 }
  0x6b   : > { %1433 = vmatmul.bf16.gmra.mxu0 %v2575_v14  ;;  %1618 = vmatmul.bf16.gmra.mxu3 %v3019_v15 }
  0x6c   : > { %1687 = vmatmul.bf16.gmra.mxu1 %v2579_v16  ;;  %v2655_v16 = vor.u32 %v3267_v11, %v2654_v10 }
  0x75   : > { %3190 = vmatmul.msk.bf16.gmra.mxu2 %vm1257_vm0, %v2607_v19  ;;  %v2634_v19 = vld [vmem:[%s3798_s7 + $0xd8] sm:$0xf] }
  0x76   : > { %v2635_v29 = vor.u32 %v3263_v20, %v2634_v19  ;;  %v3268_v20 = vld [vmem:[%s3798_s7 + $0x10c] sm:$0xf] }
  0x7b   : > { %1438 = vmatmul.bf16.gmra.mxu0 %v2587_v26  ;;  %1623 = vmatmul.bf16.gmra.mxu3 %v3031_v27 }
  0x7c   : > { %1692 = vmatmul.bf16.gmra.mxu1 %v2591_v28 }
  0x85   : > { %3191 = vmatmul.msk.bf16.gmra.mxu2 %vm1257_vm0, %v2619_v31 }
  0x8b   : > { %1443 = vmatmul.bf16.gmra.mxu0 %v2599_v38  ;;  %1628 = vmatmul.bf16.gmra.mxu3 %v3043_v39  ;;  %v2666_v39 = vld [vmem:[%s3798_s7 + $0x110] sm:$0xf] }
  0x8c   : > { %1697 = vmatmul.bf16.gmra.mxu1 %v2603_v40  ;;  %v3270_v40 = vld [vmem:[%s3798_s7 + $0x118] sm:$0xf0] }
  0x8d   : > { %v2667_v45 = vor.u32 %v3270_v40, %v2666_v39 }
  0x95   : > { %3192 = vmatmul.msk.bf16.gmra.mxu2 %vm1257_vm0, %v2631_v43 }
  0x98   : > { %v1922_v53 = vpop.f32.mrf.mxu2 }
  0x9b   : > { %1448 = vmatmul.bf16.gmra.mxu0 %v2611_v50  ;;  %1633 = vmatmul.bf16.gmra.mxu3 %v3055_v51  ;;  %v3090_v50 = vld [vmem:[%s3798_s7 + $0x468] sm:$0xf]  ;;  %v3377_v51 = vld [vmem:[%s3798_s7 + $0x470] sm:$0xf0] }
  0x9c   : > { %1702 = vmatmul.bf16.gmra.mxu1 %v2615_v52  ;;  %v3091_v59 = vor.u32 %v3377_v51, %v3090_v50  ;;  %v3271_v51 = vld [vmem:[%s3798_s7 + $0x124] sm:$0xf] }
  0xa0   : > { %v1924_v56 = vpop.f32.mrf.mxu2 }
  0xa5   : > { %3193 = vmatmul.msk.bf16.gmra.mxu2 %vm1257_vm0, %v2643_v57 }
  0xa8   : > { %v1414_v3 = vpop.f32.mrf.mxu0  ;;  %v1927_v6 = vpop.f32.mrf.mxu2 }
  0xa9   : > { %v1668_v5 = vpop.f32.mrf.mxu1  ;;  %v1415_v7 = vadd.f32 %v3920_v0, %v1414_v3 }
  0xab   : > { %1453 = vmatmul.bf16.gmra.mxu0 %v2623_v1  ;;  %1638 = vmatmul.bf16.gmra.mxu3 %v3067_v2  ;;  %v1669_v9 = vadd.f32 %v1668_v5, %v1415_v7  ;;  %v2678_v5 = vld [vmem:[%s3798_s7 + $0x128] sm:$0xf] }
  0xac   : > { %1707 = vmatmul.bf16.gmra.mxu1 %v2627_v4 }
  0xad   : > { %v1923_v17 = vadd.f32 %v1922_v53, %v1669_v9  ;;  %v3265_v53 = vld [vmem:[%s3798_s7 + $0xf4] sm:$0xf] }
  0xae   : > { %v3923_v8 = vpop.f32.mrf.mxu3  ;;  %v2651_v61 = vor.u32 %v3265_v53, %v2648_v54 }
  0xaf   : > { %v2167_v27 = vmax.f32 %v1923_v17, 0.0  ;;  %v3102_v17 = vld [vmem:[%s3798_s7 + $0x480] sm:$0xf] }
  0xb0   : > { %v1416_v12 = vpop.f32.mrf.mxu0  ;;  %v1929_v15 = vpop.f32.mrf.mxu2 }
  0xb1   : > { %v1417_v13 = vadd.f32 %v3920_v0, %v1416_v12  ;;  %v1670_v14 = vpop.f32.mrf.mxu1 }
  0xb3   : > { %v1671_v18 = vadd.f32 %v1670_v14, %v1417_v13 }
  0xb5   : > { %v1925_v23 = vadd.f32 %v1924_v56, %v1671_v18  ;;  %3194 = vmatmul.msk.bf16.gmra.mxu2 %vm1257_vm0, %v2655_v16  ;;  %v3269_v16 = vld [vmem:[%s3798_s7 + $0x110] sm:$0xf0]  ;;  %v3380_v18 = vld [vmem:[%s3798_s7 + $0x488] sm:$0xf0] }
  0xb6   : > { %v3936_v26 = vpop.f32.mrf.mxu3 }
  0xb7   : > { %v2168_v28 = vmax.f32 %v1925_v23, 0.0 }
  0xb8   : > { %v1419_v31 = vpop.f32.mrf.mxu0  ;;  %v1932_v35 = vpop.f32.mrf.mxu2 }
  0xb9   : > { %v3403_v33 = vpack.c.bf16 %v2168_v28, %v2167_v27  ;;  %v1673_v34 = vpop.f32.mrf.mxu1  ;;  %v1420_v36 = vadd.f32 %v3920_v0, %v1419_v31  ;;  %v3103_v27 = vor.u32 %v3380_v18, %v3102_v17  ;;  %v3349_v17 = vld [vmem:[%s3798_s7 + $0x394] sm:$0xf]  ;;  %v2984_v18 = vld [vmem:[%s3798_s7 + $0x39c] sm:$0xf0] }
  0xbb   : > { %3404 = vst [vmem:[%s3941_s9] sm:$0xff] %v3403_v33   ;;  %1458 = vmatmul.bf16.gmra.mxu0 %v2635_v29  ;;  %1643 = vmatmul.bf16.gmra.mxu3 %v3079_v30  ;;  %v1674_v38 = vadd.f32 %v1673_v34, %v1420_v36  ;;  %v2663_v29 = vor.u32 %v3268_v20, %v2660_v21  ;;  %v2690_v36 = vld [vmem:[%s3798_s7 + $0x140] sm:$0xf]  ;;  %v3274_v20 = vld [vmem:[%s3798_s7 + $0x13c] sm:$0xf]  ;;  %v2684_v21 = vld [vmem:[%s3798_s7 + $0x144] sm:$0xf0] }
  0xbc   : > { %1712 = vmatmul.bf16.gmra.mxu1 %v2639_v32 }
  0xbd   : > { %v1928_v46 = vadd.f32 %v1927_v6, %v1674_v38  ;;  %v3273_v6 = vld [vmem:[%s3798_s7 + $0x130] sm:$0xf0]  ;;  %v3276_v38 = vld [vmem:[%s3798_s7 + $0x148] sm:$0xf0] }
  0xbe   : > { %v3945_v37 = vpop.f32.mrf.mxu3  ;;  %v2679_v12 = vor.u32 %v3273_v6, %v2678_v5  ;;  %v2702_v5 = vld [vmem:[%s3798_s7 + $0x158] sm:$0xf]  ;;  %v3279_v6 = vld [vmem:[%s3798_s7 + $0x160] sm:$0xf0] }
  0xbf   : > { %v2169_v56 = vmax.f32 %v1928_v46, 0.0  ;;  %v2670_v46 = vld [vmem:[%s3798_s7 + $0x120] sm:$0xf] }
  0xc0   : > { %v1421_v41 = vpop.f32.mrf.mxu0  ;;  %v1934_v44 = vpop.f32.mrf.mxu2 }
  0xc1   : > { %v1422_v42 = vadd.f32 %v3920_v0, %v1421_v41  ;;  %v1675_v43 = vpop.f32.mrf.mxu1 }
  0xc3   : > { %v1676_v47 = vadd.f32 %v1675_v43, %v1422_v42  ;;  %v2691_v43 = vor.u32 %v3276_v38, %v2690_v36 }
  0xc5   : > { %v1930_v52 = vadd.f32 %v1929_v15, %v1676_v47  ;;  %3195 = vmatmul.msk.bf16.gmra.mxu2 %vm1257_vm0, %v2667_v45  ;;  %v2658_v15 = vld [vmem:[%s3798_s7 + $0x108] sm:$0xf]  ;;  %v3272_v47 = vld [vmem:[%s3798_s7 + $0x128] sm:$0xf0] }
  0xc6   : > { %v3957_v55 = vpop.f32.mrf.mxu3  ;;  %v2659_v25 = vor.u32 %v3269_v16, %v2658_v15  ;;  %v2682_v15 = vld [vmem:[%s3798_s7 + $0x138] sm:$0xf]  ;;  %v3275_v16 = vld [vmem:[%s3798_s7 + $0x140] sm:$0xf0] }
  0xc7   : > { %v2170_v57 = vmax.f32 %v1930_v52, 0.0  ;;  %v2672_v52 = vld [vmem:[%s3798_s7 + $0x12c] sm:$0xf0] }
  0xc8   : > { %v1424_v60 = vpop.f32.mrf.mxu0  ;;  %v1937_v1 = vpop.f32.mrf.mxu2 }
  0xc9   : > { %v3408_v62 = vpack.c.bf16 %v2170_v57, %v2169_v56  ;;  %v1678_v63 = vpop.f32.mrf.mxu1  ;;  %v1425_v2 = vadd.f32 %v3920_v0, %v1424_v60  ;;  %v2671_v57 = vor.u32 %v3272_v47, %v2670_v46  ;;  %v2675_v60 = vor.u32 %v3271_v51, %v2672_v52  ;;  %v2996_v51 = vld [vmem:[%s3798_s7 + $0x3b4] sm:$0xf0] }
  0xcb   : > { %3645 = vst [vmem:[%s3941_s9 + $0x8] sm:$0xff] %v3408_v62   ;;  %1463 = vmatmul.bf16.gmra.mxu0 %v2647_v58  ;;  %1648 = vmatmul.bf16.gmra.mxu3 %v3091_v59  ;;  %v1679_v4 = vadd.f32 %v1678_v63, %v1425_v2  ;;  %v2975_v58 = vor.u32 %v3346_v48, %v2972_v49  ;;  %v2694_v48 = vld [vmem:[%s3798_s7 + $0x150] sm:$0xf]  ;;  %v3278_v49 = vld [vmem:[%s3798_s7 + $0x158] sm:$0xf0] }
  0xcc   : > { %1717 = vmatmul.bf16.gmra.mxu1 %v2651_v61 }
  0xcd   : > { %v1933_v13 = vadd.f32 %v1932_v35, %v1679_v4 }
  0xce   : > { %v3961_v3 = vpop.f32.mrf.mxu3 }
  0xcf   : > { %v2171_v23 = vmax.f32 %v1933_v13, 0.0 }
  0xd0   : > { %v1426_v7 = vpop.f32.mrf.mxu0  ;;  %v1939_v11 = vpop.f32.mrf.mxu2 }
  0xd1   : > { %v1427_v9 = vadd.f32 %v3920_v0, %v1426_v7  ;;  %v1680_v10 = vpop.f32.mrf.mxu1 }
  0xd3   : > { %v1681_v14 = vadd.f32 %v1680_v10, %v1427_v9 }
  0xd5   : > { %v1935_v19 = vadd.f32 %v1934_v44, %v1681_v14  ;;  %3196 = vmatmul.msk.bf16.gmra.mxu2 %vm1257_vm0, %v2679_v12  ;;  %v2703_v12 = vor.u32 %v3279_v6, %v2702_v5 }
  0xd6   : > { %v3973_v22 = vpop.f32.mrf.mxu3 }
  0xd7   : > { %v2172_v24 = vmax.f32 %v1935_v19, 0.0 }
  0xd8   : > { %v1429_v28 = vpop.f32.mrf.mxu0  ;;  %v1942_v32 = vpop.f32.mrf.mxu2 }
  0xd9   : > { %v3413_v30 = vpack.c.bf16 %v2172_v24, %v2171_v23  ;;  %v1683_v31 = vpop.f32.mrf.mxu1  ;;  %v1430_v33 = vadd.f32 %v3920_v0, %v1429_v28  ;;  %v2987_v28 = vor.u32 %v3349_v17, %v2984_v18 }
  0xdb   : > { %3646 = vst [vmem:[%s3941_s9 + $0x10] sm:$0xff] %v3413_v30   ;;  %1468 = vmatmul.bf16.gmra.mxu0 %v2659_v25  ;;  %1653 = vmatmul.bf16.gmra.mxu3 %v3103_v27  ;;  %v1684_v35 = vadd.f32 %v1683_v31, %v1430_v33  ;;  %v2683_v27 = vor.u32 %v3275_v16, %v2682_v15 }
  0xdc   : > { %1722 = vmatmul.bf16.gmra.mxu1 %v2663_v29  ;;  %v2687_v30 = vor.u32 %v3274_v20, %v2684_v21  ;;  %v3281_v20 = vld [vmem:[%s3798_s7 + $0x170] sm:$0xf0]  ;;  %v3355_v21 = vld [vmem:[%s3798_s7 + $0x3c4] sm:$0xf] }
  0xdd   : > { %v1938_v44 = vadd.f32 %v1937_v1, %v1684_v35 }
  0xde   : > { %v3977_v34 = vpop.f32.mrf.mxu3 }
  0xdf   : > { %v2173_v54 = vmax.f32 %v1938_v44, 0.0 }
  0xe0   : > { %v1431_v39 = vpop.f32.mrf.mxu0  ;;  %v1944_v42 = vpop.f32.mrf.mxu2 }
  0xe1   : > { %v1432_v40 = vadd.f32 %v3920_v0, %v1431_v39  ;;  %v1685_v41 = vpop.f32.mrf.mxu1  ;;  %v2714_v39 = vld [vmem:[%s3798_s7 + $0x170] sm:$0xf] }
  0xe3   : > { %v1686_v45 = vadd.f32 %v1685_v41, %v1432_v40  ;;  %v3282_v40 = vld [vmem:[%s3798_s7 + $0x178] sm:$0xf0] }
  0xe5   : > { %v1940_v50 = vadd.f32 %v1939_v11, %v1686_v45  ;;  %3197 = vmatmul.msk.bf16.gmra.mxu2 %vm1257_vm0, %v2691_v43  ;;  %v2715_v45 = vor.u32 %v3282_v40, %v2714_v39 }
  0xe6   : > { %v3989_v53 = vpop.f32.mrf.mxu3 }
  0xe7   : > { %v2174_v56 = vmax.f32 %v1940_v50, 0.0  ;;  %v3352_v50 = vld [vmem:[%s3798_s7 + $0x3ac] sm:$0xf] }
  0xe8   : > { %v1434_v59 = vpop.f32.mrf.mxu0  ;;  %v1947_v63 = vpop.f32.mrf.mxu2 }
  0xe9   : > { %v3418_v61 = vpack.c.bf16 %v2174_v56, %v2173_v54  ;;  %v1688_v62 = vpop.f32.mrf.mxu1  ;;  %v1435_v1 = vadd.f32 %v3920_v0, %v1434_v59  ;;  %v3277_v54 = vld [vmem:[%s3798_s7 + $0x154] sm:$0xf]  ;;  %v2696_v56 = vld [vmem:[%s3798_s7 + $0x15c] sm:$0xf0] }
  0xeb   : > { %3647 = vst [vmem:[%s3941_s9 + $0x18] sm:$0xff] %v3418_v61   ;;  %1473 = vmatmul.bf16.gmra.mxu0 %v2671_v57  ;;  %1852 = vmatmul.bf16.vlgmr.msrb.gmra.mxu3 %v2975_v58  ;;  %v1689_v4 = vadd.f32 %v1688_v62, %v1435_v1  ;;  %v2999_v61 = vor.u32 %v3352_v50, %v2996_v51 }
  0xec   : > { %1727 = vmatmul.bf16.gmra.mxu1 %v2675_v60  ;;  %v2695_v60 = vor.u32 %v3278_v49, %v2694_v48 }
  0xed   : > { %v1943_v13 = vadd.f32 %v1942_v32, %v1689_v4 }
  0xee   : > { %v3993_v2 = vpop.f32.mrf.mxu3 }
  0xef   : > { %v2175_v24 = vmax.f32 %v1943_v13, 0.0 }
  0xf0   : > { %v1436_v7 = vpop.f32.mrf.mxu0  ;;  %v1949_v11 = vpop.f32.mrf.mxu2 }
  0xf1   : > { %v1437_v9 = vadd.f32 %v3920_v0, %v1436_v7  ;;  %v1690_v10 = vpop.f32.mrf.mxu1 }
  0xf3   : > { %v1691_v14 = vadd.f32 %v1690_v10, %v1437_v9  ;;  %v2726_v10 = vld [vmem:[%s3798_s7 + $0x188] sm:$0xf] }
  0xf5   : > { %v1945_v19 = vadd.f32 %v1944_v42, %v1691_v14  ;;  %3198 = vmatmul.msk.bf16.gmra.mxu2 %vm1257_vm0, %v2703_v12 }
  0xf6   : > { %v4005_v23 = vpop.f32.mrf.mxu3 }
  0xf7   : > { %v2176_v25 = vmax.f32 %v1945_v19, 0.0  ;;  %v2706_v19 = vld [vmem:[%s3798_s7 + $0x168] sm:$0xf] }
  0xf8   : > { %v1439_v29 = vpop.f32.mrf.mxu0  ;;  %v1952_v33 = vpop.f32.mrf.mxu2 }
  0xf9   : > { %v3423_v31 = vpack.c.bf16 %v2176_v25, %v2175_v24  ;;  %v1693_v32 = vpop.f32.mrf.mxu1  ;;  %v1440_v35 = vadd.f32 %v3920_v0, %v1439_v29  ;;  %v3008_v24 = vld [vmem:[%s3798_s7 + $0x3cc] sm:$0xf0] }
  0xfb   : > { %3648 = vst [vmem:[%s3941_s9 + $0x20] sm:$0xff] %v3423_v31   ;;  %1478 = vmatmul.bf16.gmra.mxu0 %v2683_v27  ;;  %1857 = vmatmul.bf16.gmra.mxu3 %v2987_v28  ;;  %v1694_v38 = vadd.f32 %v1693_v32, %v1440_v35  ;;  %v3280_v27 = vld [vmem:[%s3798_s7 + $0x16c] sm:$0xf]  ;;  %v2708_v28 = vld [vmem:[%s3798_s7 + $0x174] sm:$0xf0]  ;;  %v2707_v32 = vor.u32 %v3281_v20, %v2706_v19 }
  0xfc   : > { %1732 = vmatmul.bf16.gmra.mxu1 %v2687_v30  ;;  %v3011_v35 = vor.u32 %v3355_v21, %v3008_v24  ;;  %v3291_v19 = vld [vmem:[%s3798_s7 + $0x1c0] sm:$0xf0] }
  0xfd   : > { %v1948_v46 = vadd.f32 %v1947_v63, %v1694_v38  ;;  %v2699_v63 = vor.u32 %v3277_v54, %v2696_v56  ;;  %v2711_v38 = vor.u32 %v3280_v27, %v2708_v28  ;;  %v2718_v56 = vld [vmem:[%s3798_s7 + $0x180] sm:$0xf] }
  0xfe   : > { %v4009_v36 = vpop.f32.mrf.mxu3 }
  0xff   : > { %v2177_v58 = vmax.f32 %v1948_v46, 0.0  ;;  %v3288_v46 = vld [vmem:[%s3798_s7 + $0x1a8] sm:$0xf0] }
 0x100   : > { %v1441_v41 = vpop.f32.mrf.mxu0  ;;  %v1954_v44 = vpop.f32.mrf.mxu2 }
 0x101   : > { %v1442_v42 = vadd.f32 %v3920_v0, %v1441_v41  ;;  %v1695_v43 = vpop.f32.mrf.mxu1 }
 0x103   : > { %v1696_v47 = vadd.f32 %v1695_v43, %v1442_v42 }
 0x105   : > { %v1950_v52 = vadd.f32 %v1949_v11, %v1696_v47  ;;  %3199 = vmatmul.msk.bf16.gmra.mxu2 %vm1257_vm0, %v2715_v45  ;;  %v3285_v11 = vld [vmem:[%s3798_s7 + $0x190] sm:$0xf0]  ;;  %v2738_v45 = vld [vmem:[%s3798_s7 + $0x1a0] sm:$0xf] }
 0x106   : > { %v4021_v57 = vpop.f32.mrf.mxu3  ;;  %v2727_v16 = vor.u32 %v3285_v11, %v2726_v10  ;;  %v2739_v51 = vor.u32 %v3288_v46, %v2738_v45 }
 0x107   : > { %v2178_v59 = vmax.f32 %v1950_v52, 0.0 }
 0x108   : > { %v1444_v62 = vpop.f32.mrf.mxu0  ;;  %v1957_v5 = vpop.f32.mrf.mxu2 }
 0x109   : > { %v3428_v1 = vpack.c.bf16 %v2178_v59, %v2177_v58  ;;  %v1698_v4 = vpop.f32.mrf.mxu1  ;;  %v1445_v6 = vadd.f32 %v3920_v0, %v1444_v62  ;;  %v3284_v58 = vld [vmem:[%s3798_s7 + $0x188] sm:$0xf0]  ;;  %v3358_v59 = vld [vmem:[%s3798_s7 + $0x3dc] sm:$0xf]  ;;  %v3283_v62 = vld [vmem:[%s3798_s7 + $0x184] sm:$0xf] }
 0x10b   : > { %3649 = vst [vmem:[%s3941_s9 + $0x28] sm:$0xff] %v3428_v1   ;;  %1483 = vmatmul.bf16.gmra.mxu0 %v2695_v60  ;;  %1862 = vmatmul.bf16.gmra.mxu3 %v2999_v61  ;;  %v1699_v9 = vadd.f32 %v1698_v4, %v1445_v6  ;;  %v3020_v60 = vld [vmem:[%s3798_s7 + $0x3e4] sm:$0xf0] }
 0x10c   : > { %1737 = vmatmul.bf16.gmra.mxu1 %v2699_v63  ;;  %v2720_v63 = vld [vmem:[%s3798_s7 + $0x18c] sm:$0xf0]  ;;  %v3023_v10 = vor.u32 %v3358_v59, %v3020_v60  ;;  %v3294_v59 = vld [vmem:[%s3798_s7 + $0x1d8] sm:$0xf0] }
 0x10d   : > { %v1953_v17 = vadd.f32 %v1952_v33, %v1699_v9  ;;  %v2719_v9 = vor.u32 %v3284_v58, %v2718_v56  ;;  %v2723_v11 = vor.u32 %v3283_v62, %v2720_v63  ;;  %v2762_v58 = vld [vmem:[%s3798_s7 + $0x1d0] sm:$0xf] }
 0x10e   : > { %v4025_v7 = vpop.f32.mrf.mxu3 }
 0x10f   : > { %v2179_v30 = vmax.f32 %v1953_v17, 0.0 }
 0x110   : > { %v1446_v12 = vpop.f32.mrf.mxu0  ;;  %v1959_v15 = vpop.f32.mrf.mxu2 }
 0x111   : > { %v1447_v13 = vadd.f32 %v3920_v0, %v1446_v12  ;;  %v1700_v14 = vpop.f32.mrf.mxu1 }
 0x113   : > { %v1701_v18 = vadd.f32 %v1700_v14, %v1447_v13 }
 0x115   : > { %v1955_v25 = vadd.f32 %v1954_v44, %v1701_v18  ;;  %3200 = vmatmul.msk.bf16.gmra.mxu2 %vm1257_vm0, %v2727_v16  ;;  %v2750_v18 = vld [vmem:[%s3798_s7 + $0x1b8] sm:$0xf] }
 0x116   : > { %v4037_v29 = vpop.f32.mrf.mxu3  ;;  %v2751_v27 = vor.u32 %v3291_v19, %v2750_v18 }
 0x117   : > { %v2180_v31 = vmax.f32 %v1955_v25, 0.0 }
 0x118   : > { %v1449_v33 = vpop.f32.mrf.mxu0  ;;  %v1962_v41 = vpop.f32.mrf.mxu2 }
 0x119   : > { %v3433_v39 = vpack.c.bf16 %v2180_v31, %v2179_v30  ;;  %v1703_v40 = vpop.f32.mrf.mxu1  ;;  %v1450_v42 = vadd.f32 %v3920_v0, %v1449_v33  ;;  %v2730_v31 = vld [vmem:[%s3798_s7 + $0x198] sm:$0xf]  ;;  %v3032_v33 = vld [vmem:[%s3798_s7 + $0x3fc] sm:$0xf0] }
 0x11b   : > { %3650 = vst [vmem:[%s3941_s9 + $0x30] sm:$0xff] %v3433_v39   ;;  %1488 = vmatmul.bf16.gmra.mxu0 %v2707_v32  ;;  %1867 = vmatmul.bf16.gmra.mxu3 %v3011_v35  ;;  %v1704_v44 = vadd.f32 %v1703_v40, %v1450_v42  ;;  %v3287_v32 = vld [vmem:[%s3798_s7 + $0x1a0] sm:$0xf0]  ;;  %v3361_v35 = vld [vmem:[%s3798_s7 + $0x3f4] sm:$0xf] }
 0x11c   : > { %1742 = vmatmul.bf16.gmra.mxu1 %v2711_v38  ;;  %v3286_v39 = vld [vmem:[%s3798_s7 + $0x19c] sm:$0xf]  ;;  %v2732_v40 = vld [vmem:[%s3798_s7 + $0x1a4] sm:$0xf0]  ;;  %v2731_v46 = vor.u32 %v3287_v32, %v2730_v31 }
 0x11d   : > { %v1958_v52 = vadd.f32 %v1957_v5, %v1704_v44 }
 0x11e   : > { %v4041_v43 = vpop.f32.mrf.mxu3 }
 0x11f   : > { %v2181_v4 = vmax.f32 %v1958_v52, 0.0 }
 0x120   : > { %v1451_v47 = vpop.f32.mrf.mxu0  ;;  %v1964_v50 = vpop.f32.mrf.mxu2 }
 0x121   : > { %v1452_v48 = vadd.f32 %v3920_v0, %v1451_v47  ;;  %v1705_v49 = vpop.f32.mrf.mxu1  ;;  %v3035_v47 = vor.u32 %v3361_v35, %v3032_v33  ;;  %v2774_v33 = vld [vmem:[%s3798_s7 + $0x1e8] sm:$0xf] }
 0x123   : > { %v1706_v54 = vadd.f32 %v1705_v49, %v1452_v48  ;;  %v2735_v48 = vor.u32 %v3286_v39, %v2732_v40 }
 0x125   : > { %v1960_v61 = vadd.f32 %v1959_v15, %v1706_v54  ;;  %3201 = vmatmul.msk.bf16.gmra.mxu2 %vm1257_vm0, %v2739_v51 }
 0x126   : > { %v4053_v1 = vpop.f32.mrf.mxu3 }
 0x127   : > { %v2182_v6 = vmax.f32 %v1960_v61, 0.0 }
 0x128   : > { %v1454_v5 = vpop.f32.mrf.mxu0  ;;  %v1967_v14 = vpop.f32.mrf.mxu2 }
 0x129   : > { %v3438_v12 = vpack.c.bf16 %v2182_v6, %v2181_v4  ;;  %v1708_v13 = vpop.f32.mrf.mxu1  ;;  %v1455_v15 = vadd.f32 %v3920_v0, %v1454_v5  ;;  %v2763_v4 = vor.u32 %v3294_v59, %v2762_v58  ;;  %v3290_v5 = vld [vmem:[%s3798_s7 + $0x1b8] sm:$0xf0]  ;;  %v3292_v58 = vld [vmem:[%s3798_s7 + $0x1cc] sm:$0xf]  ;;  %v2756_v59 = vld [vmem:[%s3798_s7 + $0x1d4] sm:$0xf0] }
 0x12b   : > { %3651 = vst [vmem:[%s3941_s9 + $0x38] sm:$0xff] %v3438_v12   ;;  %1493 = vmatmul.bf16.gmra.mxu0 %v2719_v9  ;;  %1872 = vmatmul.bf16.gmra.mxu3 %v3023_v10  ;;  %v1709_v17 = vadd.f32 %v1708_v13, %v1455_v15  ;;  %v2742_v10 = vld [vmem:[%s3798_s7 + $0x1b0] sm:$0xf]  ;;  %v3044_v12 = vld [vmem:[%s3798_s7 + $0x414] sm:$0xf0] }
 0x12c   : > { %1747 = vmatmul.bf16.gmra.mxu1 %v2723_v11  ;;  %v3364_v11 = vld [vmem:[%s3798_s7 + $0x40c] sm:$0xf]  ;;  %v3289_v15 = vld [vmem:[%s3798_s7 + $0x1b4] sm:$0xf] }
 0x12d   : > { %v1963_v28 = vadd.f32 %v1962_v41, %v1709_v17  ;;  %v2744_v17 = vld [vmem:[%s3798_s7 + $0x1bc] sm:$0xf0] }
 0x12e   : > { %v4057_v16 = vpop.f32.mrf.mxu3 }
 0x12f   : > { %v2183_v44 = vmax.f32 %v1963_v28, 0.0 }
 0x130   : > { %v1456_v20 = vpop.f32.mrf.mxu0  ;;  %v1969_v25 = vpop.f32.mrf.mxu2 }
 0x131   : > { %v1457_v21 = vadd.f32 %v3920_v0, %v1456_v20  ;;  %v1710_v24 = vpop.f32.mrf.mxu1 }
 0x133   : > { %v1711_v30 = vadd.f32 %v1710_v24, %v1457_v21  ;;  %v2743_v21 = vor.u32 %v3290_v5, %v2742_v10  ;;  %v3047_v24 = vor.u32 %v3364_v11, %v3044_v12 }
 0x135   : > { %v1965_v38 = vadd.f32 %v1964_v50, %v1711_v30  ;;  %3202 = vmatmul.msk.bf16.gmra.mxu2 %vm1257_vm0, %v2751_v27  ;;  %v2747_v27 = vor.u32 %v3289_v15, %v2744_v17  ;;  %v2786_v15 = vld [vmem:[%s3798_s7 + $0x200] sm:$0xf]  ;;  %v3300_v17 = vld [vmem:[%s3798_s7 + $0x208] sm:$0xf0] }
 0x136   : > { %v4069_v42 = vpop.f32.mrf.mxu3 }
 0x137   : > { %v2184_v45 = vmax.f32 %v1965_v38, 0.0  ;;  %v3297_v38 = vld [vmem:[%s3798_s7 + $0x1f0] sm:$0xf0] }
 0x138   : > { %v1459_v41 = vpop.f32.mrf.mxu0  ;;  %v1972_v52 = vpop.f32.mrf.mxu2 }
 0x139   : > { %v3443_v49 = vpack.c.bf16 %v2184_v45, %v2183_v44  ;;  %v1713_v51 = vpop.f32.mrf.mxu1  ;;  %v1460_v50 = vadd.f32 %v3920_v0, %v1459_v41 }
 0x13b   : > { %3652 = vst [vmem:[%s3941_s9 + $0x40] sm:$0xff] %v3443_v49   ;;  %1498 = vmatmul.bf16.gmra.mxu0 %v2731_v46  ;;  %1877 = vmatmul.bf16.gmra.mxu3 %v3035_v47  ;;  %v1714_v56 = vadd.f32 %v1713_v51, %v1460_v50  ;;  %v2775_v46 = vor.u32 %v3297_v38, %v2774_v33  ;;  %v3293_v49 = vld [vmem:[%s3798_s7 + $0x1d0] sm:$0xf0]  ;;  %v3367_v51 = vld [vmem:[%s3798_s7 + $0x424] sm:$0xf] }
 0x13c   : > { %1752 = vmatmul.bf16.gmra.mxu1 %v2735_v48  ;;  %v2754_v48 = vld [vmem:[%s3798_s7 + $0x1c8] sm:$0xf]  ;;  %v3056_v50 = vld [vmem:[%s3798_s7 + $0x42c] sm:$0xf0] }
 0x13d   : > { %v1968_v6 = vadd.f32 %v1967_v14, %v1714_v56  ;;  %v3068_v33 = vld [vmem:[%s3798_s7 + $0x444] sm:$0xf0] }
 0x13e   : > { %v4073_v54 = vpop.f32.mrf.mxu3 }
 0x13f   : > { %v2185_v19 = vmax.f32 %v1968_v6, 0.0  ;;  %v3059_v6 = vor.u32 %v3367_v51, %v3056_v50 }
 0x140   : > { %v1461_v60 = vpop.f32.mrf.mxu0  ;;  %v1974_v63 = vpop.f32.mrf.mxu2 }
 0x141   : > { %v1462_v61 = vadd.f32 %v3920_v0, %v1461_v60  ;;  %v1715_v62 = vpop.f32.mrf.mxu1 }
 0x143   : > { %v1716_v9 = vadd.f32 %v1715_v62, %v1462_v61 }
 0x145   : > { %v1970_v13 = vadd.f32 %v1969_v25, %v1716_v9  ;;  %3203 = vmatmul.msk.bf16.gmra.mxu2 %vm1257_vm0, %v2763_v4  ;;  %v2755_v4 = vor.u32 %v3293_v49, %v2754_v48  ;;  %v2759_v9 = vor.u32 %v3292_v58, %v2756_v59  ;;  %v1600_v58 = vadd.f32 %v3920_v0, %v3923_v8  ;;  %v3373_v8 = vld [vmem:[%s3798_s7 + $0x454] sm:$0xf] }
 0x146   : > { %v4085_v18 = vpop.f32.mrf.mxu3 }
 0x147   : > { %v2186_v20 = vmax.f32 %v1970_v13, 0.0 }
 0x148   : > { %v1464_v14 = vpop.f32.mrf.mxu0  ;;  %v1977_v31 = vpop.f32.mrf.mxu2 }
 0x149   : > { %v3448_v28 = vpack.c.bf16 %v2186_v20, %v2185_v19  ;;  %v1718_v30 = vpop.f32.mrf.mxu1  ;;  %v1465_v25 = vadd.f32 %v3920_v0, %v1464_v14  ;;  %v2787_v14 = vor.u32 %v3300_v17, %v2786_v15  ;;  %v2778_v17 = vld [vmem:[%s3798_s7 + $0x1f8] sm:$0xf] }
 0x14b   : > { %3653 = vst [vmem:[%s3941_s9 + $0x48] sm:$0xff] %v3448_v28   ;;  %1503 = vmatmul.bf16.gmra.mxu0 %v2743_v21  ;;  %1882 = vmatmul.bf16.gmra.mxu3 %v3047_v24  ;;  %v1719_v35 = vadd.f32 %v1718_v30, %v1465_v25  ;;  %v2766_v30 = vld [vmem:[%s3798_s7 + $0x1e0] sm:$0xf]  ;;  %v3296_v25 = vld [vmem:[%s3798_s7 + $0x1e8] sm:$0xf0] }
 0x14c   : > { %1757 = vmatmul.bf16.gmra.mxu1 %v2747_v27 }
 0x14d   : > { %v1973_v47 = vadd.f32 %v1972_v52, %v1719_v35  ;;  %v3370_v35 = vld [vmem:[%s3798_s7 + $0x43c] sm:$0xf] }
 0x14e   : > { %v4089_v32 = vpop.f32.mrf.mxu3  ;;  %v3071_v48 = vor.u32 %v3370_v35, %v3068_v33 }
 0x14f   : > { %v2187_v61 = vmax.f32 %v1973_v47, 0.0 }
 0x150   : > { %v1466_v39 = vpop.f32.mrf.mxu0  ;;  %v1979_v45 = vpop.f32.mrf.mxu2 }
 0x151   : > { %v1467_v40 = vadd.f32 %v3920_v0, %v1466_v39  ;;  %v1720_v44 = vpop.f32.mrf.mxu1  ;;  %v3295_v39 = vld [vmem:[%s3798_s7 + $0x1e4] sm:$0xf] }
 0x153   : > { %v1721_v41 = vadd.f32 %v1720_v44, %v1467_v40  ;;  %v2768_v40 = vld [vmem:[%s3798_s7 + $0x1ec] sm:$0xf0] }
 0x154   : > { %v2771_v49 = vor.u32 %v3295_v39, %v2768_v40 }
 0x155   : > { %v1975_v56 = vadd.f32 %v1974_v63, %v1721_v41  ;;  %3204 = vmatmul.msk.bf16.gmra.mxu2 %vm1257_vm0, %v2775_v46  ;;  %v2767_v41 = vor.u32 %v3296_v25, %v2766_v30 }
 0x156   : > { %v4101_v60 = vpop.f32.mrf.mxu3 }
 0x157   : > { %v2188_v62 = vmax.f32 %v1975_v56, 0.0 }
 0x158   : > { %v1469_v52 = vpop.f32.mrf.mxu0  ;;  %v1982_v11 = vpop.f32.mrf.mxu2 }
 0x159   : > { %v3453_v10 = vpack.c.bf16 %v2188_v62, %v2187_v61  ;;  %v1723_v5 = vpop.f32.mrf.mxu1  ;;  %v1470_v63 = vadd.f32 %v3920_v0, %v1469_v52 }
 0x15b   : > { %3654 = vst [vmem:[%s3941_s9 + $0x50] sm:$0xff] %v3453_v10   ;;  %1508 = vmatmul.bf16.gmra.mxu0 %v2755_v4  ;;  %1887 = vmatmul.bf16.gmra.mxu3 %v3059_v6  ;;  %v1724_v13 = vadd.f32 %v1723_v5, %v1470_v63  ;;  %v2798_v4 = vld [vmem:[%s3798_s7 + $0x218] sm:$0xf]  ;;  %v3303_v6 = vld [vmem:[%s3798_s7 + $0x220] sm:$0xf0] }
 0x15c   : > { %1762 = vmatmul.bf16.gmra.mxu1 %v2759_v9  ;;  %v2799_v63 = vor.u32 %v3303_v6, %v2798_v4 }
 0x15d   : > { %v1978_v27 = vadd.f32 %v1977_v31, %v1724_v13 }
 0x15e   : > { %v4105_v12 = vpop.f32.mrf.mxu3 }
 0x15f   : > { %v2189_v46 = vmax.f32 %v1978_v27, 0.0  ;;  %v3298_v27 = vld [vmem:[%s3798_s7 + $0x1fc] sm:$0xf] }
 0x160   : > { %v1471_v19 = vpop.f32.mrf.mxu0  ;;  %v1984_v24 = vpop.f32.mrf.mxu2 }
 0x161   : > { %v1472_v20 = vadd.f32 %v3920_v0, %v1471_v19  ;;  %v1725_v21 = vpop.f32.mrf.mxu1  ;;  %v3299_v19 = vld [vmem:[%s3798_s7 + $0x200] sm:$0xf0] }
 0x162   : > { %v2779_v25 = vor.u32 %v3299_v19, %v2778_v17  ;;  %v3301_v17 = vld [vmem:[%s3798_s7 + $0x214] sm:$0xf]  ;;  %v2792_v19 = vld [vmem:[%s3798_s7 + $0x21c] sm:$0xf0] }
 0x163   : > { %v1726_v28 = vadd.f32 %v1725_v21, %v1472_v20  ;;  %v3080_v20 = vld [vmem:[%s3798_s7 + $0x45c] sm:$0xf0]  ;;  %v1602_v21 = vadd.f32 %v3920_v0, %v3936_v26 }
 0x165   : > { %v1980_v38 = vadd.f32 %v1979_v45, %v1726_v28  ;;  %3205 = vmatmul.msk.bf16.gmra.mxu2 %vm1257_vm0, %v2787_v14  ;;  %v2780_v28 = vld [vmem:[%s3798_s7 + $0x204] sm:$0xf0] }
 0x166   : > { %v4117_v44 = vpop.f32.mrf.mxu3  ;;  %v2783_v40 = vor.u32 %v3298_v27, %v2780_v28 }
 0x167   : > { %v2190_v47 = vmax.f32 %v1980_v38, 0.0 }
 0x168   : > { %v1474_v31 = vpop.f32.mrf.mxu0  ;;  %v1987_v56 = vpop.f32.mrf.mxu2 }
 0x169   : > { %v3458_v51 = vpack.c.bf16 %v2190_v47, %v2189_v46  ;;  %v1728_v50 = vpop.f32.mrf.mxu1  ;;  %v1475_v45 = vadd.f32 %v3920_v0, %v1474_v31 }
 0x16b   : > { %3655 = vst [vmem:[%s3941_s9 + $0x58] sm:$0xff] %v3458_v51   ;;  %1513 = vmatmul.bf16.gmra.mxu0 %v2767_v41  ;;  %1892 = vmatmul.bf16.gmra.mxu3 %v3071_v48  ;;  %v1729_v61 = vadd.f32 %v1728_v50, %v1475_v45  ;;  %v1605_v41 = vadd.f32 %v3920_v0, %v3945_v37  ;;  %v2810_v51 = vld [vmem:[%s3798_s7 + $0x230] sm:$0xf]  ;;  %v3306_v50 = vld [vmem:[%s3798_s7 + $0x238] sm:$0xf0] }
 0x16c   : > { %1767 = vmatmul.bf16.gmra.mxu1 %v2771_v49  ;;  %v2811_v4 = vor.u32 %v3306_v50, %v2810_v51  ;;  %v3376_v37 = vld [vmem:[%s3798_s7 + $0x46c] sm:$0xf] }
 0x16d   : > { %v1983_v13 = vadd.f32 %v1982_v11, %v1729_v61  ;;  %v3083_v11 = vor.u32 %v3373_v8, %v3080_v20 }
 0x16e   : > { %v1853_v59 = vpop.f32.mrf.mxu3 }
 0x16f   : > { %v4123_v62 = vadd.f32 %v1853_v59, %v1600_v58  ;;  %v2191_v35 = vmax.f32 %v1983_v13, 0.0  ;;  %v1607_v13 = vadd.f32 %v3920_v0, %v3957_v55 }
 0x170   : > { %v1476_v52 = vpop.f32.mrf.mxu0  ;;  %v1989_v5 = vpop.f32.mrf.mxu2 }
 0x171   : > { %v1477_v9 = vadd.f32 %v3920_v0, %v1476_v52  ;;  %v1730_v10 = vpop.f32.mrf.mxu1 }
 0x173   : > { %v1731_v15 = vadd.f32 %v1730_v10, %v1477_v9  ;;  %v2790_v9 = vld [vmem:[%s3798_s7 + $0x210] sm:$0xf]  ;;  %v3302_v10 = vld [vmem:[%s3798_s7 + $0x218] sm:$0xf0] }
 0x174   : > { %v2791_v20 = vor.u32 %v3302_v10, %v2790_v9  ;;  %v2804_v10 = vld [vmem:[%s3798_s7 + $0x234] sm:$0xf0] }
 0x175   : > { %v1985_v14 = vadd.f32 %v1984_v24, %v1731_v15  ;;  %3206 = vmatmul.msk.bf16.gmra.mxu2 %vm1257_vm0, %v2799_v63  ;;  %v3092_v63 = vld [vmem:[%s3798_s7 + $0x474] sm:$0xf0] }
 0x176   : > { %v1855_v30 = vpop.f32.mrf.mxu3 }
 0x177   : > { %v2192_v33 = vmax.f32 %v1985_v14, 0.0  ;;  %v4137_v38 = vadd.f32 %v1855_v30, %v1602_v21  ;;  %v2795_v30 = vor.u32 %v3301_v17, %v2792_v19 }
 0x178   : > { %v1479_v39 = vpop.f32.mrf.mxu0  ;;  %v1992_v26 = vpop.f32.mrf.mxu2 }
 0x179   : > { %v3463_v46 = vpack.c.bf16 %v2192_v33, %v2191_v35  ;;  %v1733_v47 = vpop.f32.mrf.mxu1  ;;  %v1480_v24 = vadd.f32 %v3920_v0, %v1479_v39  ;;  %v1610_v33 = vadd.f32 %v3920_v0, %v3961_v3  ;;  %v3379_v3 = vld [vmem:[%s3798_s7 + $0x484] sm:$0xf] }
 0x17b   : > { %3656 = vst [vmem:[%s3941_s9 + $0x60] sm:$0xff] %v3463_v46   ;;  %1518 = vmatmul.bf16.gmra.mxu0 %v2779_v25  ;;  %1897 = vmatmul.bf16.gmra.mxu3 %v3083_v11  ;;  %v1734_v31 = vadd.f32 %v1733_v47, %v1480_v24  ;;  %v2822_v46 = vld [vmem:[%s3798_s7 + $0x248] sm:$0xf]  ;;  %v3309_v47 = vld [vmem:[%s3798_s7 + $0x250] sm:$0xf0] }
 0x17c   : > { %1772 = vmatmul.bf16.gmra.mxu1 %v2783_v40  ;;  %v2823_v51 = vor.u32 %v3309_v47, %v2822_v46 }
 0x17d   : > { %v1988_v6 = vadd.f32 %v1987_v56, %v1734_v31  ;;  %v3095_v56 = vor.u32 %v3376_v37, %v3092_v63 }
 0x17e   : > { %v1858_v48 = vpop.f32.mrf.mxu3 }
 0x17f   : > { %v4143_v49 = vadd.f32 %v1858_v48, %v1605_v41  ;;  %v2193_v21 = vmax.f32 %v1988_v6, 0.0  ;;  %v4175_v6 = vld [vmem:[%s4493_s2] ss:$0 sm:$0xff] }
 0x180   : > { %v1481_v45 = vpop.f32.mrf.mxu0  ;;  %v1994_v61 = vpop.f32.mrf.mxu2 }
 0x181   : > { %v1482_v58 = vadd.f32 %v3920_v0, %v1481_v45  ;;  %v1735_v59 = vpop.f32.mrf.mxu1 }
 0x183   : > { %v1736_v52 = vadd.f32 %v1735_v59, %v1482_v58  ;;  %v2802_v58 = vld [vmem:[%s3798_s7 + $0x228] sm:$0xf]  ;;  %v3305_v59 = vld [vmem:[%s3798_s7 + $0x230] sm:$0xf0] }
 0x184   : > { %v2803_v37 = vor.u32 %v3305_v59, %v2802_v58  ;;  %v3307_v58 = vld [vmem:[%s3798_s7 + $0x244] sm:$0xf]  ;;  %v2816_v59 = vld [vmem:[%s3798_s7 + $0x24c] sm:$0xf0] }
 0x185   : > { %v1990_v15 = vadd.f32 %v1989_v5, %v1736_v52  ;;  %3207 = vmatmul.msk.bf16.gmra.mxu2 %vm1257_vm0, %v2811_v4  ;;  %v3104_v4 = vld [vmem:[%s3798_s7 + $0x48c] sm:$0xf0]  ;;  %v1612_v52 = vadd.f32 %v4175_v6, %v3973_v22 }
 0x186   : > { %v1860_v8 = vpop.f32.mrf.mxu3  ;;  %v3107_v17 = vor.u32 %v3379_v3, %v3104_v4 }
 0x187   : > { %v2194_v14 = vmax.f32 %v1990_v15, 0.0  ;;  %v4157_v27 = vadd.f32 %v1860_v8, %v1607_v13 }
 0x188   : > { %v1484_v28 = vpop.f32.mrf.mxu0  ;;  %v1997_v55 = vpop.f32.mrf.mxu2 }
 0x189   : > { %v3468_v25 = vpack.c.bf16 %v2194_v14, %v2193_v21  ;;  %v1738_v35 = vpop.f32.mrf.mxu1  ;;  %v1485_v5 = vadd.f32 %v3920_v0, %v1484_v28  ;;  %v1615_v14 = vadd.f32 %v4175_v6, %v3977_v34  ;;  %v2990_v34 = vld [vmem:[%s3798_s7 + $0x398] sm:$0xf] }
 0x18b   : > { %3657 = vst [vmem:[%s3941_s9 + $0x68] sm:$0xff] %v3468_v25   ;;  %1523 = vmatmul.bf16.gmra.mxu0 %v2791_v20  ;;  %1902 = vmatmul.bf16.gmra.mxu3 %v3095_v56  ;;  %v1739_v39 = vadd.f32 %v1738_v35, %v1485_v5  ;;  %v2834_v25 = vld [vmem:[%s3798_s7 + $0x260] sm:$0xf]  ;;  %v3312_v35 = vld [vmem:[%s3798_s7 + $0x268] sm:$0xf0] }
 0x18c   : > { %1777 = vmatmul.bf16.gmra.mxu1 %v2795_v30  ;;  %v2835_v46 = vor.u32 %v3312_v35, %v2834_v25 }
 0x18d   : > { %v1993_v50 = vadd.f32 %v1992_v26, %v1739_v39 }
 0x18e   : > { %v1863_v11 = vpop.f32.mrf.mxu3 }
 0x18f   : > { %v4163_v40 = vadd.f32 %v1863_v11, %v1610_v33  ;;  %v2195_v63 = vmax.f32 %v1993_v50, 0.0  ;;  %v1617_v50 = vadd.f32 %v4175_v6, %v3989_v53 }
 0x190   : > { %v1486_v24 = vpop.f32.mrf.mxu0  ;;  %v1999_v31 = vpop.f32.mrf.mxu2 }
 0x191   : > { %v1487_v41 = vadd.f32 %v3920_v0, %v1486_v24  ;;  %v1740_v48 = vpop.f32.mrf.mxu1  ;;  %v3304_v0 = vld [vmem:[%s3798_s7 + $0x22c] sm:$0xf] }
 0x192   : > { %v2807_v8 = vor.u32 %v3304_v0, %v2804_v10 }
 0x193   : > { %v1741_v45 = vadd.f32 %v1740_v48, %v1487_v41  ;;  %v2814_v41 = vld [vmem:[%s3798_s7 + $0x240] sm:$0xf]  ;;  %v3308_v48 = vld [vmem:[%s3798_s7 + $0x248] sm:$0xf0] }
 0x194   : > { %v2815_v4 = vor.u32 %v3308_v48, %v2814_v41  ;;  %v3310_v41 = vld [vmem:[%s3798_s7 + $0x25c] sm:$0xf]  ;;  %v2828_v48 = vld [vmem:[%s3798_s7 + $0x264] sm:$0xf0] }
 0x195   : > { %v1995_v9 = vadd.f32 %v1994_v61, %v1741_v45  ;;  %3208 = vmatmul.msk.bf16.gmra.mxu2 %vm1257_vm0, %v2823_v51  ;;  %v3351_v51 = vld [vmem:[%s3798_s7 + $0x3a0] sm:$0xf0] }
 0x196   : > { %v1865_v26 = vpop.f32.mrf.mxu3 }
 0x197   : > { %v2196_v13 = vmax.f32 %v1995_v9, 0.0  ;;  %v4182_v15 = vadd.f32 %v1865_v26, %v1612_v52  ;;  %v2819_v26 = vor.u32 %v3307_v58, %v2816_v59 }
 0x198   : > { %v1489_v19 = vpop.f32.mrf.mxu0  ;;  %v2002_v22 = vpop.f32.mrf.mxu2 }
 0x199   : > { %v3473_v20 = vpack.c.bf16 %v2196_v13, %v2195_v63  ;;  %v1743_v21 = vpop.f32.mrf.mxu1  ;;  %v1490_v61 = vadd.f32 %v4175_v6, %v1489_v19  ;;  %v1620_v13 = vadd.f32 %v4175_v6, %v3993_v2  ;;  %v3002_v2 = vld [vmem:[%s3798_s7 + $0x3b0] sm:$0xf] }
 0x19b   : > { %3658 = vst [vmem:[%s3941_s9 + $0x70] sm:$0xff] %v3473_v20   ;;  %1528 = vmatmul.bf16.gmra.mxu0 %v2803_v37  ;;  %1907 = vmatmul.bf16.gmra.mxu3 %v3107_v17  ;;  %v1744_v28 = vadd.f32 %v1743_v21, %v1490_v61  ;;  %v2846_v20 = vld [vmem:[%s3798_s7 + $0x278] sm:$0xf]  ;;  %v3315_v21 = vld [vmem:[%s3798_s7 + $0x280] sm:$0xf0] }
 0x19c   : > { %1782 = vmatmul.bf16.gmra.mxu1 %v2807_v8  ;;  %v2847_v25 = vor.u32 %v3315_v21, %v2846_v20 }
 0x19d   : > { %v1998_v47 = vadd.f32 %v1997_v55, %v1744_v28  ;;  %v2991_v55 = vor.u32 %v3351_v51, %v2990_v34 }
 0x19e   : > { %v1868_v56 = vpop.f32.mrf.mxu3 }
 0x19f   : > { %v4188_v30 = vadd.f32 %v1868_v56, %v1615_v14  ;;  %v2197_v52 = vmax.f32 %v1998_v47, 0.0  ;;  %v1622_v47 = vadd.f32 %v4175_v6, %v4005_v23 }
 0x1a0   : > { %v1491_v5 = vpop.f32.mrf.mxu0  ;;  %v2004_v39 = vpop.f32.mrf.mxu2 }
 0x1a1   : > { %v1492_v33 = vadd.f32 %v4175_v6, %v1491_v5  ;;  %v1745_v11 = vpop.f32.mrf.mxu1 }
 0x1a3   : > { %v1746_v24 = vadd.f32 %v1745_v11, %v1492_v33  ;;  %v2826_v33 = vld [vmem:[%s3798_s7 + $0x258] sm:$0xf]  ;;  %v3311_v11 = vld [vmem:[%s3798_s7 + $0x260] sm:$0xf0] }
 0x1a4   : > { %v2827_v51 = vor.u32 %v3311_v11, %v2826_v33  ;;  %v3313_v33 = vld [vmem:[%s3798_s7 + $0x274] sm:$0xf]  ;;  %v2840_v11 = vld [vmem:[%s3798_s7 + $0x27c] sm:$0xf0] }
 0x1a5   : > { %v2000_v45 = vadd.f32 %v1999_v31, %v1746_v24  ;;  %3209 = vmatmul.msk.bf16.gmra.mxu2 %vm1257_vm0, %v2835_v46  ;;  %v3354_v46 = vld [vmem:[%s3798_s7 + $0x3b8] sm:$0xf0] }
 0x1a6   : > { %v1870_v3 = vpop.f32.mrf.mxu3 }
 0x1a7   : > { %v2198_v9 = vmax.f32 %v2000_v45, 0.0  ;;  %v4202_v0 = vadd.f32 %v1870_v3, %v1617_v50  ;;  %v2831_v3 = vor.u32 %v3310_v41, %v2828_v48 }
 0x1a8   : > { %v1494_v10 = vpop.f32.mrf.mxu0  ;;  %v2007_v53 = vpop.f32.mrf.mxu2 }
 0x1a9   : > { %v3478_v37 = vpack.c.bf16 %v2198_v9, %v2197_v52  ;;  %v1748_v63 = vpop.f32.mrf.mxu1  ;;  %v1495_v31 = vadd.f32 %v4175_v6, %v1494_v10  ;;  %v1625_v9 = vadd.f32 %v4175_v6, %v4009_v36  ;;  %v3014_v36 = vld [vmem:[%s3798_s7 + $0x3c8] sm:$0xf] }
 0x1ab   : > { %3659 = vst [vmem:[%s3941_s9 + $0x78] sm:$0xff] %v3478_v37   ;;  %1533 = vmatmul.bf16.gmra.mxu0 %v2815_v4  ;;  %3222 = vmatmul.msk.bf16.vlgmr.msra.gmra.mxu3 %vm1257_vm0, %v2991_v55  ;;  %v1749_v19 = vadd.f32 %v1748_v63, %v1495_v31  ;;  %v2858_v37 = vld [vmem:[%s3798_s7 + $0x290] sm:$0xf]  ;;  %v3318_v63 = vld [vmem:[%s3798_s7 + $0x298] sm:$0xf0] }
 0x1ac   : > { %1787 = vmatmul.bf16.gmra.mxu1 %v2819_v26  ;;  %v2859_v20 = vor.u32 %v3318_v63, %v2858_v37 }
 0x1ad   : > { %v2003_v35 = vadd.f32 %v2002_v22, %v1749_v19  ;;  %v3003_v22 = vor.u32 %v3354_v46, %v3002_v2 }
 0x1ae   : > { %v1873_v17 = vpop.f32.mrf.mxu3 }
 0x1af   : > { %v4209_v8 = vadd.f32 %v1873_v17, %v1620_v13  ;;  %v2199_v50 = vmax.f32 %v2003_v35, 0.0  ;;  %v1627_v35 = vadd.f32 %v4175_v6, %v4021_v57 }
 0x1b0   : > { %v1496_v61 = vpop.f32.mrf.mxu0  ;;  %v2009_v28 = vpop.f32.mrf.mxu2 }
 0x1b1   : > { %v1497_v14 = vadd.f32 %v4175_v6, %v1496_v61  ;;  %v1750_v56 = vpop.f32.mrf.mxu1 }
 0x1b3   : > { %v1751_v5 = vadd.f32 %v1750_v56, %v1497_v14  ;;  %v2838_v14 = vld [vmem:[%s3798_s7 + $0x270] sm:$0xf]  ;;  %v3314_v56 = vld [vmem:[%s3798_s7 + $0x278] sm:$0xf0] }
 0x1b4   : > { %v2839_v46 = vor.u32 %v3314_v56, %v2838_v14  ;;  %v3316_v14 = vld [vmem:[%s3798_s7 + $0x28c] sm:$0xf]  ;;  %v2852_v56 = vld [vmem:[%s3798_s7 + $0x294] sm:$0xf0] }
 0x1b5   : > { %v2005_v24 = vadd.f32 %v2004_v39, %v1751_v5  ;;  %3210 = vmatmul.msk.bf16.gmra.mxu2 %vm1257_vm0, %v2847_v25  ;;  %v3357_v25 = vld [vmem:[%s3798_s7 + $0x3d0] sm:$0xf0] }
 0x1b6   : > { %v1875_v34 = vpop.f32.mrf.mxu3 }
 0x1b7   : > { %v2200_v45 = vmax.f32 %v2005_v24, 0.0  ;;  %v4223_v58 = vadd.f32 %v1875_v34, %v1622_v47  ;;  %v2843_v34 = vor.u32 %v3313_v33, %v2840_v11 }
 0x1b8   : > { %v1499_v59 = vpop.f32.mrf.mxu0  ;;  %v2012_v23 = vpop.f32.mrf.mxu2 }
 0x1b9   : > { %v3483_v4 = vpack.c.bf16 %v2200_v45, %v2199_v50  ;;  %v1753_v52 = vpop.f32.mrf.mxu1  ;;  %v1500_v39 = vadd.f32 %v4175_v6, %v1499_v59  ;;  %v1630_v45 = vadd.f32 %v4175_v6, %v4025_v7  ;;  %v3026_v7 = vld [vmem:[%s3798_s7 + $0x3e0] sm:$0xf] }
 0x1bb   : > { %3660 = vst [vmem:[%s3941_s9 + $0x80] sm:$0xff] %v3483_v4   ;;  %1538 = vmatmul.bf16.gmra.mxu0 %v2827_v51  ;;  %3223 = vmatmul.msk.bf16.gmra.mxu3 %vm1257_vm0, %v3003_v22  ;;  %v1754_v10 = vadd.f32 %v1753_v52, %v1500_v39  ;;  %v2870_v4 = vld [vmem:[%s3798_s7 + $0x2a8] sm:$0xf]  ;;  %v3321_v52 = vld [vmem:[%s3798_s7 + $0x2b0] sm:$0xf0] }
 0x1bc   : > { %1792 = vmatmul.bf16.gmra.mxu1 %v2831_v3  ;;  %v2871_v37 = vor.u32 %v3321_v52, %v2870_v4 }
 0x1bd   : > { %v2008_v21 = vadd.f32 %v2007_v53, %v1754_v10  ;;  %v3015_v53 = vor.u32 %v3357_v25, %v3014_v36 }
 0x1be   : > { %v1878_v55 = vpop.f32.mrf.mxu3 }
 0x1bf   : > { %v4230_v26 = vadd.f32 %v1878_v55, %v1625_v9  ;;  %v2201_v47 = vmax.f32 %v2008_v21, 0.0  ;;  %v1632_v21 = vadd.f32 %v4175_v6, %v4037_v29 }
 0x1c0   : > { %v1501_v31 = vpop.f32.mrf.mxu0  ;;  %v2014_v19 = vpop.f32.mrf.mxu2 }
 0x1c1   : > { %v1502_v13 = vadd.f32 %v4175_v6, %v1501_v31  ;;  %v1755_v17 = vpop.f32.mrf.mxu1 }
 0x1c3   : > { %v1756_v61 = vadd.f32 %v1755_v17, %v1502_v13  ;;  %v2850_v13 = vld [vmem:[%s3798_s7 + $0x288] sm:$0xf]  ;;  %v3317_v17 = vld [vmem:[%s3798_s7 + $0x290] sm:$0xf0] }
 0x1c4   : > { %v2851_v25 = vor.u32 %v3317_v17, %v2850_v13  ;;  %v3319_v13 = vld [vmem:[%s3798_s7 + $0x2a4] sm:$0xf]  ;;  %v2864_v17 = vld [vmem:[%s3798_s7 + $0x2ac] sm:$0xf0] }
 0x1c5   : > { %v2010_v5 = vadd.f32 %v2009_v28, %v1756_v61  ;;  %3211 = vmatmul.msk.bf16.gmra.mxu2 %vm1257_vm0, %v2859_v20  ;;  %v3360_v20 = vld [vmem:[%s3798_s7 + $0x3e8] sm:$0xf0] }
 0x1c6   : > { %v1880_v2 = vpop.f32.mrf.mxu3 }
 0x1c7   : > { %v2202_v24 = vmax.f32 %v2010_v5, 0.0  ;;  %v4244_v41 = vadd.f32 %v1880_v2, %v1627_v35  ;;  %v2855_v2 = vor.u32 %v3316_v14, %v2852_v56 }
 0x1c8   : > { %v1504_v48 = vpop.f32.mrf.mxu0  ;;  %v2017_v57 = vpop.f32.mrf.mxu2 }
 0x1c9   : > { %v3488_v51 = vpack.c.bf16 %v2202_v24, %v2201_v47  ;;  %v1758_v50 = vpop.f32.mrf.mxu1  ;;  %v1505_v28 = vadd.f32 %v4175_v6, %v1504_v48  ;;  %v1635_v24 = vadd.f32 %v4175_v6, %v4041_v43  ;;  %v3038_v43 = vld [vmem:[%s3798_s7 + $0x3f8] sm:$0xf] }
 0x1cb   : > { %3661 = vst [vmem:[%s3941_s9 + $0x88] sm:$0xff] %v3488_v51   ;;  %1543 = vmatmul.bf16.gmra.mxu0 %v2839_v46  ;;  %3224 = vmatmul.msk.bf16.gmra.mxu3 %vm1257_vm0, %v3015_v53  ;;  %v1759_v59 = vadd.f32 %v1758_v50, %v1505_v28  ;;  %v2882_v51 = vld [vmem:[%s3798_s7 + $0x2c0] sm:$0xf]  ;;  %v3324_v50 = vld [vmem:[%s3798_s7 + $0x2c8] sm:$0xf0] }
 0x1cc   : > { %1797 = vmatmul.bf16.gmra.mxu1 %v2843_v34  ;;  %v2883_v4 = vor.u32 %v3324_v50, %v2882_v51 }
 0x1cd   : > { %v2013_v63 = vadd.f32 %v2012_v23, %v1759_v59  ;;  %v3027_v23 = vor.u32 %v3360_v20, %v3026_v7 }
 0x1ce   : > { %v1883_v22 = vpop.f32.mrf.mxu3 }
 0x1cf   : > { %v4251_v3 = vadd.f32 %v1883_v22, %v1630_v45  ;;  %v2203_v35 = vmax.f32 %v2013_v63, 0.0  ;;  %v1637_v63 = vadd.f32 %v4175_v6, %v4053_v1 }
 0x1d0   : > { %v1506_v39 = vpop.f32.mrf.mxu0  ;;  %v2019_v10 = vpop.f32.mrf.mxu2 }
 0x1d1   : > { %v1507_v9 = vadd.f32 %v4175_v6, %v1506_v39  ;;  %v1760_v55 = vpop.f32.mrf.mxu1 }
 0x1d3   : > { %v1761_v31 = vadd.f32 %v1760_v55, %v1507_v9  ;;  %v2862_v9 = vld [vmem:[%s3798_s7 + $0x2a0] sm:$0xf]  ;;  %v3320_v55 = vld [vmem:[%s3798_s7 + $0x2a8] sm:$0xf0] }
 0x1d4   : > { %v2863_v20 = vor.u32 %v3320_v55, %v2862_v9  ;;  %v3322_v9 = vld [vmem:[%s3798_s7 + $0x2bc] sm:$0xf]  ;;  %v2876_v55 = vld [vmem:[%s3798_s7 + $0x2c4] sm:$0xf0] }
 0x1d5   : > { %v2015_v61 = vadd.f32 %v2014_v19, %v1761_v31  ;;  %3212 = vmatmul.msk.bf16.gmra.mxu2 %vm1257_vm0, %v2871_v37  ;;  %v3363_v37 = vld [vmem:[%s3798_s7 + $0x400] sm:$0xf0] }
 0x1d6   : > { %v1885_v36 = vpop.f32.mrf.mxu3 }
 0x1d7   : > { %v2204_v5 = vmax.f32 %v2015_v61, 0.0  ;;  %v4265_v33 = vadd.f32 %v1885_v36, %v1632_v21  ;;  %v2867_v36 = vor.u32 %v3319_v13, %v2864_v17 }
 0x1d8   : > { %v1509_v11 = vpop.f32.mrf.mxu0  ;;  %v2022_v29 = vpop.f32.mrf.mxu2 }
 0x1d9   : > { %v3493_v46 = vpack.c.bf16 %v2204_v5, %v2203_v35  ;;  %v1763_v47 = vpop.f32.mrf.mxu1  ;;  %v1510_v19 = vadd.f32 %v4175_v6, %v1509_v11  ;;  %v1640_v5 = vadd.f32 %v4175_v6, %v4057_v16  ;;  %v3050_v16 = vld [vmem:[%s3798_s7 + $0x410] sm:$0xf] }
 0x1db   : > { %3662 = vst [vmem:[%s3941_s9 + $0x90] sm:$0xff] %v3493_v46   ;;  %1548 = vmatmul.bf16.gmra.mxu0 %v2851_v25  ;;  %3225 = vmatmul.msk.bf16.gmra.mxu3 %vm1257_vm0, %v3027_v23  ;;  %v1764_v48 = vadd.f32 %v1763_v47, %v1510_v19  ;;  %v2894_v46 = vld [vmem:[%s3798_s7 + $0x2d8] sm:$0xf]  ;;  %v3327_v47 = vld [vmem:[%s3798_s7 + $0x2e0] sm:$0xf0] }
 0x1dc   : > { %1802 = vmatmul.bf16.gmra.mxu1 %v2855_v2  ;;  %v2895_v51 = vor.u32 %v3327_v47, %v2894_v46 }
 0x1dd   : > { %v2018_v52 = vadd.f32 %v2017_v57, %v1764_v48  ;;  %v3039_v57 = vor.u32 %v3363_v37, %v3038_v43 }
 0x1de   : > { %v1888_v53 = vpop.f32.mrf.mxu3 }
 0x1df   : > { %v4272_v34 = vadd.f32 %v1888_v53, %v1635_v24  ;;  %v2205_v21 = vmax.f32 %v2018_v52, 0.0  ;;  %v1642_v52 = vadd.f32 %v4175_v6, %v4069_v42 }
 0x1e0   : > { %v1511_v28 = vpop.f32.mrf.mxu0  ;;  %v2024_v59 = vpop.f32.mrf.mxu2 }
 0x1e1   : > { %v1512_v45 = vadd.f32 %v4175_v6, %v1511_v28  ;;  %v1765_v22 = vpop.f32.mrf.mxu1 }
 0x1e3   : > { %v1766_v39 = vadd.f32 %v1765_v22, %v1512_v45  ;;  %v2874_v45 = vld [vmem:[%s3798_s7 + $0x2b8] sm:$0xf]  ;;  %v3323_v22 = vld [vmem:[%s3798_s7 + $0x2c0] sm:$0xf0] }
 0x1e4   : > { %v2875_v37 = vor.u32 %v3323_v22, %v2874_v45  ;;  %v3325_v45 = vld [vmem:[%s3798_s7 + $0x2d4] sm:$0xf]  ;;  %v2888_v22 = vld [vmem:[%s3798_s7 + $0x2dc] sm:$0xf0] }
 0x1e5   : > { %v2020_v31 = vadd.f32 %v2019_v10, %v1766_v39  ;;  %3213 = vmatmul.msk.bf16.gmra.mxu2 %vm1257_vm0, %v2883_v4  ;;  %v3366_v4 = vld [vmem:[%s3798_s7 + $0x418] sm:$0xf0] }
 0x1e6   : > { %v1890_v7 = vpop.f32.mrf.mxu3 }
 0x1e7   : > { %v2206_v61 = vmax.f32 %v2020_v31, 0.0  ;;  %v4286_v14 = vadd.f32 %v1890_v7, %v1637_v63  ;;  %v2879_v7 = vor.u32 %v3322_v9, %v2876_v55 }
 0x1e8   : > { %v1514_v56 = vpop.f32.mrf.mxu0  ;;  %v2027_v1 = vpop.f32.mrf.mxu2 }
 0x1e9   : > { %v3498_v25 = vpack.c.bf16 %v2206_v61, %v2205_v21  ;;  %v1768_v35 = vpop.f32.mrf.mxu1  ;;  %v1515_v10 = vadd.f32 %v4175_v6, %v1514_v56  ;;  %v1645_v61 = vadd.f32 %v4175_v6, %v4073_v54  ;;  %v3062_v54 = vld [vmem:[%s3798_s7 + $0x428] sm:$0xf] }
 0x1eb   : > { %3663 = vst [vmem:[%s3941_s9 + $0x98] sm:$0xff] %v3498_v25   ;;  %1553 = vmatmul.bf16.gmra.mxu0 %v2863_v20  ;;  %3226 = vmatmul.msk.bf16.gmra.mxu3 %vm1257_vm0, %v3039_v57  ;;  %v1769_v11 = vadd.f32 %v1768_v35, %v1515_v10  ;;  %v2906_v25 = vld [vmem:[%s3798_s7 + $0x2f0] sm:$0xf]  ;;  %v3330_v35 = vld [vmem:[%s3798_s7 + $0x2f8] sm:$0xf0] }
 0x1ec   : > { %1807 = vmatmul.bf16.gmra.mxu1 %v2867_v36  ;;  %v2907_v46 = vor.u32 %v3330_v35, %v2906_v25 }
 0x1ed   : > { %v2023_v50 = vadd.f32 %v2022_v29, %v1769_v11  ;;  %v3051_v29 = vor.u32 %v3366_v4, %v3050_v16 }
 0x1ee   : > { %v1893_v23 = vpop.f32.mrf.mxu3 }
 0x1ef   : > { %v4293_v2 = vadd.f32 %v1893_v23, %v1640_v5  ;;  %v2207_v63 = vmax.f32 %v2023_v50, 0.0  ;;  %v1647_v50 = vadd.f32 %v4175_v6, %v4085_v18 }
 0x1f0   : > { %v1516_v19 = vpop.f32.mrf.mxu0  ;;  %v2029_v48 = vpop.f32.mrf.mxu2 }
 0x1f1   : > { %v1517_v24 = vadd.f32 %v4175_v6, %v1516_v19  ;;  %v1770_v53 = vpop.f32.mrf.mxu1 }
 0x1f3   : > { %v1771_v28 = vadd.f32 %v1770_v53, %v1517_v24  ;;  %v2886_v24 = vld [vmem:[%s3798_s7 + $0x2d0] sm:$0xf]  ;;  %v3326_v53 = vld [vmem:[%s3798_s7 + $0x2d8] sm:$0xf0] }
 0x1f4   : > { %v2887_v4 = vor.u32 %v3326_v53, %v2886_v24  ;;  %v3328_v24 = vld [vmem:[%s3798_s7 + $0x2ec] sm:$0xf]  ;;  %v2900_v53 = vld [vmem:[%s3798_s7 + $0x2f4] sm:$0xf0] }
 0x1f5   : > { %v2025_v39 = vadd.f32 %v2024_v59, %v1771_v28  ;;  %3214 = vmatmul.msk.bf16.gmra.mxu2 %vm1257_vm0, %v2895_v51  ;;  %v3369_v51 = vld [vmem:[%s3798_s7 + $0x430] sm:$0xf0] }
 0x1f6   : > { %v1895_v43 = vpop.f32.mrf.mxu3 }
 0x1f7   : > { %v2208_v31 = vmax.f32 %v2025_v39, 0.0  ;;  %v4307_v13 = vadd.f32 %v1895_v43, %v1642_v52  ;;  %v2891_v43 = vor.u32 %v3325_v45, %v2888_v22 }
 0x1f8   : > { %v1519_v17 = vpop.f32.mrf.mxu0  ;;  %v2032_v42 = vpop.f32.mrf.mxu2 }
 0x1f9   : > { %v3503_v20 = vpack.c.bf16 %v2208_v31, %v2207_v63  ;;  %v1773_v21 = vpop.f32.mrf.mxu1  ;;  %v1520_v59 = vadd.f32 %v4175_v6, %v1519_v17  ;;  %v1650_v31 = vadd.f32 %v4175_v6, %v4089_v32  ;;  %v3074_v32 = vld [vmem:[%s3798_s7 + $0x440] sm:$0xf] }
 0x1fb   : > { %3664 = vst [vmem:[%s3941_s9 + $0xa0] sm:$0xff] %v3503_v20   ;;  %1558 = vmatmul.bf16.gmra.mxu0 %v2875_v37  ;;  %3227 = vmatmul.msk.bf16.gmra.mxu3 %vm1257_vm0, %v3051_v29  ;;  %v1774_v56 = vadd.f32 %v1773_v21, %v1520_v59  ;;  %v2918_v20 = vld [vmem:[%s3798_s7 + $0x308] sm:$0xf]  ;;  %v3333_v21 = vld [vmem:[%s3798_s7 + $0x310] sm:$0xf0] }
 0x1fc   : > { %1812 = vmatmul.bf16.gmra.mxu1 %v2879_v7  ;;  %v2919_v25 = vor.u32 %v3333_v21, %v2918_v20 }
 0x1fd   : > { %v2028_v47 = vadd.f32 %v2027_v1, %v1774_v56  ;;  %v3063_v1 = vor.u32 %v3369_v51, %v3062_v54 }
 0x1fe   : > { %v1898_v57 = vpop.f32.mrf.mxu3 }
 0x1ff   : > { %v4314_v36 = vadd.f32 %v1898_v57, %v1645_v61  ;;  %v2209_v52 = vmax.f32 %v2028_v47, 0.0  ;;  %v1652_v47 = vadd.f32 %v4175_v6, %v4101_v60 }
 0x200   : > { %v1521_v10 = vpop.f32.mrf.mxu0  ;;  %v2034_v11 = vpop.f32.mrf.mxu2 }
 0x201   : > { %v1522_v5 = vadd.f32 %v4175_v6, %v1521_v10  ;;  %v1775_v23 = vpop.f32.mrf.mxu1 }
 0x203   : > { %v1776_v19 = vadd.f32 %v1775_v23, %v1522_v5  ;;  %v2898_v5 = vld [vmem:[%s3798_s7 + $0x2e8] sm:$0xf]  ;;  %v3329_v23 = vld [vmem:[%s3798_s7 + $0x2f0] sm:$0xf0] }
 0x204   : > { %v2899_v51 = vor.u32 %v3329_v23, %v2898_v5  ;;  %v3331_v5 = vld [vmem:[%s3798_s7 + $0x304] sm:$0xf]  ;;  %v2912_v23 = vld [vmem:[%s3798_s7 + $0x30c] sm:$0xf0] }
 0x205   : > { %v2030_v28 = vadd.f32 %v2029_v48, %v1776_v19  ;;  %3215 = vmatmul.msk.bf16.gmra.mxu2 %vm1257_vm0, %v2907_v46  ;;  %v3372_v46 = vld [vmem:[%s3798_s7 + $0x448] sm:$0xf0] }
 0x206   : > { %v1900_v16 = vpop.f32.mrf.mxu3 }
 0x207   : > { %v2210_v39 = vmax.f32 %v2030_v28, 0.0  ;;  %v4328_v9 = vadd.f32 %v1900_v16, %v1647_v50  ;;  %v2903_v16 = vor.u32 %v3328_v24, %v2900_v53 }
 0x208   : > { %v1524_v55 = vpop.f32.mrf.mxu0  ;;  %v2037_v18 = vpop.f32.mrf.mxu2 }
 0x209   : > { %v3508_v37 = vpack.c.bf16 %v2210_v39, %v2209_v52  ;;  %v1778_v63 = vpop.f32.mrf.mxu1  ;;  %v1525_v48 = vadd.f32 %v4175_v6, %v1524_v55  ;;  %v1655_v39 = vadd.f32 %v4175_v6, %v4105_v12  ;;  %v3086_v12 = vld [vmem:[%s3798_s7 + $0x458] sm:$0xf] }
 0x20b   : > { %3665 = vst [vmem:[%s3941_s9 + $0xa8] sm:$0xff] %v3508_v37   ;;  %1563 = vmatmul.bf16.gmra.mxu0 %v2887_v4  ;;  %3228 = vmatmul.msk.bf16.gmra.mxu3 %vm1257_vm0, %v3063_v1  ;;  %v1779_v17 = vadd.f32 %v1778_v63, %v1525_v48  ;;  %v2930_v37 = vld [vmem:[%s3798_s7 + $0x320] sm:$0xf]  ;;  %v3336_v63 = vld [vmem:[%s3798_s7 + $0x328] sm:$0xf0] }
 0x20c   : > { %1817 = vmatmul.bf16.gmra.mxu1 %v2891_v43  ;;  %v2931_v20 = vor.u32 %v3336_v63, %v2930_v37  ;;  %v2922_v63 = vld [vmem:[%s3798_s7 + $0x318] sm:$0xf] }
 0x20d   : > { %v2033_v35 = vadd.f32 %v2032_v42, %v1779_v17  ;;  %v3075_v42 = vor.u32 %v3372_v46, %v3074_v32 }
 0x20e   : > { %v1903_v29 = vpop.f32.mrf.mxu3 }
 0x20f   : > { %v4335_v7 = vadd.f32 %v1903_v29, %v1650_v31  ;;  %v2211_v50 = vmax.f32 %v2033_v35, 0.0  ;;  %v1657_v35 = vadd.f32 %v4175_v6, %v4117_v44 }
 0x210   : > { %v1526_v59 = vpop.f32.mrf.mxu0  ;;  %v2039_v56 = vpop.f32.mrf.mxu2 }
 0x211   : > { %v1527_v61 = vadd.f32 %v4175_v6, %v1526_v59  ;;  %v1780_v57 = vpop.f32.mrf.mxu1 }
 0x213   : > { %v1781_v10 = vadd.f32 %v1780_v57, %v1527_v61  ;;  %v2910_v61 = vld [vmem:[%s3798_s7 + $0x300] sm:$0xf]  ;;  %v3332_v57 = vld [vmem:[%s3798_s7 + $0x308] sm:$0xf0] }
 0x214   : > { %v2911_v46 = vor.u32 %v3332_v57, %v2910_v61  ;;  %v2924_v61 = vld [vmem:[%s3798_s7 + $0x324] sm:$0xf0] }
 0x215   : > { %v2035_v19 = vadd.f32 %v2034_v11, %v1781_v10  ;;  %3216 = vmatmul.msk.bf16.gmra.mxu2 %vm1257_vm0, %v2919_v25  ;;  %v3375_v25 = vld [vmem:[%s3798_s7 + $0x460] sm:$0xf0] }
 0x216   : > { %v1905_v54 = vpop.f32.mrf.mxu3  ;;  %v3087_v24 = vor.u32 %v3375_v25, %v3086_v12 }
 0x217   : > { %v2212_v28 = vmax.f32 %v2035_v19, 0.0  ;;  %v4349_v45 = vadd.f32 %v1905_v54, %v1652_v47  ;;  %v2915_v54 = vor.u32 %v3331_v5, %v2912_v23 }
 0x218   : > { %v1529_v22 = vpop.f32.mrf.mxu0  ;;  %v2042_v60 = vpop.f32.mrf.mxu2 }
 0x219   : > { %v3513_v4 = vpack.c.bf16 %v2212_v28, %v2211_v50  ;;  %v1783_v52 = vpop.f32.mrf.mxu1  ;;  %v1530_v11 = vadd.f32 %v4175_v6, %v1529_v22  ;;  %v2942_v22 = vld [vmem:[%s3798_s7 + $0x338] sm:$0xf] }
 0x21b   : > { %3666 = vst [vmem:[%s3941_s9 + $0xb0] sm:$0xff] %v3513_v4   ;;  %1568 = vmatmul.bf16.gmra.mxu0 %v2899_v51  ;;  %3229 = vmatmul.msk.bf16.gmra.mxu3 %vm1257_vm0, %v3075_v42  ;;  %v1784_v55 = vadd.f32 %v1783_v52, %v1530_v11 }
 0x21c   : > { %1822 = vmatmul.bf16.gmra.mxu1 %v2903_v16  ;;  %v3339_v16 = vld [vmem:[%s3798_s7 + $0x340] sm:$0xf0] }
 0x21d   : > { %v2038_v21 = vadd.f32 %v2037_v18, %v1784_v55 }
 0x21e   : > { %v1908_v1 = vpop.f32.mrf.mxu3 }
 0x21f   : > { %v4356_v43 = vadd.f32 %v1908_v1, %v1655_v39  ;;  %v2213_v47 = vmax.f32 %v2038_v21, 0.0  ;;  %v2943_v1 = vor.u32 %v3339_v16, %v2942_v22 }
 0x220   : > { %v1531_v48 = vpop.f32.mrf.mxu0  ;;  %v2044_v17 = vpop.f32.mrf.mxu2 }
 0x221   : > { %v1532_v31 = vadd.f32 %v4175_v6, %v1531_v48  ;;  %v1785_v29 = vpop.f32.mrf.mxu1  ;;  %v3335_v48 = vld [vmem:[%s3798_s7 + $0x320] sm:$0xf0] }
 0x222   : > { %v2923_v12 = vor.u32 %v3335_v48, %v2922_v63  ;;  %v3337_v48 = vld [vmem:[%s3798_s7 + $0x334] sm:$0xf] }
 0x223   : > { %v1786_v59 = vadd.f32 %v1785_v29, %v1532_v31  ;;  %v3098_v31 = vld [vmem:[%s3798_s7 + $0x470] sm:$0xf]  ;;  %v3378_v29 = vld [vmem:[%s3798_s7 + $0x478] sm:$0xf0] }
 0x225   : > { %v2040_v10 = vadd.f32 %v2039_v56, %v1786_v59  ;;  %3217 = vmatmul.msk.bf16.gmra.mxu2 %vm1257_vm0, %v2931_v20  ;;  %v3334_v59 = vld [vmem:[%s3798_s7 + $0x31c] sm:$0xf] }
 0x226   : > { %v1910_v32 = vpop.f32.mrf.mxu3  ;;  %v2927_v23 = vor.u32 %v3334_v59, %v2924_v61 }
 0x227   : > { %v2214_v19 = vmax.f32 %v2040_v10, 0.0  ;;  %v4370_v18 = vadd.f32 %v1910_v32, %v1657_v35  ;;  %v3099_v10 = vor.u32 %v3378_v29, %v3098_v31  ;;  %v2936_v31 = vld [vmem:[%s3798_s7 + $0x33c] sm:$0xf0] }
 0x228   : > { %v1534_v53 = vpop.f32.mrf.mxu0  ;;  %v2047_v44 = vpop.f32.mrf.mxu2 }
 0x229   : > { %v3518_v51 = vpack.c.bf16 %v2214_v19, %v2213_v47  ;;  %v1788_v50 = vpop.f32.mrf.mxu1  ;;  %v1535_v56 = vadd.f32 %v4175_v6, %v1534_v53 }
 0x22b   : > { %3667 = vst [vmem:[%s3941_s9 + $0xb8] sm:$0xff] %v3518_v51   ;;  %1573 = vmatmul.bf16.gmra.mxu0 %v2911_v46  ;;  %3230 = vmatmul.msk.bf16.gmra.mxu3 %vm1257_vm0, %v3087_v24  ;;  %v1789_v42 = vadd.f32 %v1788_v50, %v1535_v56  ;;  %v3342_v51 = vld [vmem:[%s3798_s7 + $0x358] sm:$0xf0] }
 0x22c   : > { %1827 = vmatmul.bf16.gmra.mxu1 %v2915_v54  ;;  %v2954_v54 = vld [vmem:[%s3798_s7 + $0x350] sm:$0xf] }
 0x22d   : > { %v2043_v55 = vadd.f32 %v2042_v60, %v1789_v42  ;;  %v2955_v22 = vor.u32 %v3342_v51, %v2954_v54  ;;  %v2946_v51 = vld [vmem:[%s3798_s7 + $0x348] sm:$0xf] }
 0x22e   : > { %v2112_v28 = vpop.f32.mrf.mxu3 }
 0x22f   : > { %v2113_v20 = vadd.f32 %v2112_v28, %v4143_v49  ;;  %v2215_v25 = vmax.f32 %v2043_v55, 0.0  ;;  %v3381_v55 = vld [vmem:[%s3798_s7 + $0x490] sm:$0xf0] }
 0x230   : > { %v1536_v4 = vpop.f32.mrf.mxu0  ;;  %v2049_v39 = vpop.f32.mrf.mxu2 }
 0x231   : > { %v1537_v52 = vadd.f32 %v4175_v6, %v1536_v4  ;;  %v1790_v11 = vpop.f32.mrf.mxu1  ;;  %v2243_v32 = vmax.f32 %v2113_v20, 0.0 }
 0x233   : > { %v1791_v37 = vadd.f32 %v1790_v11, %v1537_v52  ;;  %v2934_v52 = vld [vmem:[%s3798_s7 + $0x330] sm:$0xf]  ;;  %v3338_v11 = vld [vmem:[%s3798_s7 + $0x338] sm:$0xf0] }
 0x234   : > { %v2935_v20 = vor.u32 %v3338_v11, %v2934_v52 }
 0x235   : > { %v2045_v21 = vadd.f32 %v2044_v17, %v1791_v37  ;;  %3218 = vmatmul.msk.bf16.gmra.mxu2 %vm1257_vm0, %v2943_v1  ;;  %v3110_v1 = vld [vmem:[%s3798_s7 + $0x488] sm:$0xf] }
 0x236   : > { %v2114_v57 = vpop.f32.mrf.mxu3  ;;  %v3111_v61 = vor.u32 %v3381_v55, %v3110_v1 }
 0x237   : > { %v2216_v35 = vmax.f32 %v2045_v21, 0.0  ;;  %v2115_v60 = vadd.f32 %v2114_v57, %v4157_v27 }
 0x238   : > { %v1539_v5 = vpop.f32.mrf.mxu0  ;;  %v2052_v47 = vpop.f32.mrf.mxu2 }
 0x239   : > { %v3523_v49 = vpack.c.bf16 %v2216_v35, %v2215_v25  ;;  %v2244_v17 = vmax.f32 %v2115_v60, 0.0  ;;  %v1793_v46 = vpop.f32.mrf.mxu1  ;;  %v1540_v24 = vadd.f32 %v4175_v6, %v1539_v5 }
 0x23b   : > { %3668 = vst [vmem:[%s3941_s9 + $0xc0] sm:$0xff] %v3523_v49   ;;  %v3593_v19 = vpack.c.bf16 %v2244_v17, %v2243_v32  ;;  %1578 = vmatmul.bf16.gmra.mxu0 %v2923_v12  ;;  %3231 = vmatmul.msk.bf16.gmra.mxu3 %vm1257_vm0, %v3099_v10  ;;  %v1794_v53 = vadd.f32 %v1793_v46, %v1540_v24  ;;  %v2966_v32 = vld [vmem:[%s3798_s7 + $0x368] sm:$0xf]  ;;  %v3345_v49 = vld [vmem:[%s3798_s7 + $0x370] sm:$0xf0] }
 0x23c   : > { %1832 = vmatmul.bf16.gmra.mxu1 %v2927_v23  ;;  %v2939_v12 = vor.u32 %v3337_v48, %v2936_v31 }
 0x23d   : > { %3682 = vst [vmem:[%s3941_s9 + $0x130] sm:$0xff] %v3593_v19   ;;  %v2048_v16 = vadd.f32 %v2047_v44, %v1794_v53 }
 0x23e   : > { %v2117_v27 = vpop.f32.mrf.mxu3 }
 0x23f   : > { %v2118_v37 = vadd.f32 %v2117_v27, %v4163_v40  ;;  %v2217_v21 = vmax.f32 %v2048_v16, 0.0  ;;  %v2967_v27 = vor.u32 %v3345_v49, %v2966_v32  ;;  %v2948_v16 = vld [vmem:[%s3798_s7 + $0x354] sm:$0xf0]  ;;  %v3343_v32 = vld [vmem:[%s3798_s7 + $0x364] sm:$0xf] }
 0x240   : > { %v1541_v50 = vpop.f32.mrf.mxu0  ;;  %v2054_v42 = vpop.f32.mrf.mxu2  ;;  %v2960_v49 = vld [vmem:[%s3798_s7 + $0x36c] sm:$0xf0] }
 0x241   : > { %v1542_v56 = vadd.f32 %v4175_v6, %v1541_v50  ;;  %v1795_v28 = vpop.f32.mrf.mxu1  ;;  %v2245_v25 = vmax.f32 %v2118_v37, 0.0  ;;  %v3341_v50 = vld [vmem:[%s3798_s7 + $0x350] sm:$0xf0] }
 0x242   : > { %v2947_v55 = vor.u32 %v3341_v50, %v2946_v51 }
 0x243   : > { %v1796_v4 = vadd.f32 %v1795_v28, %v1542_v56 }
 0x245   : > { %v2050_v63 = vadd.f32 %v2049_v39, %v1796_v4  ;;  %3219 = vmatmul.msk.bf16.gmra.mxu2 %vm1257_vm0, %v2955_v22  ;;  %v3340_v22 = vld [vmem:[%s3798_s7 + $0x34c] sm:$0xf] }
 0x246   : > { %v2119_v29 = vpop.f32.mrf.mxu3  ;;  %v2951_v37 = vor.u32 %v3340_v22, %v2948_v16 }
 0x247   : > { %v2218_v59 = vmax.f32 %v2050_v63, 0.0  ;;  %v2120_v44 = vadd.f32 %v2119_v29, %v4182_v15 }
 0x248   : > { %v1544_v57 = vpop.f32.mrf.mxu0  ;;  %v2057_v60 = vpop.f32.mrf.mxu2 }
 0x249   : > { %v3528_v40 = vpack.c.bf16 %v2218_v59, %v2217_v21  ;;  %v2246_v39 = vmax.f32 %v2120_v44, 0.0  ;;  %v1798_v35 = vpop.f32.mrf.mxu1  ;;  %v1545_v5 = vadd.f32 %v4175_v6, %v1544_v57  ;;  %v2978_v59 = vld [vmem:[%s3798_s7 + $0x380] sm:$0xf]  ;;  %v3348_v44 = vld [vmem:[%s3798_s7 + $0x388] sm:$0xf0] }
 0x24b   : > { %3669 = vst [vmem:[%s3941_s9 + $0xc8] sm:$0xff] %v3528_v40   ;;  %v3598_v10 = vpack.c.bf16 %v2246_v39, %v2245_v25  ;;  %1583 = vmatmul.bf16.gmra.mxu0 %v2935_v20  ;;  %3232 = vmatmul.msk.bf16.gmra.mxu3 %vm1257_vm0, %v3111_v61  ;;  %v1799_v23 = vadd.f32 %v1798_v35, %v1545_v5  ;;  %v3344_v5 = vld [vmem:[%s3798_s7 + $0x368] sm:$0xf0] }
 0x24c   : > { %1837 = vmatmul.bf16.gmra.mxu1 %v2939_v12  ;;  %v2979_v40 = vor.u32 %v3348_v44, %v2978_v59 }
 0x24d   : > { %3683 = vst [vmem:[%s3941_s9 + $0x138] sm:$0xff] %v3598_v10   ;;  %v2053_v53 = vadd.f32 %v2052_v47, %v1799_v23  ;;  %v2958_v10 = vld [vmem:[%s3798_s7 + $0x360] sm:$0xf] }
 0x24e   : > { %v2122_v15 = vpop.f32.mrf.mxu3 }
 0x24f   : > { %v2123_v56 = vadd.f32 %v2122_v15, %v4188_v30  ;;  %v2219_v52 = vmax.f32 %v2053_v53, 0.0  ;;  %v2959_v53 = vor.u32 %v3344_v5, %v2958_v10 }
 0x250   : > { %v1546_v17 = vpop.f32.mrf.mxu0  ;;  %v2059_v24 = vpop.f32.mrf.mxu2 }
 0x251   : > { %v1547_v46 = vadd.f32 %v4175_v6, %v1546_v17  ;;  %v1800_v19 = vpop.f32.mrf.mxu1  ;;  %v2247_v63 = vmax.f32 %v2123_v56, 0.0 }
 0x253   : > { %v1801_v54 = vadd.f32 %v1800_v19, %v1547_v46 }
 0x255   : > { %v2055_v28 = vadd.f32 %v2054_v42, %v1801_v54  ;;  %3220 = vmatmul.msk.bf16.gmra.mxu2 %vm1257_vm0, %v2967_v27 }
 0x256   : > { %v2124_v4 = vpop.f32.mrf.mxu3 }
 0x257   : > { %v2220_v11 = vmax.f32 %v2055_v28, 0.0  ;;  %v2125_v1 = vadd.f32 %v2124_v4, %v4202_v0 }
 0x258   : > { %v1549_v47 = vpop.f32.mrf.mxu0  ;;  %v2062_v31 = vpop.f32.mrf.mxu2 }
 0x259   : > { %v3533_v48 = vpack.c.bf16 %v2220_v11, %v2219_v52  ;;  %v2248_v30 = vmax.f32 %v2125_v1, 0.0  ;;  %v1803_v42 = vpop.f32.mrf.mxu1  ;;  %v1550_v20 = vadd.f32 %v4175_v6, %v1549_v47 }
 0x25b   : > { %3670 = vst [vmem:[%s3941_s9 + $0xd0] sm:$0xff] %v3533_v48   ;;  %v3603_v29 = vpack.c.bf16 %v2248_v30, %v2247_v63  ;;  %1588 = vmatmul.bf16.gmra.mxu0 %v2947_v55  ;;  %v1804_v21 = vadd.f32 %v1803_v42, %v1550_v20 }
 0x25c   : > { %1842 = vmatmul.bf16.gmra.mxu1 %v2951_v37 }
 0x25d   : > { %3684 = vst [vmem:[%s3941_s9 + $0x140] sm:$0xff] %v3603_v29   ;;  %v2058_v39 = vadd.f32 %v2057_v60, %v1804_v21  ;;  %v2963_v60 = vor.u32 %v3343_v32, %v2960_v49 }
 0x25e   : > { %v2127_v0 = vpop.f32.mrf.mxu3 }
 0x25f   : > { %v2128_v15 = vadd.f32 %v2127_v0, %v4209_v8  ;;  %v2221_v46 = vmax.f32 %v2058_v39, 0.0 }
 0x260   : > { %v1551_v61 = vpop.f32.mrf.mxu0  ;;  %v2064_v25 = vpop.f32.mrf.mxu2 }
 0x261   : > { %v1552_v57 = vadd.f32 %v4175_v6, %v1551_v61  ;;  %v1805_v12 = vpop.f32.mrf.mxu1  ;;  %v2249_v51 = vmax.f32 %v2128_v15, 0.0 }
 0x263   : > { %v1806_v35 = vadd.f32 %v1805_v12, %v1552_v57 }
 0x265   : > { %v2060_v23 = vadd.f32 %v2059_v24, %v1806_v35  ;;  %3221 = vmatmul.msk.bf16.gmra.mxu2 %vm1257_vm0, %v2979_v40 }
 0x266   : > { %v2129_v17 = vpop.f32.mrf.mxu3 }
 0x267   : > { %v2222_v19 = vmax.f32 %v2060_v23, 0.0  ;;  %v2130_v27 = vadd.f32 %v2129_v17, %v4223_v58  ;;  %v4436_v58 = vld [vmem:[%s4493_s2] ss:$0 sm:$0xff] }
 0x268   : > { %v1554_v54 = vpop.f32.mrf.mxu0  ;;  %v2067_v8 = vpop.f32.mrf.mxu2 }
 0x269   : > { %v3538_v50 = vpack.c.bf16 %v2222_v19, %v2221_v46  ;;  %v2250_v56 = vmax.f32 %v2130_v27, 0.0  ;;  %v1808_v28 = vpop.f32.mrf.mxu1  ;;  %v1555_v22 = vadd.f32 %v4175_v6, %v1554_v54 }
 0x26b   : > { %3671 = vst [vmem:[%s3941_s9 + $0xd8] sm:$0xff] %v3538_v50   ;;  %v3608_v24 = vpack.c.bf16 %v2250_v56, %v2249_v51  ;;  %1593 = vmatmul.bf16.gmra.mxu0 %v2959_v53  ;;  %v1809_v4 = vadd.f32 %v1808_v28, %v1555_v22 }
 0x26c   : > { %1847 = vmatmul.bf16.gmra.mxu1 %v2963_v60 }
 0x26d   : > { %3685 = vst [vmem:[%s3941_s9 + $0x148] sm:$0xff] %v3608_v24   ;;  %v2063_v47 = vadd.f32 %v2062_v31, %v1809_v4 }
 0x26e   : > { %v2132_v16 = vpop.f32.mrf.mxu3 }
 0x26f   : > { %v2133_v6 = vadd.f32 %v2132_v16, %v4230_v26  ;;  %v2223_v30 = vmax.f32 %v2063_v47, 0.0 }
 0x270   : > { %v1556_v52 = vpop.f32.mrf.mxu0  ;;  %v2069_v55 = vpop.f32.mrf.mxu2 }
 0x271   : > { %v1557_v11 = vadd.f32 %v4436_v58, %v1556_v52  ;;  %v1810_v1 = vpop.f32.mrf.mxu1  ;;  %v2251_v0 = vmax.f32 %v2133_v6, 0.0 }
 0x273   : > { %v1811_v37 = vadd.f32 %v1810_v1, %v1557_v11 }
 0x275   : > { %v2065_v63 = vadd.f32 %v2064_v25, %v1811_v37 }
 0x276   : > { %v2134_v48 = vpop.f32.mrf.mxu3 }
 0x277   : > { %v2224_v42 = vmax.f32 %v2065_v63, 0.0  ;;  %v2135_v29 = vadd.f32 %v2134_v48, %v4244_v41 }
 0x278   : > { %v1559_v20 = vpop.f32.mrf.mxu0  ;;  %v2072_v61 = vpop.f32.mrf.mxu2 }
 0x279   : > { %v3543_v21 = vpack.c.bf16 %v2224_v42, %v2223_v30  ;;  %v2252_v59 = vmax.f32 %v2135_v29, 0.0  ;;  %v1813_v44 = vpop.f32.mrf.mxu1  ;;  %v1560_v31 = vadd.f32 %v4436_v58, %v1559_v20 }
 0x27b   : > { %3672 = vst [vmem:[%s3941_s9 + $0xe0] sm:$0xff] %v3543_v21   ;;  %v3613_v57 = vpack.c.bf16 %v2252_v59, %v2251_v0  ;;  %v1814_v40 = vadd.f32 %v1813_v44, %v1560_v31 }
 0x27d   : > { %3686 = vst [vmem:[%s3941_s9 + $0x150] sm:$0xff] %v3613_v57   ;;  %v2068_v41 = vadd.f32 %v2067_v8, %v1814_v40 }
 0x27e   : > { %v2137_v12 = vpop.f32.mrf.mxu3 }
 0x27f   : > { %v2138_v5 = vadd.f32 %v2137_v12, %v4251_v3  ;;  %v2225_v32 = vmax.f32 %v2068_v41, 0.0 }
 0x280   : > { %v1561_v26 = vpop.f32.mrf.mxu0  ;;  %v2074_v35 = vpop.f32.mrf.mxu2 }
 0x281   : > { %v1562_v25 = vadd.f32 %v4436_v58, %v1561_v26  ;;  %v1815_v39 = vpop.f32.mrf.mxu1  ;;  %v2253_v19 = vmax.f32 %v2138_v5, 0.0 }
 0x283   : > { %v1816_v10 = vadd.f32 %v1815_v39, %v1562_v25 }
 0x285   : > { %v2070_v15 = vadd.f32 %v2069_v55, %v1816_v10 }
 0x286   : > { %v2139_v23 = vpop.f32.mrf.mxu3 }
 0x287   : > { %v2226_v49 = vmax.f32 %v2070_v15, 0.0  ;;  %v2140_v17 = vadd.f32 %v2139_v23, %v4265_v33 }
 0x288   : > { %v1564_v46 = vpop.f32.mrf.mxu0  ;;  %v2077_v60 = vpop.f32.mrf.mxu2 }
 0x289   : > { %v3548_v27 = vpack.c.bf16 %v2226_v49, %v2225_v32  ;;  %v2254_v53 = vmax.f32 %v2140_v17, 0.0  ;;  %v1818_v54 = vpop.f32.mrf.mxu1  ;;  %v1565_v50 = vadd.f32 %v4436_v58, %v1564_v46 }
 0x28b   : > { %3673 = vst [vmem:[%s3941_s9 + $0xe8] sm:$0xff] %v3548_v27   ;;  %v3618_v51 = vpack.c.bf16 %v2254_v53, %v2253_v19  ;;  %v1819_v28 = vadd.f32 %v1818_v54, %v1565_v50 }
 0x28d   : > { %3687 = vst [vmem:[%s3941_s9 + $0x158] sm:$0xff] %v3618_v51   ;;  %v2073_v33 = vadd.f32 %v2072_v61, %v1819_v28 }
 0x28e   : > { %v2142_v56 = vpop.f32.mrf.mxu3 }
 0x28f   : > { %v2143_v4 = vadd.f32 %v2142_v56, %v4272_v34  ;;  %v2227_v1 = vmax.f32 %v2073_v33, 0.0 }
 0x290   : > { %v1566_v3 = vpop.f32.mrf.mxu0  ;;  %v2079_v22 = vpop.f32.mrf.mxu2 }
 0x291   : > { %v1567_v8 = vadd.f32 %v4436_v58, %v1566_v3  ;;  %v1820_v24 = vpop.f32.mrf.mxu1  ;;  %v2255_v6 = vmax.f32 %v2143_v4, 0.0 }
 0x293   : > { %v1821_v16 = vadd.f32 %v1820_v24, %v1567_v8 }
 0x295   : > { %v2075_v52 = vadd.f32 %v2074_v35, %v1821_v16 }
 0x296   : > { %v2144_v11 = vpop.f32.mrf.mxu3 }
 0x297   : > { %v2228_v55 = vmax.f32 %v2075_v52, 0.0  ;;  %v2145_v47 = vadd.f32 %v2144_v11, %v4286_v14 }
 0x298   : > { %v1569_v37 = vpop.f32.mrf.mxu0  ;;  %v2082_v42 = vpop.f32.mrf.mxu2 }
 0x299   : > { %v3553_v63 = vpack.c.bf16 %v2228_v55, %v2227_v1  ;;  %v2256_v48 = vmax.f32 %v2145_v47, 0.0  ;;  %v1823_v30 = vpop.f32.mrf.mxu1  ;;  %v1570_v20 = vadd.f32 %v4436_v58, %v1569_v37 }
 0x29b   : > { %3674 = vst [vmem:[%s3941_s9 + $0xf0] sm:$0xff] %v3553_v63   ;;  %v3623_v29 = vpack.c.bf16 %v2256_v48, %v2255_v6  ;;  %v1824_v21 = vadd.f32 %v1823_v30, %v1570_v20 }
 0x29d   : > { %3688 = vst [vmem:[%s3941_s9 + $0x160] sm:$0xff] %v3623_v29   ;;  %v2078_v14 = vadd.f32 %v2077_v60, %v1824_v21 }
 0x29e   : > { %v2147_v0 = vpop.f32.mrf.mxu3 }
 0x29f   : > { %v2148_v31 = vadd.f32 %v2147_v0, %v4293_v2  ;;  %v2229_v26 = vmax.f32 %v2078_v14, 0.0 }
 0x2a0   : > { %v1571_v34 = vpop.f32.mrf.mxu0  ;;  %v2084_v61 = vpop.f32.mrf.mxu2 }
 0x2a1   : > { %v1572_v59 = vadd.f32 %v4436_v58, %v1571_v34  ;;  %v1825_v44 = vpop.f32.mrf.mxu1  ;;  %v2257_v41 = vmax.f32 %v2148_v31, 0.0 }
 0x2a3   : > { %v1826_v57 = vadd.f32 %v1825_v44, %v1572_v59 }
 0x2a5   : > { %v2080_v12 = vadd.f32 %v2079_v22, %v1826_v57 }
 0x2a6   : > { %v2149_v40 = vpop.f32.mrf.mxu3 }
 0x2a7   : > { %v2230_v25 = vmax.f32 %v2080_v12, 0.0  ;;  %v2150_v39 = vadd.f32 %v2149_v40, %v4307_v13 }
 0x2a8   : > { %v1574_v35 = vpop.f32.mrf.mxu0  ;;  %v2087_v23 = vpop.f32.mrf.mxu2 }
 0x2a9   : > { %v3558_v10 = vpack.c.bf16 %v2230_v25, %v2229_v26  ;;  %v2258_v5 = vmax.f32 %v2150_v39, 0.0  ;;  %v1828_v15 = vpop.f32.mrf.mxu1  ;;  %v1575_v49 = vadd.f32 %v4436_v58, %v1574_v35 }
 0x2ab   : > { %3675 = vst [vmem:[%s3941_s9 + $0xf8] sm:$0xff] %v3558_v10   ;;  %v3628_v32 = vpack.c.bf16 %v2258_v5, %v2257_v41  ;;  %v1829_v46 = vadd.f32 %v1828_v15, %v1575_v49 }
 0x2ad   : > { %3689 = vst [vmem:[%s3941_s9 + $0x168] sm:$0xff] %v3628_v32   ;;  %v2083_v13 = vadd.f32 %v2082_v42, %v1829_v46 }
 0x2ae   : > { %v2152_v17 = vpop.f32.mrf.mxu3 }
 0x2af   : > { %v2153_v60 = vadd.f32 %v2152_v17, %v4314_v36  ;;  %v2231_v56 = vmax.f32 %v2083_v13, 0.0 }
 0x2b0   : > { %v1576_v2 = vpop.f32.mrf.mxu0  ;;  %v2089_v53 = vpop.f32.mrf.mxu2 }
 0x2b1   : > { %v1577_v19 = vadd.f32 %v4436_v58, %v1576_v2  ;;  %v1830_v27 = vpop.f32.mrf.mxu1  ;;  %v2259_v24 = vmax.f32 %v2153_v60, 0.0 }
 0x2b3   : > { %v1831_v54 = vadd.f32 %v1830_v27, %v1577_v19 }
 0x2b5   : > { %v2085_v51 = vadd.f32 %v2084_v61, %v1831_v54 }
 0x2b6   : > { %v2154_v50 = vpop.f32.mrf.mxu3 }
 0x2b7   : > { %v2232_v28 = vmax.f32 %v2085_v51, 0.0  ;;  %v2155_v3 = vadd.f32 %v2154_v50, %v4328_v9 }
 0x2b8   : > { %v1579_v8 = vpop.f32.mrf.mxu0  ;;  %v2092_v4 = vpop.f32.mrf.mxu2 }
 0x2b9   : > { %v3563_v22 = vpack.c.bf16 %v2232_v28, %v2231_v56  ;;  %v2260_v33 = vmax.f32 %v2155_v3, 0.0  ;;  %v1833_v16 = vpop.f32.mrf.mxu1  ;;  %v1580_v11 = vadd.f32 %v4436_v58, %v1579_v8 }
 0x2bb   : > { %3676 = vst [vmem:[%s3941_s9 + $0x100] sm:$0xff] %v3563_v22   ;;  %v3633_v52 = vpack.c.bf16 %v2260_v33, %v2259_v24  ;;  %v1834_v55 = vadd.f32 %v1833_v16, %v1580_v11 }
 0x2bd   : > { %3690 = vst [vmem:[%s3941_s9 + $0x170] sm:$0xff] %v3633_v52   ;;  %v2088_v9 = vadd.f32 %v2087_v23, %v1834_v55 }
 0x2be   : > { %v2157_v1 = vpop.f32.mrf.mxu3 }
 0x2bf   : > { %v2158_v48 = vadd.f32 %v2157_v1, %v4335_v7  ;;  %v2233_v29 = vmax.f32 %v2088_v9, 0.0 }
 0x2c0   : > { %v1581_v36 = vpop.f32.mrf.mxu0  ;;  %v2094_v6 = vpop.f32.mrf.mxu2 }
 0x2c1   : > { %v1582_v47 = vadd.f32 %v4436_v58, %v1581_v36  ;;  %v1835_v37 = vpop.f32.mrf.mxu1  ;;  %v2261_v34 = vmax.f32 %v2158_v48, 0.0 }
 0x2c3   : > { %v1836_v63 = vadd.f32 %v1835_v37, %v1582_v47 }
 0x2c5   : > { %v2090_v30 = vadd.f32 %v2089_v53, %v1836_v63 }
 0x2c6   : > { %v2159_v42 = vpop.f32.mrf.mxu3 }
 0x2c7   : > { %v2234_v20 = vmax.f32 %v2090_v30, 0.0  ;;  %v2160_v0 = vadd.f32 %v2159_v42, %v4349_v45 }
 0x2c8   : > { %v1584_v21 = vpop.f32.mrf.mxu0  ;;  %v2097_v14 = vpop.f32.mrf.mxu2 }
 0x2c9   : > { %v3568_v59 = vpack.c.bf16 %v2234_v20, %v2233_v29  ;;  %v2262_v44 = vmax.f32 %v2160_v0, 0.0  ;;  %v1838_v61 = vpop.f32.mrf.mxu1  ;;  %v1585_v31 = vadd.f32 %v4436_v58, %v1584_v21 }
 0x2cb   : > { %3677 = vst [vmem:[%s3941_s9 + $0x108] sm:$0xff] %v3568_v59   ;;  %v3638_v57 = vpack.c.bf16 %v2262_v44, %v2261_v34  ;;  %v1839_v40 = vadd.f32 %v1838_v61, %v1585_v31 }
 0x2cd   : > { %3691 = vst [vmem:[%s3941_s9 + $0x178] sm:$0xff] %v3638_v57   ;;  %v2093_v45 = vadd.f32 %v2092_v4, %v1839_v40 }
 0x2ce   : > { %v2162_v12 = vpop.f32.mrf.mxu3 }
 0x2cf   : > { %v2163_v41 = vadd.f32 %v2162_v12, %v4356_v43  ;;  %v2235_v15 = vmax.f32 %v2093_v45, 0.0 }
 0x2d0   : > { %v1586_v7 = vpop.f32.mrf.mxu0  ;;  %v2099_v39 = vpop.f32.mrf.mxu2 }
 0x2d1   : > { %v1587_v26 = vadd.f32 %v4436_v58, %v1586_v7  ;;  %v1840_v25 = vpop.f32.mrf.mxu1  ;;  %v2263_v17 = vmax.f32 %v2163_v41, 0.0 }
 0x2d3   : > { %v1841_v35 = vadd.f32 %v1840_v25, %v1587_v26 }
 0x2d5   : > { %v2095_v10 = vadd.f32 %v2094_v6, %v1841_v35 }
 0x2d6   : > { %v2164_v5 = vpop.f32.mrf.mxu3 }
 0x2d7   : > { %v2236_v23 = vmax.f32 %v2095_v10, 0.0  ;;  %v2165_v32 = vadd.f32 %v2164_v5, %v4370_v18 }
 0x2d8   : > { %v1589_v49 = vpop.f32.mrf.mxu0  ;;  %v2102_v27 = vpop.f32.mrf.mxu2 }
 0x2d9   : > { %v3573_v46 = vpack.c.bf16 %v2236_v23, %v2235_v15  ;;  %v2264_v2 = vmax.f32 %v2165_v32, 0.0  ;;  %v1843_v19 = vpop.f32.mrf.mxu1  ;;  %v1590_v13 = vadd.f32 %v4436_v58, %v1589_v49 }
 0x2db   : > { %3678 = vst [vmem:[%s3941_s9 + $0x110] sm:$0xff] %v3573_v46   ;;  %v3643_v53 = vpack.c.bf16 %v2264_v2, %v2263_v17  ;;  %v1844_v54 = vadd.f32 %v1843_v19, %v1590_v13 }
 0x2dd   : > { %3692 = vst [vmem:[%s3941_s9 + $0x180] sm:$0xff] %v3643_v53   ;;  %v2098_v56 = vadd.f32 %v2097_v14, %v1844_v54 }
 0x2df   : > { %v2237_v3 = vmax.f32 %v2098_v56, 0.0 }
 0x2e0   : > { %v1591_v43 = vpop.f32.mrf.mxu0  ;;  %v2104_v50 = vpop.f32.mrf.mxu2 }
 0x2e1   : > { %v1592_v60 = vadd.f32 %v4436_v58, %v1591_v43  ;;  %v1845_v51 = vpop.f32.mrf.mxu1 }
 0x2e3   : > { %v1846_v18 = vadd.f32 %v1845_v51, %v1592_v60 }
 0x2e5   : > { %v2100_v28 = vadd.f32 %v2099_v39, %v1846_v18 }
 0x2e7   : > { %v2238_v8 = vmax.f32 %v2100_v28, 0.0 }
 0x2e8   : > { %v1594_v24 = vpop.f32.mrf.mxu0  ;;  %v2107_v16 = vpop.f32.mrf.mxu2 }
 0x2e9   : > { %v3578_v22 = vpack.c.bf16 %v2238_v8, %v2237_v3  ;;  %v1848_v33 = vpop.f32.mrf.mxu1  ;;  %v1595_v4 = vadd.f32 %v4436_v58, %v1594_v24  ;;  %v2108_v11 = vadd.f32 %v2107_v16, %v4123_v62 }
 0x2eb   : > { %3679 = vst [vmem:[%s3941_s9 + $0x118] sm:$0xff] %v3578_v22   ;;  %v1849_v52 = vadd.f32 %v1848_v33, %v1595_v4  ;;  %v2241_v63 = vmax.f32 %v2108_v11, 0.0 }
 0x2ed   : > { %v2103_v6 = vadd.f32 %v2102_v27, %v1849_v52 }
 0x2ef   : > { %v2239_v29 = vmax.f32 %v2103_v6, 0.0 }
 0x2f0   : > { %v1596_v1 = vpop.f32.mrf.mxu0  ;;  %v2109_v36 = vpop.f32.mrf.mxu2 }
 0x2f1   : > { %v1597_v55 = vadd.f32 %v4436_v58, %v1596_v1  ;;  %v1850_v47 = vpop.f32.mrf.mxu1  ;;  %v2110_v37 = vadd.f32 %v2109_v36, %v4137_v38 }
 0x2f3   : > { %v1851_v9 = vadd.f32 %v1850_v47, %v1597_v55  ;;  %v2242_v48 = vmax.f32 %v2110_v37, 0.0 }
 0x2f5   : > { %v2105_v30 = vadd.f32 %v2104_v50, %v1851_v9  ;;  %v3588_v42 = vpack.c.bf16 %v2242_v48, %v2241_v63 }
 0x2f7   : > { %v2240_v20 = vmax.f32 %v2105_v30, 0.0  ;;  %3681 = vst [vmem:[%s3941_s9 + $0x128] sm:$0xff] %v3588_v42  }
 0x2f9   : > { %v3583_v0 = vpack.c.bf16 %v2240_v20, %v2239_v29 }
 0x2fb   : > { %3680 = vst [vmem:[%s3941_s9 + $0x120] sm:$0xff] %v3583_v0  }
 0x2fc PF: > { %s13_s12 = sadd.s32 1, %s3729_s12  }
 0x2fd   : > { %p10_p4 = scmp.ge.s32.totalorder %s13_s12, 4  }
 0x2ff   :  { %12 = sbr.rel (!%p10_p4) target bundleno = 1 (0x1), region = 62 }

// kernel: model_forward.6
= control target key start
LH: loop header
LB: loop body
LE: loop exit
PB: predicated region body
PF: predicated region fallthrough
CT: control target
= control target key end

     0   :  { %s2033_s12 = smov 0   ;;  %s2430_s0 = inlined_call_operand.vmem [shape: bf16[400,576], index: 0, kind: input, shape index: {}]   ;;  %s2431_s1 = inlined_call_operand.vmem [shape: bf16[576,128], index: 1, kind: input, shape index: {}]   ;;  %s2432_s2 = inlined_call_operand.vmem [shape: f32[1,128], index: 2, kind: input, shape index: {}]   ;;  %s2433_s3 = inlined_call_operand.vmem [shape: bf16[400,128], index: 3, kind: output, shape index: {}]  }
   0x1 LB: > { %s1398_s13 = sadd.s32 4294967295, %s2011_s12   ;;  %p1402_p0 = scmp.ge.s32.totalorder %s2011_s12, 1  ;;  %s2011_s12 = sphi %s2033_s12, %s13_s12  }
   0x2   : > { %p139_p1 = scmp.lt.s32.totalorder %s2011_s12, 3 }
   0x4   : > { %p140_p2 = pnand %p1402_p0, %p139_p1 }
   0x5   : > { %s164_s20 = smul.u32 (!%p140_p2), 25, %s1398_s13 }
   0x6   : > { %143 = sbr.rel (%p140_p2) target bundleno = 438 (0x1b6), region = 32 }
   0x7   : > { %p165_p3 = scmp.lt.s32.totalorder (!%p140_p2), %s164_s20, 49 }
   0xb   : > { %v1871_v0 = vld [vmem:[%s2431_s1 + $0x38] sm:$0xff]  ;;  %v1870_v1 = vld [vmem:[%s2431_s1 + $0x30] sm:$0xff]  ;;  %v1869_v2 = vld [vmem:[%s2431_s1 + $0x28] sm:$0xff]  ;;  %s2435_s20 = smov (!%p165_p3, %s164_s20), 49  ;;  %vm862_vm0 = vcmask 523264  }
   0xc   : > { %902 = vmatpush.bf16.msra.mxu0 %v1871_v0  ;;  %1971 = vmatpush.bf16.msra.mxu1 %v1871_v0  ;;  %v1868_v3 = vld [vmem:[%s2431_s1 + $0x20] sm:$0xff]  ;;  %v1867_v4 = vld [vmem:[%s2431_s1 + $0x18] sm:$0xff]  ;;  %v1866_v5 = vld [vmem:[%s2431_s1 + $0x10] sm:$0xff]  ;;  %s1995_s27 = smul.u32 20, %s2435_s20  ;;  %s1404_s19 = sshll.u32 %s2435_s20, 2 }
   0xd   : > { %1973 = vmatpush.bf16.msra.mxu3 %v1871_v0  ;;  %1972 = vmatpush.bf16.msra.mxu2 %v1871_v0  ;;  %v1865_v6 = vld [vmem:[%s2431_s1 + $0x8] sm:$0xff]  ;;  %v1864_v7 = vld [vmem:[%s2431_s1] sm:$0xff]  ;;  %v1879_v12 = vld [vmem:[%s2431_s1 + $0x78] sm:$0xff]  ;;  %s2364_s23 = scalar_lea.vmem %s2433_s3, %s1404_s19 }
   0xe   : > { %s2068_s5 = scalar_lea.vmem %s2430_s0, %s1995_s27  ;;  %v1899_v15 = vld [vmem:[%s2431_s1 + $0x118] sm:$0xff]  ;;  %v1878_v22 = vld [vmem:[%s2431_s1 + $0x70] sm:$0xff]  ;;  %v1877_v27 = vld [vmem:[%s2431_s1 + $0x68] sm:$0xff] }
   0xf   : > { %v1407_v8 = vld [vmem:[%s2068_s5] sm:$0xf]  ;;  %v1806_v9 = vld [vmem:[%s2068_s5 + $0x10] sm:$0xf0]  ;;  %v1607_v13 = vld [vmem:[%s2068_s5 + $0x190] sm:$0xf] }
  0x10   : > { %903 = vmatpush.bf16.msra.mxu0 %v1870_v1  ;;  %1974 = vmatpush.bf16.msra.mxu1 %v1870_v1  ;;  %v1487_v10 = vld [vmem:[%s2068_s5 + $0xa0] sm:$0xf]  ;;  %v1826_v11 = vld [vmem:[%s2068_s5 + $0xb0] sm:$0xf0]  ;;  %v1856_v14 = vld [vmem:[%s2068_s5 + $0x1a0] sm:$0xf0]  ;;  %v1408_v17 = vor.u32 %v1806_v9, %v1407_v8 }
  0x11   : > { %1976 = vmatpush.bf16.msra.mxu3 %v1870_v1  ;;  %1975 = vmatpush.bf16.msra.mxu2 %v1870_v1  ;;  %v1895_v16 = vld [vmem:[%s2431_s1 + $0xf8] sm:$0xff]  ;;  %v1488_v18 = vor.u32 %v1826_v11, %v1487_v10  ;;  %v1608_v19 = vor.u32 %v1856_v14, %v1607_v13  ;;  %v1567_v20 = vld [vmem:[%s2068_s5 + $0x140] sm:$0xf]  ;;  %v1846_v21 = vld [vmem:[%s2068_s5 + $0x150] sm:$0xf0] }
  0x12   : > { %v1887_v23 = vld [vmem:[%s2431_s1 + $0xb8] sm:$0xff]  ;;  %v1894_v24 = vld [vmem:[%s2431_s1 + $0xf0] sm:$0xff]  ;;  %v1568_v26 = vor.u32 %v1846_v21, %v1567_v20  ;;  %v1893_v29 = vld [vmem:[%s2431_s1 + $0xe8] sm:$0xff] }
  0x13   : > { %v1898_v25 = vld [vmem:[%s2431_s1 + $0x110] sm:$0xff]  ;;  %v1897_v30 = vld [vmem:[%s2431_s1 + $0x108] sm:$0xff]  ;;  %v1876_v31 = vld [vmem:[%s2431_s1 + $0x60] sm:$0xff] }
  0x14   : > { %904 = vmatpush.bf16.msra.mxu0 %v1869_v2  ;;  %1977 = vmatpush.bf16.msra.mxu1 %v1869_v2  ;;  %v1886_v28 = vld [vmem:[%s2431_s1 + $0xb0] sm:$0xff]  ;;  %v1885_v32 = vld [vmem:[%s2431_s1 + $0xa8] sm:$0xff]  ;;  %v1892_v33 = vld [vmem:[%s2431_s1 + $0xe0] sm:$0xff] }
  0x15   : > { %1979 = vmatpush.bf16.msra.mxu3 %v1869_v2  ;;  %1978 = vmatpush.bf16.msra.mxu2 %v1869_v2  ;;  %v1427_v34 = vld [vmem:[%s2068_s5 + $0x28] sm:$0xf]  ;;  %v1811_v35 = vld [vmem:[%s2068_s5 + $0x38] sm:$0xf0]  ;;  %v1627_v38 = vld [vmem:[%s2068_s5 + $0x1b8] sm:$0xf] }
  0x16   : > { %v1507_v36 = vld [vmem:[%s2068_s5 + $0xc8] sm:$0xf]  ;;  %v1831_v37 = vld [vmem:[%s2068_s5 + $0xd8] sm:$0xf0]  ;;  %v1861_v39 = vld [vmem:[%s2068_s5 + $0x1c8] sm:$0xf0]  ;;  %v1428_v43 = vor.u32 %v1811_v35, %v1427_v34 }
  0x17   : > { %v1875_v40 = vld [vmem:[%s2431_s1 + $0x58] sm:$0xff]  ;;  %v1884_v41 = vld [vmem:[%s2431_s1 + $0xa0] sm:$0xff]  ;;  %v1508_v44 = vor.u32 %v1831_v37, %v1507_v36  ;;  %v1628_v45 = vor.u32 %v1861_v39, %v1627_v38  ;;  %v1587_v46 = vld [vmem:[%s2068_s5 + $0x168] sm:$0xf] }
  0x18   : > { %905 = vmatpush.bf16.msra.mxu0 %v1868_v3  ;;  %1980 = vmatpush.bf16.msra.mxu1 %v1868_v3  ;;  %v1891_v42 = vld [vmem:[%s2431_s1 + $0xd8] sm:$0xff]  ;;  %v1874_v49 = vld [vmem:[%s2431_s1 + $0x50] sm:$0xff]  ;;  %v1896_v52 = vld [vmem:[%s2431_s1 + $0x100] sm:$0xff] }
  0x19   : > { %1982 = vmatpush.bf16.msra.mxu3 %v1868_v3  ;;  %1981 = vmatpush.bf16.msra.mxu2 %v1868_v3  ;;  %v1851_v47 = vld [vmem:[%s2068_s5 + $0x178] sm:$0xf0]  ;;  %v1890_v50 = vld [vmem:[%s2431_s1 + $0xd0] sm:$0xff]  ;;  %v1873_v54 = vld [vmem:[%s2431_s1 + $0x48] sm:$0xff] }
  0x1a   : > { %v1883_v48 = vld [vmem:[%s2431_s1 + $0x98] sm:$0xff]  ;;  %v1588_v51 = vor.u32 %v1851_v47, %v1587_v46  ;;  %v1882_v53 = vld [vmem:[%s2431_s1 + $0x90] sm:$0xff]  ;;  %v1889_v55 = vld [vmem:[%s2431_s1 + $0xc8] sm:$0xff] }
  0x1b   : > { %v2162_v56 = vld [vmem:[%s2068_s5 + $0x1e0] sm:$0xff]  ;;  %v1881_v57 = vld [vmem:[%s2431_s1 + $0x88] sm:$0xff]  ;;  %v1447_v60 = vld [vmem:[%s2068_s5 + $0x50] sm:$0xf] }
  0x1c   : > { %906 = vmatpush.bf16.msra.mxu0 %v1867_v4  ;;  %1983 = vmatpush.bf16.msra.mxu1 %v1867_v4  ;;  %v1872_v58 = vld [vmem:[%s2431_s1 + $0x40] sm:$0xff]  ;;  %v1527_v62 = vld [vmem:[%s2068_s5 + $0xf0] sm:$0xf]  ;;  %v524_v0 = vunpack.c.l.b16 %v2162_v56  ;;  %v1467_v8 = vld [vmem:[%s2068_s5 + $0x78] sm:$0xf] }
  0x1d   : > { %1985 = vmatpush.bf16.msra.mxu3 %v1867_v4  ;;  %1984 = vmatpush.bf16.msra.mxu2 %v1867_v4  ;;  %v1888_v59 = vld [vmem:[%s2431_s1 + $0xc0] sm:$0xff]  ;;  %v1821_v9 = vld [vmem:[%s2068_s5 + $0x88] sm:$0xf0]  ;;  %v1547_v10 = vld [vmem:[%s2068_s5 + $0x118] sm:$0xf] }
  0x1e   : > { %v1816_v61 = vld [vmem:[%s2068_s5 + $0x60] sm:$0xf0]  ;;  %v589_v4 = vpack.c.b16 %v524_v0, %v524_v0  ;;  %v1841_v11 = vld [vmem:[%s2068_s5 + $0x128] sm:$0xf0]  ;;  %v1417_v13 = vld [vmem:[%s2068_s5 + $0x1c] sm:$0xf0]  ;;  %v1468_v14 = vor.u32 %v1821_v9, %v1467_v8 }
  0x1f   : > { %v1836_v63 = vld [vmem:[%s2068_s5 + $0x100] sm:$0xf0]  ;;  %v1448_v2 = vor.u32 %v1816_v61, %v1447_v60  ;;  %v1409_v21 = vld [vmem:[%s2068_s5 + $0x14] sm:$0xf0]  ;;  %v1813_v35 = vld [vmem:[%s2068_s5 + $0x48] sm:$0xf0] }
  0x20   : > { %907 = vmatpush.bf16.msra.mxu0 %v1866_v5  ;;  %1986 = vmatpush.bf16.msra.mxu1 %v1866_v5  ;;  %v1880_v1 = vld [vmem:[%s2431_s1 + $0x80] sm:$0xff]  ;;  %v1528_v3 = vor.u32 %v1836_v63, %v1527_v62  ;;  %v1443_v34 = vld [vmem:[%s2068_s5 + $0x38] sm:$0xf]  ;;  %v1815_v36 = vld [vmem:[%s2068_s5 + $0x5c] sm:$0xf] }
  0x21   : > { %1988 = vmatpush.bf16.msra.mxu3 %v1866_v5  ;;  %1987 = vmatpush.bf16.msra.mxu2 %v1866_v5  ;;  %v1415_v5 = vld [vmem:[%s2068_s5 + $0x8] sm:$0xf]  ;;  %v1804_v20 = vld [vmem:[%s2068_s5 + $0x4] sm:$0xf]  ;;  %v1457_v37 = vld [vmem:[%s2068_s5 + $0x6c] sm:$0xf0]  ;;  %v1444_v39 = vor.u32 %v1813_v35, %v1443_v34 }
  0x22   : > { %v1463_v46 = vld [vmem:[%s2068_s5 + $0x60] sm:$0xf]  ;;  %v1818_v47 = vld [vmem:[%s2068_s5 + $0x70] sm:$0xf0]  ;;  %v1823_v60 = vld [vmem:[%s2068_s5 + $0x98] sm:$0xf0] }
  0x23   : > { %v1825_v61 = vld [vmem:[%s2068_s5 + $0xac] sm:$0xf]  ;;  %v1497_v62 = vld [vmem:[%s2068_s5 + $0xbc] sm:$0xf0]  ;;  %v1828_v8 = vld [vmem:[%s2068_s5 + $0xc0] sm:$0xf0] }
  0x24   : > { %908 = vmatpush.bf16.msra.mxu0 %v1865_v6  ;;  %1989 = vmatpush.bf16.msra.mxu1 %v1865_v6  ;;  %v2234_v9 = vld [vmem:[%s2432_s2] ss:$0 sm:$0xff] }
  0x25   : > { %1991 = vmatpush.bf16.msra.mxu3 %v1865_v6  ;;  %1990 = vmatpush.bf16.msra.mxu2 %v1865_v6  ;;  %v1807_v6 = vld [vmem:[%s2068_s5 + $0x18] sm:$0xf0] }
  0x28   : > { %909 = vmatpush.bf16.msra.mxu0 %v1864_v7  ;;  %1992 = vmatpush.bf16.msra.mxu1 %v1864_v7 }
  0x29   : > { %1994 = vmatpush.bf16.msra.mxu3 %v1864_v7  ;;  %1993 = vmatpush.bf16.msra.mxu2 %v1864_v7  ;;  %v1416_v7 = vor.u32 %v1807_v6, %v1415_v5  ;;  %v1824_v5 = vld [vmem:[%s2068_s5 + $0xa4] sm:$0xf]  ;;  %v1489_v6 = vld [vmem:[%s2068_s5 + $0xb4] sm:$0xf0] }
  0x2b   : > { %910 = vmatmul.bf16.vlgmr.msra.gmra.mxu0 %v1408_v17  ;;  %930 = vmatmul.bf16.vlgmr.msra.gmra.mxu1 %v1488_v18  ;;  %v1435_v17 = vld [vmem:[%s2068_s5 + $0x30] sm:$0xf]  ;;  %v1812_v18 = vld [vmem:[%s2068_s5 + $0x40] sm:$0xf0] }
  0x2c   : > { %975 = vmatpush.bf16.msrb.mxu1 %v1879_v12  ;;  %1198 = vmatpush.bf16.msrb.mxu0 %v1899_v15  ;;  %v1805_v12 = vld [vmem:[%s2068_s5 + $0xc] sm:$0xf]  ;;  %v1548_v15 = vor.u32 %v1841_v11, %v1547_v10  ;;  %v1830_v10 = vld [vmem:[%s2068_s5 + $0xd4] sm:$0xf]  ;;  %v1517_v11 = vld [vmem:[%s2068_s5 + $0xe4] sm:$0xf0] }
  0x2d   : > { %1121 = vmatpush.bf16.msrb.mxu3 %v1895_v16  ;;  %1048 = vmatpush.bf16.msrb.mxu2 %v1887_v23  ;;  %v1420_v16 = vor.u32 %v1805_v12, %v1417_v13  ;;  %v1808_v23 = vld [vmem:[%s2068_s5 + $0x20] sm:$0xf0]  ;;  %v1492_v12 = vor.u32 %v1824_v5, %v1489_v6  ;;  %v1847_v5 = vld [vmem:[%s2068_s5 + $0x158] sm:$0xf0] }
  0x2e   : > { %960 = vmatmul.bf16.vlgmr.msra.gmra.mxu3 %v1608_v19  ;;  %950 = vmatmul.bf16.vlgmr.msra.gmra.mxu2 %v1568_v26  ;;  %v1436_v19 = vor.u32 %v1812_v18, %v1435_v17  ;;  %v1412_v26 = vor.u32 %v1804_v20, %v1409_v21  ;;  %v1535_v17 = vld [vmem:[%s2068_s5 + $0xf8] sm:$0xf]  ;;  %v1837_v18 = vld [vmem:[%s2068_s5 + $0x108] sm:$0xf0] }
  0x2f   : > { %v1536_v20 = vor.u32 %v1837_v18, %v1535_v17  ;;  %v1839_v18 = vld [vmem:[%s2068_s5 + $0x11c] sm:$0xf] }
  0x30   : > { %976 = vmatpush.bf16.msrb.mxu1 %v1878_v22  ;;  %1199 = vmatpush.bf16.msrb.mxu0 %v1898_v25  ;;  %v1423_v22 = vld [vmem:[%s2068_s5 + $0x10] sm:$0xf]  ;;  %v1437_v25 = vld [vmem:[%s2068_s5 + $0x44] sm:$0xf0] }
  0x31   : > { %1122 = vmatpush.bf16.msrb.mxu3 %v1894_v24  ;;  %1049 = vmatpush.bf16.msrb.mxu2 %v1886_v28  ;;  %v1810_v24 = vld [vmem:[%s2068_s5 + $0x34] sm:$0xf] }
  0x32   : > { %v1440_v28 = vor.u32 %v1810_v24, %v1437_v25 }
  0x34   : > { %977 = vmatpush.bf16.msrb.mxu1 %v1877_v27  ;;  %1200 = vmatpush.bf16.msrb.mxu0 %v1897_v30  ;;  %v1424_v27 = vor.u32 %v1808_v23, %v1423_v22  ;;  %v1817_v30 = vld [vmem:[%s2068_s5 + $0x68] sm:$0xf0] }
  0x35   : > { %1123 = vmatpush.bf16.msrb.mxu3 %v1893_v29  ;;  %1050 = vmatpush.bf16.msrb.mxu2 %v1885_v32  ;;  %v1455_v29 = vld [vmem:[%s2068_s5 + $0x58] sm:$0xf]  ;;  %v1809_v32 = vld [vmem:[%s2068_s5 + $0x2c] sm:$0xf] }
  0x38   : > { %978 = vmatpush.bf16.msrb.mxu1 %v1876_v31  ;;  %1201 = vmatpush.bf16.msrb.mxu0 %v1896_v52  ;;  %v1456_v31 = vor.u32 %v1817_v30, %v1455_v29  ;;  %v1509_v29 = vld [vmem:[%s2068_s5 + $0xdc] sm:$0xf0]  ;;  %v1523_v30 = vld [vmem:[%s2068_s5 + $0xd8] sm:$0xf] }
  0x39   : > { %1124 = vmatpush.bf16.msrb.mxu3 %v1892_v33  ;;  %1051 = vmatpush.bf16.msrb.mxu2 %v1884_v41  ;;  %v1429_v33 = vld [vmem:[%s2068_s5 + $0x3c] sm:$0xf0] }
  0x3a   : > { %v1432_v38 = vor.u32 %v1809_v32, %v1429_v33  ;;  %v1475_v41 = vld [vmem:[%s2068_s5 + $0x80] sm:$0xf]  ;;  %v1835_v32 = vld [vmem:[%s2068_s5 + $0xfc] sm:$0xf]  ;;  %v1537_v33 = vld [vmem:[%s2068_s5 + $0x10c] sm:$0xf0] }
  0x3b   : > { %915 = vmatmul.bf16.gmra.mxu0 %v1428_v43  ;;  %935 = vmatmul.bf16.gmra.mxu1 %v1508_v44  ;;  %v1814_v44 = vld [vmem:[%s2068_s5 + $0x54] sm:$0xf] }
  0x3c   : > { %979 = vmatpush.bf16.msrb.mxu1 %v1875_v40  ;;  %v1460_v40 = vor.u32 %v1815_v36, %v1457_v37 }
  0x3d   : > { %1125 = vmatpush.bf16.msrb.mxu3 %v1891_v42  ;;  %1052 = vmatpush.bf16.msrb.mxu2 %v1883_v48  ;;  %v1822_v42 = vld [vmem:[%s2068_s5 + $0x90] sm:$0xf0]  ;;  %v1820_v48 = vld [vmem:[%s2068_s5 + $0x84] sm:$0xf] }
  0x3e   : > { %965 = vmatmul.bf16.gmra.mxu3 %v1628_v45  ;;  %955 = vmatmul.bf16.gmra.mxu2 %v1588_v51  ;;  %v1476_v43 = vor.u32 %v1822_v42, %v1475_v41  ;;  %v1449_v45 = vld [vmem:[%s2068_s5 + $0x64] sm:$0xf0]  ;;  %v1464_v51 = vor.u32 %v1818_v47, %v1463_v46  ;;  %v1555_v41 = vld [vmem:[%s2068_s5 + $0x120] sm:$0xf]  ;;  %v1842_v42 = vld [vmem:[%s2068_s5 + $0x130] sm:$0xf0] }
  0x3f   : > { %v1556_v46 = vor.u32 %v1842_v42, %v1555_v41 }
  0x40   : > { %980 = vmatpush.bf16.msrb.mxu1 %v1874_v49  ;;  %v1477_v49 = vld [vmem:[%s2068_s5 + $0x94] sm:$0xf0] }
  0x41   : > { %1126 = vmatpush.bf16.msrb.mxu3 %v1890_v50  ;;  %1053 = vmatpush.bf16.msrb.mxu2 %v1882_v53  ;;  %v1452_v50 = vor.u32 %v1814_v44, %v1449_v45  ;;  %v1480_v52 = vor.u32 %v1820_v48, %v1477_v49  ;;  %v1495_v53 = vld [vmem:[%s2068_s5 + $0xa8] sm:$0xf] }
  0x44   : > { %981 = vmatpush.bf16.msrb.mxu1 %v1873_v54  ;;  %v1827_v54 = vld [vmem:[%s2068_s5 + $0xb8] sm:$0xf0] }
  0x45   : > { %1127 = vmatpush.bf16.msrb.mxu3 %v1889_v55  ;;  %1054 = vmatpush.bf16.msrb.mxu2 %v1881_v57  ;;  %v1496_v55 = vor.u32 %v1827_v54, %v1495_v53  ;;  %v1819_v57 = vld [vmem:[%s2068_s5 + $0x7c] sm:$0xf]  ;;  %v1834_v53 = vld [vmem:[%s2068_s5 + $0xf4] sm:$0xf] }
  0x48   : > { %982 = vmatpush.bf16.msrb.mxu1 %v1872_v58  ;;  %v1469_v58 = vld [vmem:[%s2068_s5 + $0x8c] sm:$0xf0] }
  0x49   : > { %1128 = vmatpush.bf16.msrb.mxu3 %v1888_v59  ;;  %1055 = vmatpush.bf16.msrb.mxu2 %v1880_v1  ;;  %v1483_v59 = vld [vmem:[%s2068_s5 + $0x88] sm:$0xf]  ;;  %v1472_v63 = vor.u32 %v1819_v57, %v1469_v58  ;;  %v1500_v1 = vor.u32 %v1825_v61, %v1497_v62  ;;  %v1543_v57 = vld [vmem:[%s2068_s5 + $0x100] sm:$0xf]  ;;  %v1838_v58 = vld [vmem:[%s2068_s5 + $0x110] sm:$0xf0] }
  0x4a   : > { %v1484_v0 = vor.u32 %v1823_v60, %v1483_v59  ;;  %v1840_v59 = vld [vmem:[%s2068_s5 + $0x124] sm:$0xf]  ;;  %v1557_v60 = vld [vmem:[%s2068_s5 + $0x134] sm:$0xf0]  ;;  %v1544_v62 = vor.u32 %v1838_v58, %v1543_v57  ;;  %v1850_v58 = vld [vmem:[%s2068_s5 + $0x174] sm:$0xf] }
  0x4b   : > { %920 = vmatmul.bf16.gmra.mxu0 %v1448_v2  ;;  %940 = vmatmul.bf16.gmra.mxu1 %v1528_v3  ;;  %v1515_v2 = vld [vmem:[%s2068_s5 + $0xd0] sm:$0xf]  ;;  %v1832_v3 = vld [vmem:[%s2068_s5 + $0xe0] sm:$0xf0] }
  0x4c   : > { %v1848_v57 = vld [vmem:[%s2068_s5 + $0x160] sm:$0xf0] }
  0x4e   : > { %970 = vmatmul.bf16.gmra.mxu3 %v589_v4  ;;  %1056 = vmatmul.bf16.vlgmr.msrb.gmra.mxu2 %v1416_v7  ;;  %v1516_v4 = vor.u32 %v1832_v3, %v1515_v2  ;;  %v1503_v7 = vld [vmem:[%s2068_s5 + $0xb0] sm:$0xf]  ;;  %v1560_v3 = vor.u32 %v1840_v59, %v1557_v60  ;;  %v1597_v59 = vld [vmem:[%s2068_s5 + $0x184] sm:$0xf0] }
  0x4f   : > { %v1504_v13 = vor.u32 %v1828_v8, %v1503_v7 }
  0x5b   : > { %925 = vmatmul.bf16.gmra.mxu0 %v1468_v14  ;;  %945 = vmatmul.bf16.gmra.mxu1 %v1548_v15 }
  0x5e   : > { %1129 = vmatmul.bf16.vlgmr.msrb.gmra.mxu3 %v1420_v16  ;;  %1061 = vmatmul.bf16.gmra.mxu2 %v1436_v19  ;;  %v1520_v16 = vor.u32 %v1830_v10, %v1517_v11 }
  0x6b   : > { %983 = vmatmul.bf16.vlgmr.msrb.gmra.mxu1 %v1412_v26  ;;  %1789 = vmatmul.msk.bf16.vlgmr.msrb.gmra.mxu0 %vm862_vm0, %v1424_v27  ;;  %v1829_v27 = vld [vmem:[%s2068_s5 + $0xcc] sm:$0xf] }
  0x6c   : > { %v1512_v34 = vor.u32 %v1829_v27, %v1509_v29  ;;  %v1577_v27 = vld [vmem:[%s2068_s5 + $0x15c] sm:$0xf0] }
  0x6e   : > { %1134 = vmatmul.bf16.gmra.mxu3 %v1440_v28  ;;  %1066 = vmatmul.bf16.gmra.mxu2 %v1456_v31  ;;  %v1833_v31 = vld [vmem:[%s2068_s5 + $0xe8] sm:$0xf0] }
  0x6f   : > { %v1524_v35 = vor.u32 %v1833_v31, %v1523_v30 }
  0x7b   : > { %988 = vmatmul.bf16.gmra.mxu1 %v1432_v38  ;;  %1790 = vmatmul.msk.bf16.gmra.mxu0 %vm862_vm0, %v1444_v39 }
  0x7e   : > { %1139 = vmatmul.bf16.gmra.mxu3 %v1460_v40  ;;  %1071 = vmatmul.bf16.gmra.mxu2 %v1476_v43  ;;  %v1540_v40 = vor.u32 %v1835_v32, %v1537_v33 }
  0x8b   : > { %993 = vmatmul.bf16.gmra.mxu1 %v1452_v50  ;;  %1791 = vmatmul.msk.bf16.gmra.mxu0 %vm862_vm0, %v1464_v51 }
  0x8e   : > { %1144 = vmatmul.bf16.gmra.mxu3 %v1480_v52  ;;  %1076 = vmatmul.bf16.gmra.mxu2 %v1496_v55  ;;  %v1529_v55 = vld [vmem:[%s2068_s5 + $0x104] sm:$0xf0] }
  0x8f   : > { %v1532_v61 = vor.u32 %v1834_v53, %v1529_v55  ;;  %v1569_v53 = vld [vmem:[%s2068_s5 + $0x154] sm:$0xf0]  ;;  %v1583_v55 = vld [vmem:[%s2068_s5 + $0x150] sm:$0xf] }
  0x9b   : > { %998 = vmatmul.bf16.gmra.mxu1 %v1472_v63  ;;  %1792 = vmatmul.msk.bf16.gmra.mxu0 %vm862_vm0, %v1484_v0 }
  0x9e   : > { %1149 = vmatmul.bf16.gmra.mxu3 %v1500_v1  ;;  %1081 = vmatmul.bf16.gmra.mxu2 %v1516_v4  ;;  %v1575_v4 = vld [vmem:[%s2068_s5 + $0x148] sm:$0xf] }
  0x9f   : > { %v1576_v10 = vor.u32 %v1847_v5, %v1575_v4  ;;  %v1600_v4 = vor.u32 %v1850_v58, %v1597_v59  ;;  %v1615_v5 = vld [vmem:[%s2068_s5 + $0x198] sm:$0xf]  ;;  %v1635_v59 = vld [vmem:[%s2068_s5 + $0x1c0] sm:$0xf] }
  0xa8   : > { %v2238_v14 = vpop.f32.mrf.mxu0  ;;  %v931_v15 = vpop.f32.mrf.mxu1 }
  0xa9   : > { %v2243_v19 = vadd.f32 %v2234_v9, %v931_v15  ;;  %v912_v60 = vadd.f32 %v2234_v9, %v2238_v14 }
  0xab   : > { %1003 = vmatmul.bf16.gmra.mxu1 %v1492_v12  ;;  %1793 = vmatmul.msk.bf16.gmra.mxu0 %vm862_vm0, %v1504_v13 }
  0xae   : > { %1154 = vmatmul.bf16.gmra.mxu3 %v1520_v16  ;;  %1086 = vmatmul.bf16.gmra.mxu2 %v1536_v20  ;;  %v1549_v20 = vld [vmem:[%s2068_s5 + $0x12c] sm:$0xf0] }
  0xaf   : > { %v1552_v29 = vor.u32 %v1839_v18, %v1549_v20 }
  0xb0   : > { %v2246_v22 = vpop.f32.mrf.mxu0  ;;  %v933_v23 = vpop.f32.mrf.mxu1 }
  0xb1   : > { %v961_v21 = vpop.f32.mrf.mxu3  ;;  %v2252_v25 = vadd.f32 %v2234_v9, %v933_v23  ;;  %v951_v26 = vpop.f32.mrf.mxu2  ;;  %v1843_v23 = vld [vmem:[%s2068_s5 + $0x138] sm:$0xf0]  ;;  %v914_v18 = vadd.f32 %v2234_v9, %v2246_v22 }
  0xb2   : > { %v2249_v24 = vadd.f32 %v2234_v9, %v961_v21  ;;  %v2256_v28 = vadd.f32 %v2234_v9, %v951_v26  ;;  %v1563_v21 = vld [vmem:[%s2068_s5 + $0x128] sm:$0xf]  ;;  %v1845_v26 = vld [vmem:[%s2068_s5 + $0x14c] sm:$0xf]  ;;  %v1855_v22 = vld [vmem:[%s2068_s5 + $0x19c] sm:$0xf] }
  0xb3   : > { %v1564_v30 = vor.u32 %v1843_v23, %v1563_v21 }
  0xb8   : > { %v2263_v37 = vpop.f32.mrf.mxu0  ;;  %v936_v38 = vpop.f32.mrf.mxu1 }
  0xb9   : > { %v963_v36 = vpop.f32.mrf.mxu3  ;;  %v2271_v43 = vadd.f32 %v2234_v9, %v936_v38  ;;  %v953_v44 = vpop.f32.mrf.mxu2 }
  0xba   : > { %v2266_v39 = vadd.f32 %v2234_v9, %v963_v36  ;;  %v2275_v45 = vadd.f32 %v2234_v9, %v953_v44  ;;  %v1852_v36 = vld [vmem:[%s2068_s5 + $0x180] sm:$0xf0] }
  0xbb   : > { %1008 = vmatmul.bf16.gmra.mxu1 %v1512_v34  ;;  %1794 = vmatmul.msk.bf16.gmra.mxu0 %vm862_vm0, %v1524_v35  ;;  %v1580_v34 = vor.u32 %v1845_v26, %v1577_v27  ;;  %v1595_v35 = vld [vmem:[%s2068_s5 + $0x170] sm:$0xf] }
  0xbc   : > { %v1596_v41 = vor.u32 %v1852_v36, %v1595_v35 }
  0xbe   : > { %1159 = vmatmul.bf16.gmra.mxu3 %v1540_v40  ;;  %1091 = vmatmul.bf16.gmra.mxu2 %v1556_v46 }
  0xc0   : > { %v2277_v48 = vpop.f32.mrf.mxu0  ;;  %v938_v49 = vpop.f32.mrf.mxu1 }
  0xc1   : > { %v966_v47 = vpop.f32.mrf.mxu3  ;;  %v2283_v51 = vadd.f32 %v2234_v9, %v938_v49  ;;  %v956_v52 = vpop.f32.mrf.mxu2 }
  0xc2   : > { %v2280_v50 = vadd.f32 %v2234_v9, %v966_v47  ;;  %v2287_v54 = vadd.f32 %v2234_v9, %v956_v52  ;;  %v1844_v52 = vld [vmem:[%s2068_s5 + $0x144] sm:$0xf] }
  0xc8   : > { %v2294_v0 = vpop.f32.mrf.mxu0  ;;  %v941_v1 = vpop.f32.mrf.mxu1 }
  0xc9   : > { %v968_v63 = vpop.f32.mrf.mxu3  ;;  %v2302_v6 = vadd.f32 %v2234_v9, %v941_v1  ;;  %v958_v7 = vpop.f32.mrf.mxu2 }
  0xca   : > { %v2297_v2 = vadd.f32 %v2234_v9, %v968_v63  ;;  %v2306_v8 = vadd.f32 %v2234_v9, %v958_v7  ;;  %v1857_v7 = vld [vmem:[%s2068_s5 + $0x1a8] sm:$0xf0] }
  0xcb   : > { %1013 = vmatmul.bf16.gmra.mxu1 %v1532_v61  ;;  %1795 = vmatmul.msk.bf16.gmra.mxu0 %vm862_vm0, %v1544_v62  ;;  %v1572_v61 = vor.u32 %v1844_v52, %v1569_v53  ;;  %v1584_v62 = vor.u32 %v1848_v57, %v1583_v55 }
  0xce   : > { %1164 = vmatmul.bf16.gmra.mxu3 %v1560_v3  ;;  %1096 = vmatmul.bf16.gmra.mxu2 %v1576_v10 }
  0xd0   : > { %v2308_v12 = vpop.f32.mrf.mxu0  ;;  %v943_v13 = vpop.f32.mrf.mxu1 }
  0xd1   : > { %v971_v11 = vpop.f32.mrf.mxu3  ;;  %v2314_v16 = vadd.f32 %v2234_v9, %v943_v13  ;;  %v1057_v17 = vpop.f32.mrf.mxu2  ;;  %v1616_v13 = vor.u32 %v1857_v7, %v1615_v5  ;;  %v919_v5 = vadd.f32 %v2234_v9, %v2277_v48  ;;  %v1637_v48 = vld [vmem:[%s2068_s5 + $0x1d4] sm:$0xf0] }
  0xd2   : > { %v2311_v15 = vadd.f32 %v2234_v9, %v971_v11 }
  0xd8   : > { %v2322_v32 = vpop.f32.mrf.mxu0  ;;  %v946_v33 = vpop.f32.mrf.mxu1 }
  0xd9   : > { %v973_v31 = vpop.f32.mrf.mxu3  ;;  %v2327_v38 = vadd.f32 %v2234_v9, %v946_v33  ;;  %v1059_v40 = vpop.f32.mrf.mxu2  ;;  %v1589_v33 = vld [vmem:[%s2068_s5 + $0x17c] sm:$0xf0] }
  0xda   : > { %v1849_v31 = vld [vmem:[%s2068_s5 + $0x16c] sm:$0xf] }
  0xdb   : > { %1018 = vmatmul.bf16.gmra.mxu1 %v1552_v29  ;;  %1796 = vmatmul.msk.bf16.gmra.mxu0 %vm862_vm0, %v1564_v30 }
  0xde   : > { %1169 = vmatmul.bf16.gmra.mxu3 %v1580_v34  ;;  %1101 = vmatmul.bf16.gmra.mxu2 %v1596_v41  ;;  %v1603_v34 = vld [vmem:[%s2068_s5 + $0x178] sm:$0xf]  ;;  %v1617_v41 = vld [vmem:[%s2068_s5 + $0x1ac] sm:$0xf0] }
  0xdf   : > { %v1620_v58 = vor.u32 %v1855_v22, %v1617_v41 }
  0xe0   : > { %v2330_v44 = vpop.f32.mrf.mxu0  ;;  %v948_v46 = vpop.f32.mrf.mxu1 }
  0xe1   : > { %v1130_v42 = vpop.f32.mrf.mxu3  ;;  %v2333_v47 = vadd.f32 %v2234_v9, %v948_v46  ;;  %v1062_v49 = vpop.f32.mrf.mxu2  ;;  %v917_v46 = vadd.f32 %v2234_v9, %v2263_v37 }
  0xe8   : > { %v984_v1 = vpop.f32.mrf.mxu1  ;;  %v1203_v3 = vpop.f32.mrf.mxu0 }
  0xe9   : > { %v1132_v63 = vpop.f32.mrf.mxu3  ;;  %v985_v10 = vadd.f32 %v984_v1, %v912_v60  ;;  %v1064_v11 = vpop.f32.mrf.mxu2  ;;  %v1862_v60 = vld [vmem:[%s2068_s5 + $0x1d0] sm:$0xf0] }
  0xeb   : > { %1023 = vmatmul.bf16.gmra.mxu1 %v1572_v61  ;;  %1797 = vmatmul.msk.bf16.gmra.mxu0 %vm862_vm0, %v1584_v62  ;;  %v1058_v14 = vadd.f32 %v1057_v17, %v985_v10  ;;  %v1853_v17 = vld [vmem:[%s2068_s5 + $0x188] sm:$0xf0] }
  0xec   : > { %v1604_v53 = vor.u32 %v1853_v17, %v1603_v34  ;;  %v1860_v17 = vld [vmem:[%s2068_s5 + $0x1c4] sm:$0xf] }
  0xed   : > { %v1131_v26 = vadd.f32 %v1130_v42, %v1058_v14  ;;  %v1592_v42 = vor.u32 %v1849_v31, %v1589_v33  ;;  %v1858_v31 = vld [vmem:[%s2068_s5 + $0x1b0] sm:$0xf0]  ;;  %v251_v33 = vld [vmem:[%s2068_s5 + $0x1e8] sm:$0xff] }
  0xee   : > { %1174 = vmatmul.bf16.gmra.mxu3 %v1600_v4  ;;  %1106 = vmatmul.bf16.gmra.mxu2 %v1616_v13 }
  0xef   : > { %v1204_v35 = vadd.f32 %v1203_v3, %v1131_v26  ;;  %v1636_v3 = vor.u32 %v1862_v60, %v1635_v59  ;;  %v1854_v26 = vld [vmem:[%s2068_s5 + $0x194] sm:$0xf]  ;;  %v924_v60 = vadd.f32 %v2234_v9, %v2308_v12 }
  0xf0   : > { %v986_v21 = vpop.f32.mrf.mxu1  ;;  %v1205_v23 = vpop.f32.mrf.mxu0 }
  0xf1   : > { %v1135_v20 = vpop.f32.mrf.mxu3  ;;  %v987_v27 = vadd.f32 %v986_v21, %v914_v18  ;;  %v2348_v29 = vpop.f32.mrf.mxu2  ;;  %v1267_v61 = vmax.f32 %v1204_v35, 0.0  ;;  %v922_v35 = vadd.f32 %v2234_v9, %v2294_v0 }
  0xf3   : > { %v1060_v30 = vadd.f32 %v1059_v40, %v987_v27  ;;  %v1609_v27 = vld [vmem:[%s2068_s5 + $0x1a4] sm:$0xf0] }
  0xf4   : > { %v1612_v22 = vor.u32 %v1854_v26, %v1609_v27 }
  0xf5   : > { %v1133_v36 = vadd.f32 %v1132_v63, %v1060_v30  ;;  %v1623_v30 = vld [vmem:[%s2068_s5 + $0x1a0] sm:$0xf] }
  0xf7   : > { %v1206_v52 = vadd.f32 %v1205_v23, %v1133_v36 }
  0xf8   : > { %v989_v57 = vpop.f32.mrf.mxu1  ;;  %v1208_v40 = vpop.f32.mrf.mxu0 }
  0xf9   : > { %v1137_v55 = vpop.f32.mrf.mxu3  ;;  %v1268_v62 = vmax.f32 %v1206_v52, 0.0  ;;  %v990_v1 = vadd.f32 %v989_v57, %v917_v46  ;;  %v1069_v37 = vpop.f32.mrf.mxu2  ;;  %v526_v46 = vunpack.c.l.b16 %v251_v33 }
  0xfb   : > { %v1903_v63 = vpack.c.bf16 %v1268_v62, %v1267_v61  ;;  %1028 = vmatmul.bf16.gmra.mxu1 %v1592_v42  ;;  %1798 = vmatmul.msk.bf16.gmra.mxu0 %vm862_vm0, %v1604_v53  ;;  %v1063_v4 = vadd.f32 %v1062_v49, %v990_v1  ;;  %v1640_v42 = vor.u32 %v1860_v17, %v1637_v48 }
  0xfc   : > { %v591_v0 = vpack.c.b16 %v526_v46, %v526_v46 }
  0xfd   : > { %1904 = vst [vmem:[%s2364_s23] sm:$0xff] %v1903_v63   ;;  %v1136_v14 = vadd.f32 %v1135_v20, %v1063_v4  ;;  %v1624_v20 = vor.u32 %v1858_v31, %v1623_v30 }
  0xfe   : > { %1179 = vmatmul.bf16.gmra.mxu3 %v1620_v58  ;;  %1111 = vmatmul.bf16.gmra.mxu2 %v1636_v3 }
  0xff   : > { %v1209_v49 = vadd.f32 %v1208_v40, %v1136_v14  ;;  %v1643_v14 = vld [vmem:[%s2068_s5 + $0x1c8] sm:$0xf] }
 0x100   : > { %v991_v10 = vpop.f32.mrf.mxu1  ;;  %v1210_v13 = vpop.f32.mrf.mxu0 }
 0x101   : > { %v1140_v7 = vpop.f32.mrf.mxu3  ;;  %v992_v18 = vadd.f32 %v991_v10, %v919_v5  ;;  %v2370_v21 = vpop.f32.mrf.mxu2  ;;  %v1269_v53 = vmax.f32 %v1209_v49, 0.0  ;;  %v1859_v10 = vld [vmem:[%s2068_s5 + $0x1bc] sm:$0xf] }
 0x103   : > { %v1065_v23 = vadd.f32 %v1064_v11, %v992_v18  ;;  %v1863_v18 = vld [vmem:[%s2068_s5 + $0x1d8] sm:$0xf0] }
 0x104   : > { %v1644_v31 = vor.u32 %v1863_v18, %v1643_v14 }
 0x105   : > { %v1138_v34 = vadd.f32 %v1137_v55, %v1065_v23  ;;  %v527_v23 = vunpack.c.h.b16 %v251_v33  ;;  %v929_v33 = vadd.f32 %v2234_v9, %v2330_v44 }
 0x107   : > { %v1211_v36 = vadd.f32 %v1210_v13, %v1138_v34  ;;  %v1629_v13 = vld [vmem:[%s2068_s5 + $0x1cc] sm:$0xf0]  ;;  %v592_v17 = vpack.c.b16 %v527_v23, %v527_v23 }
 0x108   : > { %v994_v52 = vpop.f32.mrf.mxu1  ;;  %v1213_v11 = vpop.f32.mrf.mxu0  ;;  %v1632_v30 = vor.u32 %v1859_v10, %v1629_v13 }
 0x109   : > { %v1142_v41 = vpop.f32.mrf.mxu3  ;;  %v1270_v57 = vmax.f32 %v1211_v36, 0.0  ;;  %v995_v58 = vadd.f32 %v994_v52, %v922_v35  ;;  %v1074_v59 = vpop.f32.mrf.mxu2  ;;  %v252_v52 = vld [vmem:[%s2068_s5 + $0x1f0] sm:$0xf] }
 0x10b   : > { %v1908_v40 = vpack.c.bf16 %v1270_v57, %v1269_v53  ;;  %1033 = vmatmul.bf16.gmra.mxu1 %v1612_v22  ;;  %1799 = vmatmul.msk.bf16.gmra.mxu0 %vm862_vm0, %v1624_v20  ;;  %v1068_v55 = vadd.f32 %v2348_v29, %v995_v58  ;;  %v927_v29 = vadd.f32 %v2234_v9, %v2322_v32  ;;  %v525_v57 = vunpack.c.h.b16 %v2162_v56 }
 0x10d   : > { %1960 = vst [vmem:[%s2364_s23 + $0x8] sm:$0xff] %v1908_v40   ;;  %v1141_v63 = vadd.f32 %v1140_v7, %v1068_v55  ;;  %v528_v40 = vunpack.c.l.b16 %v252_v52 }
 0x10e   : > { %1184 = vmatmul.bf16.gmra.mxu3 %v1640_v42  ;;  %1116 = vmatmul.bf16.gmra.mxu2 %v591_v0 }
 0x10f   : > { %v1214_v26 = vadd.f32 %v1213_v11, %v1141_v63 }
 0x110   : > { %v996_v62 = vpop.f32.mrf.mxu1  ;;  %v1215_v1 = vpop.f32.mrf.mxu0 }
 0x111   : > { %v1145_v61 = vpop.f32.mrf.mxu3  ;;  %v997_v3 = vadd.f32 %v996_v62, %v924_v60  ;;  %v1077_v4 = vpop.f32.mrf.mxu2  ;;  %v590_v62 = vpack.c.b16 %v525_v57, %v525_v57 }
 0x113   : > { %v1070_v5 = vadd.f32 %v1069_v37, %v997_v3  ;;  %v1271_v37 = vmax.f32 %v1214_v26, 0.0 }
 0x115   : > { %v1143_v27 = vadd.f32 %v1142_v41, %v1070_v5 }
 0x117   : > { %v1216_v12 = vadd.f32 %v1215_v1, %v1143_v27 }
 0x118   : > { %v999_v34 = vpop.f32.mrf.mxu1  ;;  %v1218_v7 = vpop.f32.mrf.mxu0 }
 0x119   : > { %v1147_v49 = vpop.f32.mrf.mxu3  ;;  %v1272_v48 = vmax.f32 %v1216_v12, 0.0  ;;  %v1000_v35 = vadd.f32 %v999_v34, %v927_v29  ;;  %v1079_v36 = vpop.f32.mrf.mxu2 }
 0x11b   : > { %v1913_v22 = vpack.c.bf16 %v1272_v48, %v1271_v37  ;;  %1038 = vmatmul.bf16.gmra.mxu1 %v1632_v30  ;;  %1800 = vmatmul.msk.bf16.gmra.mxu0 %vm862_vm0, %v1644_v31  ;;  %v1073_v32 = vadd.f32 %v2370_v21, %v1000_v35  ;;  %v593_v21 = vpack.c.b16 %v528_v40, %v528_v40 }
 0x11d   : > { %1961 = vst [vmem:[%s2364_s23 + $0x10] sm:$0xff] %v1913_v22   ;;  %v1146_v11 = vadd.f32 %v1145_v61, %v1073_v32 }
 0x11e   : > { %1189 = vmatmul.bf16.gmra.mxu3 %v592_v17 }
 0x11f   : > { %v1219_v0 = vadd.f32 %v1218_v7, %v1146_v11 }
 0x120   : > { %v1001_v41 = vpop.f32.mrf.mxu1  ;;  %v1220_v46 = vpop.f32.mrf.mxu0 }
 0x121   : > { %v1150_v20 = vpop.f32.mrf.mxu3  ;;  %v1002_v42 = vadd.f32 %v1001_v41, %v929_v33  ;;  %v1082_v53 = vpop.f32.mrf.mxu2  ;;  %v1273_v44 = vmax.f32 %v1219_v0, 0.0 }
 0x123   : > { %v1075_v58 = vadd.f32 %v1074_v59, %v1002_v42 }
 0x125   : > { %v1148_v55 = vadd.f32 %v1147_v49, %v1075_v58 }
 0x127   : > { %v1221_v60 = vadd.f32 %v1220_v46, %v1148_v55 }
 0x128   : > { %v1004_v63 = vpop.f32.mrf.mxu1  ;;  %v1223_v9 = vpop.f32.mrf.mxu0 }
 0x129   : > { %v1152_v1 = vpop.f32.mrf.mxu3  ;;  %v1274_v3 = vmax.f32 %v1221_v60, 0.0  ;;  %v1005_v5 = vadd.f32 %v1004_v63, %v2243_v19  ;;  %v1084_v61 = vpop.f32.mrf.mxu2 }
 0x12b   : > { %v1918_v10 = vpack.c.bf16 %v1274_v3, %v1273_v44  ;;  %1043 = vmatmul.bf16.gmra.mxu1 %v590_v62  ;;  %1801 = vmatmul.msk.bf16.gmra.mxu0 %vm862_vm0, %v593_v21  ;;  %v1078_v56 = vadd.f32 %v1077_v4, %v1005_v5 }
 0x12d   : > { %1962 = vst [vmem:[%s2364_s23 + $0x18] sm:$0xff] %v1918_v10   ;;  %v1151_v18 = vadd.f32 %v1150_v20, %v1078_v56 }
 0x12f   : > { %v1224_v29 = vadd.f32 %v1223_v9, %v1151_v18 }
 0x130   : > { %v1006_v13 = vpop.f32.mrf.mxu1  ;;  %v1225_v14 = vpop.f32.mrf.mxu0 }
 0x131   : > { %v1155_v59 = vpop.f32.mrf.mxu3  ;;  %v1007_v23 = vadd.f32 %v1006_v13, %v2252_v25  ;;  %v1087_v26 = vpop.f32.mrf.mxu2  ;;  %v1275_v34 = vmax.f32 %v1224_v29, 0.0 }
 0x133   : > { %v1080_v27 = vadd.f32 %v1079_v36, %v1007_v23 }
 0x135   : > { %v1153_v12 = vadd.f32 %v1152_v1, %v1080_v27 }
 0x137   : > { %v1226_v30 = vadd.f32 %v1225_v14, %v1153_v12 }
 0x138   : > { %v1009_v31 = vpop.f32.mrf.mxu1  ;;  %v1228_v49 = vpop.f32.mrf.mxu0 }
 0x139   : > { %v1157_v19 = vpop.f32.mrf.mxu3  ;;  %v1276_v7 = vmax.f32 %v1226_v30, 0.0  ;;  %v1010_v17 = vadd.f32 %v1009_v31, %v2271_v43  ;;  %v1089_v4 = vpop.f32.mrf.mxu2 }
 0x13b   : > { %v1923_v37 = vpack.c.bf16 %v1276_v7, %v1275_v34  ;;  %v1083_v48 = vadd.f32 %v1082_v53, %v1010_v17 }
 0x13d   : > { %1963 = vst [vmem:[%s2364_s23 + $0x20] sm:$0xff] %v1923_v37   ;;  %v1156_v25 = vadd.f32 %v1155_v59, %v1083_v48 }
 0x13f   : > { %v1229_v41 = vadd.f32 %v1228_v49, %v1156_v25 }
 0x140   : > { %v1011_v22 = vpop.f32.mrf.mxu1  ;;  %v1230_v32 = vpop.f32.mrf.mxu0 }
 0x141   : > { %v1160_v35 = vpop.f32.mrf.mxu3  ;;  %v1012_v36 = vadd.f32 %v1011_v22, %v2283_v51  ;;  %v1092_v33 = vpop.f32.mrf.mxu2  ;;  %v1277_v43 = vmax.f32 %v1229_v41, 0.0 }
 0x143   : > { %v1085_v20 = vadd.f32 %v1084_v61, %v1012_v36 }
 0x145   : > { %v1158_v46 = vadd.f32 %v1157_v19, %v1085_v20 }
 0x147   : > { %v1231_v52 = vadd.f32 %v1230_v32, %v1158_v46 }
 0x148   : > { %v1014_v42 = vpop.f32.mrf.mxu1  ;;  %v1233_v57 = vpop.f32.mrf.mxu0 }
 0x149   : > { %v1162_v11 = vpop.f32.mrf.mxu3  ;;  %v1278_v58 = vmax.f32 %v1231_v52, 0.0  ;;  %v1015_v40 = vadd.f32 %v1014_v42, %v2302_v6  ;;  %v1094_v53 = vpop.f32.mrf.mxu2 }
 0x14b   : > { %v1928_v0 = vpack.c.bf16 %v1278_v58, %v1277_v43  ;;  %v1088_v55 = vadd.f32 %v1087_v26, %v1015_v40 }
 0x14d   : > { %1964 = vst [vmem:[%s2364_s23 + $0x28] sm:$0xff] %v1928_v0   ;;  %v1161_v51 = vadd.f32 %v1160_v35, %v1088_v55 }
 0x14f   : > { %v1234_v44 = vadd.f32 %v1233_v57, %v1161_v51 }
 0x150   : > { %v1016_v62 = vpop.f32.mrf.mxu1  ;;  %v1235_v21 = vpop.f32.mrf.mxu0 }
 0x151   : > { %v1165_v60 = vpop.f32.mrf.mxu3  ;;  %v1017_v1 = vadd.f32 %v1016_v62, %v2314_v16  ;;  %v1097_v63 = vpop.f32.mrf.mxu2  ;;  %v1279_v6 = vmax.f32 %v1234_v44, 0.0 }
 0x153   : > { %v1090_v9 = vadd.f32 %v1089_v4, %v1017_v1 }
 0x155   : > { %v1163_v3 = vadd.f32 %v1162_v11, %v1090_v9 }
 0x157   : > { %v1236_v5 = vadd.f32 %v1235_v21, %v1163_v3 }
 0x158   : > { %v1019_v10 = vpop.f32.mrf.mxu1  ;;  %v1238_v56 = vpop.f32.mrf.mxu0 }
 0x159   : > { %v1167_v61 = vpop.f32.mrf.mxu3  ;;  %v1280_v59 = vmax.f32 %v1236_v5, 0.0  ;;  %v1020_v13 = vadd.f32 %v1019_v10, %v2327_v38  ;;  %v1099_v14 = vpop.f32.mrf.mxu2 }
 0x15b   : > { %v1933_v18 = vpack.c.bf16 %v1280_v59, %v1279_v6  ;;  %v1093_v23 = vadd.f32 %v1092_v33, %v1020_v13 }
 0x15d   : > { %1965 = vst [vmem:[%s2364_s23 + $0x30] sm:$0xff] %v1933_v18   ;;  %v1166_v16 = vadd.f32 %v1165_v60, %v1093_v23 }
 0x15f   : > { %v1239_v31 = vadd.f32 %v1238_v56, %v1166_v16 }
 0x160   : > { %v1021_v27 = vpop.f32.mrf.mxu1  ;;  %v1240_v29 = vpop.f32.mrf.mxu0 }
 0x161   : > { %v1170_v26 = vpop.f32.mrf.mxu3  ;;  %v1022_v12 = vadd.f32 %v1021_v27, %v2333_v47  ;;  %v1102_v30 = vpop.f32.mrf.mxu2  ;;  %v1281_v38 = vmax.f32 %v1239_v31, 0.0 }
 0x163   : > { %v1095_v19 = vadd.f32 %v1094_v53, %v1022_v12 }
 0x165   : > { %v1168_v49 = vadd.f32 %v1167_v61, %v1095_v19 }
 0x167   : > { %v1241_v34 = vadd.f32 %v1240_v29, %v1168_v49 }
 0x168   : > { %v1024_v17 = vpop.f32.mrf.mxu1  ;;  %v1243_v4 = vpop.f32.mrf.mxu0 }
 0x169   : > { %v1172_v7 = vpop.f32.mrf.mxu3  ;;  %v1282_v37 = vmax.f32 %v1241_v34, 0.0  ;;  %v1025_v48 = vadd.f32 %v1024_v17, %v2256_v28  ;;  %v1104_v35 = vpop.f32.mrf.mxu2 }
 0x16b   : > { %v1938_v22 = vpack.c.bf16 %v1282_v37, %v1281_v38  ;;  %v1098_v32 = vadd.f32 %v1097_v63, %v1025_v48 }
 0x16d   : > { %1966 = vst [vmem:[%s2364_s23 + $0x38] sm:$0xff] %v1938_v22   ;;  %v1171_v47 = vadd.f32 %v1170_v26, %v1098_v32 }
 0x16f   : > { %v1244_v52 = vadd.f32 %v1243_v4, %v1171_v47 }
 0x170   : > { %v1026_v36 = vpop.f32.mrf.mxu1  ;;  %v1245_v33 = vpop.f32.mrf.mxu0 }
 0x171   : > { %v1175_v25 = vpop.f32.mrf.mxu3  ;;  %v1027_v20 = vadd.f32 %v1026_v36, %v2275_v45  ;;  %v1107_v41 = vpop.f32.mrf.mxu2  ;;  %v1283_v28 = vmax.f32 %v1244_v52, 0.0 }
 0x173   : > { %v1100_v46 = vadd.f32 %v1099_v14, %v1027_v20 }
 0x175   : > { %v1173_v11 = vadd.f32 %v1172_v7, %v1100_v46 }
 0x177   : > { %v1246_v42 = vadd.f32 %v1245_v33, %v1173_v11 }
 0x178   : > { %v1029_v43 = vpop.f32.mrf.mxu1  ;;  %v1248_v58 = vpop.f32.mrf.mxu0 }
 0x179   : > { %v1177_v57 = vpop.f32.mrf.mxu3  ;;  %v1284_v40 = vmax.f32 %v1246_v42, 0.0  ;;  %v1030_v53 = vadd.f32 %v1029_v43, %v2287_v54  ;;  %v1109_v0 = vpop.f32.mrf.mxu2 }
 0x17b   : > { %v1943_v55 = vpack.c.bf16 %v1284_v40, %v1283_v28  ;;  %v1103_v60 = vadd.f32 %v1102_v30, %v1030_v53 }
 0x17d   : > { %1967 = vst [vmem:[%s2364_s23 + $0x40] sm:$0xff] %v1943_v55   ;;  %v1176_v45 = vadd.f32 %v1175_v25, %v1103_v60 }
 0x17f   : > { %v1249_v44 = vadd.f32 %v1248_v58, %v1176_v45 }
 0x180   : > { %v1031_v21 = vpop.f32.mrf.mxu1  ;;  %v1250_v51 = vpop.f32.mrf.mxu0 }
 0x181   : > { %v1180_v62 = vpop.f32.mrf.mxu3  ;;  %v1032_v1 = vadd.f32 %v1031_v21, %v2306_v8  ;;  %v1112_v63 = vpop.f32.mrf.mxu2  ;;  %v1285_v54 = vmax.f32 %v1249_v44, 0.0 }
 0x183   : > { %v1105_v9 = vadd.f32 %v1104_v35, %v1032_v1 }
 0x185   : > { %v1178_v3 = vadd.f32 %v1177_v57, %v1105_v9 }
 0x187   : > { %v1251_v5 = vadd.f32 %v1250_v51, %v1178_v3 }
 0x188   : > { %v1034_v10 = vpop.f32.mrf.mxu1  ;;  %v1253_v56 = vpop.f32.mrf.mxu0 }
 0x189   : > { %v1182_v61 = vpop.f32.mrf.mxu3  ;;  %v1286_v6 = vmax.f32 %v1251_v5, 0.0  ;;  %v1035_v59 = vadd.f32 %v1034_v10, %v2249_v24  ;;  %v1114_v13 = vpop.f32.mrf.mxu2 }
 0x18b   : > { %v1948_v14 = vpack.c.bf16 %v1286_v6, %v1285_v54  ;;  %v1108_v18 = vadd.f32 %v1107_v41, %v1035_v59 }
 0x18d   : > { %1968 = vst [vmem:[%s2364_s23 + $0x48] sm:$0xff] %v1948_v14   ;;  %v1181_v8 = vadd.f32 %v1180_v62, %v1108_v18 }
 0x18f   : > { %v1254_v30 = vadd.f32 %v1253_v56, %v1181_v8 }
 0x190   : > { %v1036_v26 = vpop.f32.mrf.mxu1  ;;  %v1255_v27 = vpop.f32.mrf.mxu0 }
 0x191   : > { %v1185_v23 = vpop.f32.mrf.mxu3  ;;  %v1037_v29 = vadd.f32 %v1036_v26, %v2266_v39  ;;  %v1117_v16 = vpop.f32.mrf.mxu2  ;;  %v1287_v24 = vmax.f32 %v1254_v30, 0.0 }
 0x193   : > { %v1110_v12 = vadd.f32 %v1109_v0, %v1037_v29 }
 0x195   : > { %v1183_v19 = vadd.f32 %v1182_v61, %v1110_v12 }
 0x197   : > { %v1256_v31 = vadd.f32 %v1255_v27, %v1183_v19 }
 0x198   : > { %v1039_v34 = vpop.f32.mrf.mxu1  ;;  %v1258_v7 = vpop.f32.mrf.mxu0 }
 0x199   : > { %v1187_v49 = vpop.f32.mrf.mxu3  ;;  %v1288_v17 = vmax.f32 %v1256_v31, 0.0  ;;  %v1040_v4 = vadd.f32 %v1039_v34, %v2280_v50  ;;  %v1119_v38 = vpop.f32.mrf.mxu2 }
 0x19b   : > { %v1953_v37 = vpack.c.bf16 %v1288_v17, %v1287_v24  ;;  %v1113_v48 = vadd.f32 %v1112_v63, %v1040_v4 }
 0x19d   : > { %1969 = vst [vmem:[%s2364_s23 + $0x50] sm:$0xff] %v1953_v37   ;;  %v1186_v32 = vadd.f32 %v1185_v23, %v1113_v48 }
 0x19f   : > { %v1259_v33 = vadd.f32 %v1258_v7, %v1186_v32 }
 0x1a0   : > { %v1041_v22 = vpop.f32.mrf.mxu1  ;;  %v1260_v39 = vpop.f32.mrf.mxu0 }
 0x1a1   : > { %v1190_v35 = vpop.f32.mrf.mxu3  ;;  %v1042_v25 = vadd.f32 %v1041_v22, %v2297_v2  ;;  %v1289_v50 = vmax.f32 %v1259_v33, 0.0 }
 0x1a3   : > { %v1115_v36 = vadd.f32 %v1114_v13, %v1042_v25 }
 0x1a5   : > { %v1188_v47 = vadd.f32 %v1187_v49, %v1115_v36 }
 0x1a7   : > { %v1261_v20 = vadd.f32 %v1260_v39, %v1188_v47 }
 0x1a8   : > { %v1044_v46 = vpop.f32.mrf.mxu1  ;;  %v1263_v52 = vpop.f32.mrf.mxu0 }
 0x1a9   : > { %v1192_v41 = vpop.f32.mrf.mxu3  ;;  %v1290_v11 = vmax.f32 %v1261_v20, 0.0  ;;  %v1045_v42 = vadd.f32 %v1044_v46, %v2311_v15 }
 0x1ab   : > { %v1958_v57 = vpack.c.bf16 %v1290_v11, %v1289_v50  ;;  %v1118_v43 = vadd.f32 %v1117_v16, %v1045_v42 }
 0x1ad   : > { %1970 = vst [vmem:[%s2364_s23 + $0x58] sm:$0xff] %v1958_v57   ;;  %v1191_v58 = vadd.f32 %v1190_v35, %v1118_v43 }
 0x1af   : > { %v1264_v28 = vadd.f32 %v1263_v52, %v1191_v58 }
 0x1b0   : > { %v1046_v40 = vpop.f32.mrf.mxu1  ;;  %v1265_v53 = vpop.f32.mrf.mxu0 }
 0x1b1   : > { %v1291_v2 = vmax.f32 %v1264_v28, 0.0 }
 0x1b3   : > { %v1316_v0 = vpack.c.bf16 %v1291_v2, %v1291_v2 }
 0x1b5   : > { %1341 = vst [vmem:[%s2364_s23 + $0x60] sm:$0xf] %v1316_v0 }
 0x1b6 PF: > { %s13_s12 = sadd.s32 1, %s2011_s12  }
 0x1b7   : > { %p10_p4 = scmp.ge.s32.totalorder %s13_s12, 4  }
 0x1b9   :  { %12 = sbr.rel (!%p10_p4) target bundleno = 1 (0x1), region = 62 }

// kernel: model_forward.7
= control target key start
LH: loop header
LB: loop body
LE: loop exit
PB: predicated region body
PF: predicated region fallthrough
CT: control target
= control target key end

     0   :  { %s7416_s1 = inlined_call_operand.vmem [shape: bf16[6272,128], index: 1, kind: input, shape index: {}]   ;;  %s7417_s0 = inlined_call_operand.vmem [shape: bf16[8,6272], index: 0, kind: input, shape index: {}]   ;;  %s7418_s2 = inlined_call_operand.vmem [shape: f32[1,128], index: 2, kind: input, shape index: {}]   ;;  %s7419_s4 = inlined_call_operand.vmem [shape: f32[1,128], index: 4, kind: input, shape index: {}]   ;;  %s7420_s3 = inlined_call_operand.vmem [shape: bf16[128,128], index: 3, kind: input, shape index: {}]   ;;  %s7421_s5 = inlined_call_operand.vmem [shape: f32[8,128], index: 5, kind: output, shape index: {}]  }
   0x1   :  { %v5689_v0 = vld [vmem:[%s7416_s1 + $0x38] sm:$0xff]  ;;  %v5688_v4 = vld [vmem:[%s7416_s1 + $0x30] sm:$0xff]  ;;  %v5687_v8 = vld [vmem:[%s7416_s1 + $0x28] sm:$0xff] }
   0x2   :  { %v5705_v1 = vld [vmem:[%s7416_s1 + $0xb8] sm:$0xff]  ;;  %3357 = vmatpush.bf16.msra.mxu0 %v5689_v0  ;;  %v5704_v5 = vld [vmem:[%s7416_s1 + $0xb0] sm:$0xff]  ;;  %v5703_v9 = vld [vmem:[%s7416_s1 + $0xa8] sm:$0xff] }
   0x3   :  { %v5697_v2 = vld [vmem:[%s7416_s1 + $0x78] sm:$0xff]  ;;  %3383 = vmatpush.bf16.msra.mxu2 %v5705_v1  ;;  %v5696_v6 = vld [vmem:[%s7416_s1 + $0x70] sm:$0xff]  ;;  %v5695_v10 = vld [vmem:[%s7416_s1 + $0x68] sm:$0xff] }
   0x4   :  { %v5713_v3 = vld [vmem:[%s7416_s1 + $0xf8] sm:$0xff]  ;;  %3370 = vmatpush.bf16.msra.mxu1 %v5697_v2  ;;  %v5712_v7 = vld [vmem:[%s7416_s1 + $0xf0] sm:$0xff]  ;;  %v5711_v11 = vld [vmem:[%s7416_s1 + $0xe8] sm:$0xff] }
   0x5   :  { %3396 = vmatpush.bf16.msra.mxu3 %v5713_v3  ;;  %v5686_v12 = vld [vmem:[%s7416_s1 + $0x20] sm:$0xff]  ;;  %v5685_v16 = vld [vmem:[%s7416_s1 + $0x18] sm:$0xff]  ;;  %v5684_v20 = vld [vmem:[%s7416_s1 + $0x10] sm:$0xff] }
   0x6   :  { %3358 = vmatpush.bf16.msra.mxu0 %v5688_v4  ;;  %v5702_v13 = vld [vmem:[%s7416_s1 + $0xa0] sm:$0xff]  ;;  %v5701_v17 = vld [vmem:[%s7416_s1 + $0x98] sm:$0xff]  ;;  %v5700_v21 = vld [vmem:[%s7416_s1 + $0x90] sm:$0xff] }
   0x7   :  { %3384 = vmatpush.bf16.msra.mxu2 %v5704_v5  ;;  %v5694_v14 = vld [vmem:[%s7416_s1 + $0x60] sm:$0xff]  ;;  %v5693_v18 = vld [vmem:[%s7416_s1 + $0x58] sm:$0xff]  ;;  %v5692_v22 = vld [vmem:[%s7416_s1 + $0x50] sm:$0xff] }
   0x8   :  { %3371 = vmatpush.bf16.msra.mxu1 %v5696_v6  ;;  %v5710_v15 = vld [vmem:[%s7416_s1 + $0xe0] sm:$0xff]  ;;  %v5709_v19 = vld [vmem:[%s7416_s1 + $0xd8] sm:$0xff]  ;;  %v5708_v23 = vld [vmem:[%s7416_s1 + $0xd0] sm:$0xff] }
   0x9   :  { %3397 = vmatpush.bf16.msra.mxu3 %v5712_v7  ;;  %v5683_v24 = vld [vmem:[%s7416_s1 + $0x8] sm:$0xff]  ;;  %v20_v29 = vld [vmem:[%s7417_s0] sm:$0xff]  ;;  %v5721_v34 = vld [vmem:[%s7416_s1 + $0x138] sm:$0xff] }
   0xa   :  { %3359 = vmatpush.bf16.msra.mxu0 %v5687_v8  ;;  %v5699_v25 = vld [vmem:[%s7416_s1 + $0x88] sm:$0xff]  ;;  %v5682_v30 = vld [vmem:[%s7416_s1] sm:$0xff]  ;;  %v858_v33 = vunpack.c.l.b16 %v20_v29  ;;  %v5737_v35 = vld [vmem:[%s7416_s1 + $0x1b8] sm:$0xff]  ;;  %v859_v39 = vunpack.c.h.b16 %v20_v29 }
   0xb   :  { %3385 = vmatpush.bf16.msra.mxu2 %v5703_v9  ;;  %v5691_v26 = vld [vmem:[%s7416_s1 + $0x48] sm:$0xff]  ;;  %v5698_v31 = vld [vmem:[%s7416_s1 + $0x80] sm:$0xff]  ;;  %v5729_v40 = vld [vmem:[%s7416_s1 + $0x178] sm:$0xff] }
   0xc   :  { %3372 = vmatpush.bf16.msra.mxu1 %v5695_v10  ;;  %v5707_v27 = vld [vmem:[%s7416_s1 + $0xc8] sm:$0xff]  ;;  %v5690_v36 = vld [vmem:[%s7416_s1 + $0x40] sm:$0xff]  ;;  %v5745_v41 = vld [vmem:[%s7416_s1 + $0x1f8] sm:$0xff]  ;;  %v907_v43 = vpack.c.b16 %v858_v33, %v858_v33  ;;  %v908_v47 = vpack.c.b16 %v859_v39, %v859_v39 }
   0xd   :  { %3398 = vmatpush.bf16.msra.mxu3 %v5711_v11  ;;  %v21_v28 = vld [vmem:[%s7417_s0 + $0x8] sm:$0xff]  ;;  %v5706_v37 = vld [vmem:[%s7416_s1 + $0xc0] sm:$0xff]  ;;  %v5720_v44 = vld [vmem:[%s7416_s1 + $0x130] sm:$0xff] }
   0xe   :  { %3360 = vmatpush.bf16.msra.mxu0 %v5686_v12  ;;  %v860_v32 = vunpack.c.l.b16 %v21_v28  ;;  %v861_v38 = vunpack.c.h.b16 %v21_v28  ;;  %v5736_v45 = vld [vmem:[%s7416_s1 + $0x1b0] sm:$0xff]  ;;  %v5719_v50 = vld [vmem:[%s7416_s1 + $0x128] sm:$0xff]  ;;  %v5718_v54 = vld [vmem:[%s7416_s1 + $0x120] sm:$0xff] }
   0xf   :  { %3386 = vmatpush.bf16.msra.mxu2 %v5702_v13  ;;  %v5728_v48 = vld [vmem:[%s7416_s1 + $0x170] sm:$0xff]  ;;  %v5735_v51 = vld [vmem:[%s7416_s1 + $0x1a8] sm:$0xff]  ;;  %v5734_v55 = vld [vmem:[%s7416_s1 + $0x1a0] sm:$0xff] }
  0x10   :  { %3373 = vmatpush.bf16.msra.mxu1 %v5694_v14  ;;  %v909_v42 = vpack.c.b16 %v860_v32, %v860_v32  ;;  %v910_v46 = vpack.c.b16 %v861_v38, %v861_v38  ;;  %v5744_v49 = vld [vmem:[%s7416_s1 + $0x1f0] sm:$0xff]  ;;  %v5727_v52 = vld [vmem:[%s7416_s1 + $0x168] sm:$0xff]  ;;  %v5726_v56 = vld [vmem:[%s7416_s1 + $0x160] sm:$0xff] }
  0x11   :  { %3399 = vmatpush.bf16.msra.mxu3 %v5710_v15  ;;  %v5743_v53 = vld [vmem:[%s7416_s1 + $0x1e8] sm:$0xff]  ;;  %v5742_v57 = vld [vmem:[%s7416_s1 + $0x1e0] sm:$0xff]  ;;  %v5717_v58 = vld [vmem:[%s7416_s1 + $0x118] sm:$0xff] }
  0x12   :  { %3361 = vmatpush.bf16.msra.mxu0 %v5685_v16  ;;  %v5733_v59 = vld [vmem:[%s7416_s1 + $0x198] sm:$0xff]  ;;  %v5716_v62 = vld [vmem:[%s7416_s1 + $0x110] sm:$0xff]  ;;  %v5715_v2 = vld [vmem:[%s7416_s1 + $0x108] sm:$0xff] }
  0x13   :  { %3387 = vmatpush.bf16.msra.mxu2 %v5701_v17  ;;  %v5725_v60 = vld [vmem:[%s7416_s1 + $0x158] sm:$0xff]  ;;  %v5732_v63 = vld [vmem:[%s7416_s1 + $0x190] sm:$0xff]  ;;  %v5731_v3 = vld [vmem:[%s7416_s1 + $0x188] sm:$0xff] }
  0x14   :  { %3374 = vmatpush.bf16.msra.mxu1 %v5693_v18  ;;  %v5741_v61 = vld [vmem:[%s7416_s1 + $0x1d8] sm:$0xff]  ;;  %v5724_v0 = vld [vmem:[%s7416_s1 + $0x150] sm:$0xff]  ;;  %v5723_v6 = vld [vmem:[%s7416_s1 + $0x148] sm:$0xff] }
  0x15   :  { %3400 = vmatpush.bf16.msra.mxu3 %v5709_v19  ;;  %v5740_v1 = vld [vmem:[%s7416_s1 + $0x1d0] sm:$0xff]  ;;  %v23_v4 = vld [vmem:[%s7417_s0 + $0x18] sm:$0xff]  ;;  %v5739_v7 = vld [vmem:[%s7416_s1 + $0x1c8] sm:$0xff] }
  0x16   :  { %3362 = vmatpush.bf16.msra.mxu0 %v5684_v20  ;;  %v22_v5 = vld [vmem:[%s7417_s0 + $0x10] sm:$0xff]  ;;  %v5714_v8 = vld [vmem:[%s7416_s1 + $0x100] sm:$0xff]  ;;  %v864_v10 = vunpack.c.l.b16 %v23_v4  ;;  %v5753_v12 = vld [vmem:[%s7416_s1 + $0x238] sm:$0xff]  ;;  %v865_v16 = vunpack.c.h.b16 %v23_v4 }
  0x17   :  { %3388 = vmatpush.bf16.msra.mxu2 %v5700_v21  ;;  %v5730_v9 = vld [vmem:[%s7416_s1 + $0x180] sm:$0xff]  ;;  %v862_v11 = vunpack.c.l.b16 %v22_v5  ;;  %v5769_v13 = vld [vmem:[%s7416_s1 + $0x2b8] sm:$0xff]  ;;  %v863_v17 = vunpack.c.h.b16 %v22_v5  ;;  %v5751_v28 = vld [vmem:[%s7416_s1 + $0x228] sm:$0xff] }
  0x18   :  { %3375 = vmatpush.bf16.msra.mxu1 %v5692_v22  ;;  %v5722_v14 = vld [vmem:[%s7416_s1 + $0x140] sm:$0xff]  ;;  %v5761_v18 = vld [vmem:[%s7416_s1 + $0x278] sm:$0xff]  ;;  %v913_v20 = vpack.c.b16 %v864_v10, %v864_v10  ;;  %v5752_v22 = vld [vmem:[%s7416_s1 + $0x230] sm:$0xff] }
  0x19   :  { %3401 = vmatpush.bf16.msra.mxu3 %v5708_v23  ;;  %v5738_v15 = vld [vmem:[%s7416_s1 + $0x1c0] sm:$0xff]  ;;  %v5777_v19 = vld [vmem:[%s7416_s1 + $0x2f8] sm:$0xff]  ;;  %v911_v21 = vpack.c.b16 %v862_v11, %v862_v11  ;;  %v5768_v23 = vld [vmem:[%s7416_s1 + $0x2b0] sm:$0xff] }
  0x1a   :  { %3363 = vmatpush.bf16.msra.mxu0 %v5683_v24  ;;  %v914_v24 = vpack.c.b16 %v865_v16, %v865_v16  ;;  %v5767_v29 = vld [vmem:[%s7416_s1 + $0x2a8] sm:$0xff]  ;;  %v5750_v32 = vld [vmem:[%s7416_s1 + $0x220] sm:$0xff]  ;;  %v5757_v38 = vld [vmem:[%s7416_s1 + $0x258] sm:$0xff] }
  0x1b   :  { %3389 = vmatpush.bf16.msra.mxu2 %v5699_v25  ;;  %v912_v25 = vpack.c.b16 %v863_v17, %v863_v17  ;;  %v5766_v33 = vld [vmem:[%s7416_s1 + $0x2a0] sm:$0xff]  ;;  %v5773_v39 = vld [vmem:[%s7416_s1 + $0x2d8] sm:$0xff]  ;;  %v5792_v4 = vld [vmem:[%s7416_s1 + $0x370] sm:$0xff] }
  0x1c   :  { %3376 = vmatpush.bf16.msra.mxu1 %v5691_v26  ;;  %v5760_v26 = vld [vmem:[%s7416_s1 + $0x270] sm:$0xff]  ;;  %v5782_v10 = vld [vmem:[%s7416_s1 + $0x320] sm:$0xff]  ;;  %v5789_v16 = vld [vmem:[%s7416_s1 + $0x358] sm:$0xff] }
  0x1d   :  { %3402 = vmatpush.bf16.msra.mxu3 %v5707_v27  ;;  %v5776_v27 = vld [vmem:[%s7416_s1 + $0x2f0] sm:$0xff]  ;;  %v5798_v11 = vld [vmem:[%s7416_s1 + $0x3a0] sm:$0xff]  ;;  %v5805_v17 = vld [vmem:[%s7416_s1 + $0x3d8] sm:$0xff] }
  0x1e   :  { %3364 = vmatpush.bf16.msra.mxu0 %v5682_v30  ;;  %v5759_v30 = vld [vmem:[%s7416_s1 + $0x268] sm:$0xff]  ;;  %v5808_v5 = vld [vmem:[%s7416_s1 + $0x3f0] sm:$0xff] }
  0x1f   :  { %3390 = vmatpush.bf16.msra.mxu2 %v5698_v31  ;;  %v5775_v31 = vld [vmem:[%s7416_s1 + $0x2e8] sm:$0xff] }
  0x20   :  { %3377 = vmatpush.bf16.msra.mxu1 %v5690_v36  ;;  %v5749_v36 = vld [vmem:[%s7416_s1 + $0x218] sm:$0xff] }
  0x21   :  { %3403 = vmatpush.bf16.msra.mxu3 %v5706_v37  ;;  %3365 = vmatmul.bf16.vlgmr.msra.gmra.mxu0 %v907_v43  ;;  %v5765_v37 = vld [vmem:[%s7416_s1 + $0x298] sm:$0xff]  ;;  %v5772_v43 = vld [vmem:[%s7416_s1 + $0x2d0] sm:$0xff] }
  0x22   :  { %3409 = vmatpush.bf16.msrb.mxu0 %v5721_v34  ;;  %3391 = vmatmul.bf16.vlgmr.msra.gmra.mxu2 %v909_v42  ;;  %v5758_v34 = vld [vmem:[%s7416_s1 + $0x260] sm:$0xff]  ;;  %v5756_v42 = vld [vmem:[%s7416_s1 + $0x250] sm:$0xff] }
  0x23   :  { %3435 = vmatpush.bf16.msrb.mxu2 %v5737_v35  ;;  %3378 = vmatmul.bf16.vlgmr.msra.gmra.mxu1 %v908_v47  ;;  %v5774_v35 = vld [vmem:[%s7416_s1 + $0x2e0] sm:$0xff]  ;;  %v25_v47 = vld [vmem:[%s7417_s0 + $0x28] sm:$0xff] }
  0x24   :  { %3422 = vmatpush.bf16.msrb.mxu1 %v5729_v40  ;;  %3404 = vmatmul.bf16.vlgmr.msra.gmra.mxu3 %v910_v46  ;;  %v5748_v40 = vld [vmem:[%s7416_s1 + $0x210] sm:$0xff]  ;;  %v24_v46 = vld [vmem:[%s7417_s0 + $0x20] sm:$0xff] }
  0x25   :  { %3448 = vmatpush.bf16.msrb.mxu3 %v5745_v41  ;;  %v5764_v41 = vld [vmem:[%s7416_s1 + $0x290] sm:$0xff] }
  0x26   :  { %3410 = vmatpush.bf16.msrb.mxu0 %v5720_v44  ;;  %v5747_v44 = vld [vmem:[%s7416_s1 + $0x208] sm:$0xff] }
  0x27   :  { %3436 = vmatpush.bf16.msrb.mxu2 %v5736_v45  ;;  %v5763_v45 = vld [vmem:[%s7416_s1 + $0x288] sm:$0xff] }
  0x28   :  { %3423 = vmatpush.bf16.msrb.mxu1 %v5728_v48  ;;  %v5755_v48 = vld [vmem:[%s7416_s1 + $0x248] sm:$0xff] }
  0x29   :  { %3449 = vmatpush.bf16.msrb.mxu3 %v5744_v49  ;;  %v5771_v49 = vld [vmem:[%s7416_s1 + $0x2c8] sm:$0xff] }
  0x2a   :  { %3411 = vmatpush.bf16.msrb.mxu0 %v5719_v50  ;;  %v866_v50 = vunpack.c.l.b16 %v24_v46 }
  0x2b   :  { %3437 = vmatpush.bf16.msrb.mxu2 %v5735_v51  ;;  %v868_v51 = vunpack.c.l.b16 %v25_v47 }
  0x2c   :  { %3424 = vmatpush.bf16.msrb.mxu1 %v5727_v52  ;;  %v5746_v52 = vld [vmem:[%s7416_s1 + $0x200] sm:$0xff] }
  0x2d   :  { %3450 = vmatpush.bf16.msrb.mxu3 %v5743_v53  ;;  %v5762_v53 = vld [vmem:[%s7416_s1 + $0x280] sm:$0xff] }
  0x2e   :  { %3412 = vmatpush.bf16.msrb.mxu0 %v5718_v54  ;;  %v5785_v54 = vld [vmem:[%s7416_s1 + $0x338] sm:$0xff] }
  0x2f   :  { %3438 = vmatpush.bf16.msrb.mxu2 %v5734_v55  ;;  %v5801_v55 = vld [vmem:[%s7416_s1 + $0x3b8] sm:$0xff] }
  0x30   :  { %3425 = vmatpush.bf16.msrb.mxu1 %v5726_v56  ;;  %v867_v56 = vunpack.c.h.b16 %v24_v46  ;;  %v5824_v46 = vld [vmem:[%s7416_s1 + $0x470] sm:$0xff] }
  0x31   :  { %3451 = vmatpush.bf16.msrb.mxu3 %v5742_v57  ;;  %v869_v57 = vunpack.c.h.b16 %v25_v47  ;;  %v5840_v47 = vld [vmem:[%s7416_s1 + $0x4f0] sm:$0xff] }
  0x32   :  { %3413 = vmatpush.bf16.msrb.mxu0 %v5717_v58  ;;  %v5754_v58 = vld [vmem:[%s7416_s1 + $0x240] sm:$0xff] }
  0x33   :  { %3439 = vmatpush.bf16.msrb.mxu2 %v5733_v59  ;;  %v5770_v59 = vld [vmem:[%s7416_s1 + $0x2c0] sm:$0xff] }
  0x34   :  { %3426 = vmatpush.bf16.msrb.mxu1 %v5725_v60  ;;  %v915_v60 = vpack.c.b16 %v866_v50, %v866_v50  ;;  %v5823_v50 = vld [vmem:[%s7416_s1 + $0x468] sm:$0xff] }
  0x35   :  { %3452 = vmatpush.bf16.msrb.mxu3 %v5741_v61  ;;  %v917_v61 = vpack.c.b16 %v868_v51, %v868_v51  ;;  %v5839_v51 = vld [vmem:[%s7416_s1 + $0x4e8] sm:$0xff] }
  0x36   :  { %3414 = vmatpush.bf16.msrb.mxu0 %v5716_v62  ;;  %v5793_v62 = vld [vmem:[%s7416_s1 + $0x378] sm:$0xff] }
  0x37   :  { %3440 = vmatpush.bf16.msrb.mxu2 %v5732_v63  ;;  %v5809_v63 = vld [vmem:[%s7416_s1 + $0x3f8] sm:$0xff] }
  0x38   :  { %3427 = vmatpush.bf16.msrb.mxu1 %v5724_v0  ;;  %v916_v0 = vpack.c.b16 %v867_v56, %v867_v56  ;;  %v5813_v56 = vld [vmem:[%s7416_s1 + $0x418] sm:$0xff] }
  0x39   :  { %3453 = vmatpush.bf16.msrb.mxu3 %v5740_v1  ;;  %v918_v1 = vpack.c.b16 %v869_v57, %v869_v57  ;;  %v5829_v57 = vld [vmem:[%s7416_s1 + $0x498] sm:$0xff] }
  0x3a   :  { %3415 = vmatpush.bf16.msrb.mxu0 %v5715_v2  ;;  %v5784_v2 = vld [vmem:[%s7416_s1 + $0x330] sm:$0xff] }
  0x3b   :  { %3441 = vmatpush.bf16.msrb.mxu2 %v5731_v3  ;;  %v5800_v3 = vld [vmem:[%s7416_s1 + $0x3b0] sm:$0xff] }
  0x3c   :  { %3428 = vmatpush.bf16.msrb.mxu1 %v5723_v6  ;;  %v5783_v6 = vld [vmem:[%s7416_s1 + $0x328] sm:$0xff] }
  0x3d   :  { %3454 = vmatpush.bf16.msrb.mxu3 %v5739_v7  ;;  %v5799_v7 = vld [vmem:[%s7416_s1 + $0x3a8] sm:$0xff] }
  0x3e   :  { %3416 = vmatpush.bf16.msrb.mxu0 %v5714_v8  ;;  %v5791_v8 = vld [vmem:[%s7416_s1 + $0x368] sm:$0xff] }
  0x3f   :  { %3442 = vmatpush.bf16.msrb.mxu2 %v5730_v9  ;;  %v5807_v9 = vld [vmem:[%s7416_s1 + $0x3e8] sm:$0xff] }
  0x40   :  { %3429 = vmatpush.bf16.msrb.mxu1 %v5722_v14  ;;  %v5781_v14 = vld [vmem:[%s7416_s1 + $0x318] sm:$0xff] }
  0x41   :  { %3455 = vmatpush.bf16.msrb.mxu3 %v5738_v15  ;;  %3417 = vmatmul.bf16.vlgmr.msrb.gmra.mxu0 %v911_v21  ;;  %v5797_v15 = vld [vmem:[%s7416_s1 + $0x398] sm:$0xff]  ;;  %v5804_v21 = vld [vmem:[%s7416_s1 + $0x3d0] sm:$0xff] }
  0x42   :  { %3461 = vmatpush.bf16.msra.mxu0 %v5753_v12  ;;  %3443 = vmatmul.bf16.vlgmr.msrb.gmra.mxu2 %v913_v20  ;;  %v5790_v12 = vld [vmem:[%s7416_s1 + $0x360] sm:$0xff]  ;;  %v5788_v20 = vld [vmem:[%s7416_s1 + $0x350] sm:$0xff] }
  0x43   :  { %3487 = vmatpush.bf16.msra.mxu2 %v5769_v13  ;;  %3430 = vmatmul.bf16.vlgmr.msrb.gmra.mxu1 %v912_v25  ;;  %v5806_v13 = vld [vmem:[%s7416_s1 + $0x3e0] sm:$0xff]  ;;  %v27_v25 = vld [vmem:[%s7417_s0 + $0x38] sm:$0xff] }
  0x44   :  { %3474 = vmatpush.bf16.msra.mxu1 %v5761_v18  ;;  %3456 = vmatmul.bf16.vlgmr.msrb.gmra.mxu3 %v914_v24  ;;  %v5780_v18 = vld [vmem:[%s7416_s1 + $0x310] sm:$0xff] }
  0x45   :  { %3500 = vmatpush.bf16.msra.mxu3 %v5777_v19  ;;  %v5796_v19 = vld [vmem:[%s7416_s1 + $0x390] sm:$0xff] }
  0x46   :  { %3462 = vmatpush.bf16.msra.mxu0 %v5752_v22  ;;  %v5779_v22 = vld [vmem:[%s7416_s1 + $0x308] sm:$0xff]  ;;  %v26_v24 = vld [vmem:[%s7417_s0 + $0x30] sm:$0xff] }
  0x47   :  { %3488 = vmatpush.bf16.msra.mxu2 %v5768_v23  ;;  %v5795_v23 = vld [vmem:[%s7416_s1 + $0x388] sm:$0xff] }
  0x48   :  { %3475 = vmatpush.bf16.msra.mxu1 %v5760_v26  ;;  %v5787_v26 = vld [vmem:[%s7416_s1 + $0x348] sm:$0xff] }
  0x49   :  { %3501 = vmatpush.bf16.msra.mxu3 %v5776_v27  ;;  %v5803_v27 = vld [vmem:[%s7416_s1 + $0x3c8] sm:$0xff] }
  0x4a   :  { %3463 = vmatpush.bf16.msra.mxu0 %v5751_v28  ;;  %v870_v28 = vunpack.c.l.b16 %v26_v24 }
  0x4b   :  { %3489 = vmatpush.bf16.msra.mxu2 %v5767_v29  ;;  %v872_v29 = vunpack.c.l.b16 %v27_v25 }
  0x4c   :  { %3476 = vmatpush.bf16.msra.mxu1 %v5759_v30  ;;  %v5778_v30 = vld [vmem:[%s7416_s1 + $0x300] sm:$0xff] }
  0x4d   :  { %3502 = vmatpush.bf16.msra.mxu3 %v5775_v31  ;;  %v5794_v31 = vld [vmem:[%s7416_s1 + $0x380] sm:$0xff] }
  0x4e   :  { %3464 = vmatpush.bf16.msra.mxu0 %v5750_v32  ;;  %v5817_v32 = vld [vmem:[%s7416_s1 + $0x438] sm:$0xff] }
  0x4f   :  { %3490 = vmatpush.bf16.msra.mxu2 %v5766_v33  ;;  %v5833_v33 = vld [vmem:[%s7416_s1 + $0x4b8] sm:$0xff] }
  0x50   :  { %3477 = vmatpush.bf16.msra.mxu1 %v5758_v34  ;;  %v871_v34 = vunpack.c.h.b16 %v26_v24  ;;  %v5856_v24 = vld [vmem:[%s7416_s1 + $0x570] sm:$0xff] }
  0x51   :  { %3503 = vmatpush.bf16.msra.mxu3 %v5774_v35  ;;  %v873_v35 = vunpack.c.h.b16 %v27_v25  ;;  %v5872_v25 = vld [vmem:[%s7416_s1 + $0x5f0] sm:$0xff] }
  0x52   :  { %3465 = vmatpush.bf16.msra.mxu0 %v5749_v36  ;;  %v5786_v36 = vld [vmem:[%s7416_s1 + $0x340] sm:$0xff] }
  0x53   :  { %3491 = vmatpush.bf16.msra.mxu2 %v5765_v37  ;;  %v5802_v37 = vld [vmem:[%s7416_s1 + $0x3c0] sm:$0xff] }
  0x54   :  { %3478 = vmatpush.bf16.msra.mxu1 %v5757_v38  ;;  %v919_v38 = vpack.c.b16 %v870_v28, %v870_v28  ;;  %v5855_v28 = vld [vmem:[%s7416_s1 + $0x568] sm:$0xff] }
  0x55   :  { %3504 = vmatpush.bf16.msra.mxu3 %v5773_v39  ;;  %v921_v39 = vpack.c.b16 %v872_v29, %v872_v29  ;;  %v5871_v29 = vld [vmem:[%s7416_s1 + $0x5e8] sm:$0xff] }
  0x56   :  { %3466 = vmatpush.bf16.msra.mxu0 %v5748_v40  ;;  %v5825_v40 = vld [vmem:[%s7416_s1 + $0x478] sm:$0xff] }
  0x57   :  { %3492 = vmatpush.bf16.msra.mxu2 %v5764_v41  ;;  %v5841_v41 = vld [vmem:[%s7416_s1 + $0x4f8] sm:$0xff] }
  0x58   :  { %3479 = vmatpush.bf16.msra.mxu1 %v5756_v42  ;;  %v920_v42 = vpack.c.b16 %v871_v34, %v871_v34  ;;  %v5854_v34 = vld [vmem:[%s7416_s1 + $0x560] sm:$0xff] }
  0x59   :  { %3505 = vmatpush.bf16.msra.mxu3 %v5772_v43  ;;  %v922_v43 = vpack.c.b16 %v873_v35, %v873_v35  ;;  %v5870_v35 = vld [vmem:[%s7416_s1 + $0x5e0] sm:$0xff] }
  0x5a   :  { %3467 = vmatpush.bf16.msra.mxu0 %v5747_v44  ;;  %v5816_v44 = vld [vmem:[%s7416_s1 + $0x430] sm:$0xff] }
  0x5b   :  { %3493 = vmatpush.bf16.msra.mxu2 %v5763_v45  ;;  %v5832_v45 = vld [vmem:[%s7416_s1 + $0x4b0] sm:$0xff] }
  0x5c   :  { %3480 = vmatpush.bf16.msra.mxu1 %v5755_v48  ;;  %v5815_v48 = vld [vmem:[%s7416_s1 + $0x428] sm:$0xff] }
  0x5d   :  { %3506 = vmatpush.bf16.msra.mxu3 %v5771_v49  ;;  %v5831_v49 = vld [vmem:[%s7416_s1 + $0x4a8] sm:$0xff] }
  0x5e   :  { %3468 = vmatpush.bf16.msra.mxu0 %v5746_v52  ;;  %v5814_v52 = vld [vmem:[%s7416_s1 + $0x420] sm:$0xff] }
  0x5f   :  { %3494 = vmatpush.bf16.msra.mxu2 %v5762_v53  ;;  %v5830_v53 = vld [vmem:[%s7416_s1 + $0x4a0] sm:$0xff] }
  0x60   :  { %3481 = vmatpush.bf16.msra.mxu1 %v5754_v58  ;;  %v5821_v58 = vld [vmem:[%s7416_s1 + $0x458] sm:$0xff] }
  0x61   :  { %3507 = vmatpush.bf16.msra.mxu3 %v5770_v59  ;;  %3469 = vmatmul.bf16.vlgmr.msra.gmra.mxu0 %v915_v60  ;;  %v5837_v59 = vld [vmem:[%s7416_s1 + $0x4d8] sm:$0xff]  ;;  %v5812_v60 = vld [vmem:[%s7416_s1 + $0x410] sm:$0xff] }
  0x62   :  { %3513 = vmatpush.bf16.msrb.mxu0 %v5785_v54  ;;  %3495 = vmatmul.bf16.vlgmr.msra.gmra.mxu2 %v917_v61  ;;  %v5822_v54 = vld [vmem:[%s7416_s1 + $0x460] sm:$0xff]  ;;  %v5828_v61 = vld [vmem:[%s7416_s1 + $0x490] sm:$0xff] }
  0x63   :  { %3539 = vmatpush.bf16.msrb.mxu2 %v5801_v55  ;;  %3482 = vmatmul.bf16.vlgmr.msra.gmra.mxu1 %v916_v0  ;;  %v5838_v55 = vld [vmem:[%s7416_s1 + $0x4e0] sm:$0xff]  ;;  %v5811_v0 = vld [vmem:[%s7416_s1 + $0x408] sm:$0xff] }
  0x64   :  { %3526 = vmatpush.bf16.msrb.mxu1 %v5793_v62  ;;  %3508 = vmatmul.bf16.vlgmr.msra.gmra.mxu3 %v918_v1  ;;  %v5820_v62 = vld [vmem:[%s7416_s1 + $0x450] sm:$0xff]  ;;  %v5827_v1 = vld [vmem:[%s7416_s1 + $0x488] sm:$0xff] }
  0x65   :  { %3552 = vmatpush.bf16.msrb.mxu3 %v5809_v63  ;;  %v5836_v63 = vld [vmem:[%s7416_s1 + $0x4d0] sm:$0xff] }
  0x66   :  { %3514 = vmatpush.bf16.msrb.mxu0 %v5784_v2  ;;  %v28_v2 = vld [vmem:[%s7417_s0 + $0x40] sm:$0xff] }
  0x67   :  { %3540 = vmatpush.bf16.msrb.mxu2 %v5800_v3  ;;  %v29_v3 = vld [vmem:[%s7417_s0 + $0x48] sm:$0xff] }
  0x68   :  { %3527 = vmatpush.bf16.msrb.mxu1 %v5792_v4  ;;  %v5819_v4 = vld [vmem:[%s7416_s1 + $0x448] sm:$0xff] }
  0x69   :  { %3553 = vmatpush.bf16.msrb.mxu3 %v5808_v5  ;;  %v5835_v5 = vld [vmem:[%s7416_s1 + $0x4c8] sm:$0xff] }
  0x6a   :  { %3515 = vmatpush.bf16.msrb.mxu0 %v5783_v6  ;;  %v874_v6 = vunpack.c.l.b16 %v28_v2 }
  0x6b   :  { %3541 = vmatpush.bf16.msrb.mxu2 %v5799_v7  ;;  %v876_v7 = vunpack.c.l.b16 %v29_v3 }
  0x6c   :  { %3528 = vmatpush.bf16.msrb.mxu1 %v5791_v8  ;;  %v5810_v8 = vld [vmem:[%s7416_s1 + $0x400] sm:$0xff] }
  0x6d   :  { %3554 = vmatpush.bf16.msrb.mxu3 %v5807_v9  ;;  %v5826_v9 = vld [vmem:[%s7416_s1 + $0x480] sm:$0xff] }
  0x6e   :  { %3516 = vmatpush.bf16.msrb.mxu0 %v5782_v10  ;;  %v5849_v10 = vld [vmem:[%s7416_s1 + $0x538] sm:$0xff] }
  0x6f   :  { %3542 = vmatpush.bf16.msrb.mxu2 %v5798_v11  ;;  %v5865_v11 = vld [vmem:[%s7416_s1 + $0x5b8] sm:$0xff] }
  0x70   :  { %3529 = vmatpush.bf16.msrb.mxu1 %v5790_v12  ;;  %v875_v12 = vunpack.c.h.b16 %v28_v2 }
  0x71   :  { %3555 = vmatpush.bf16.msrb.mxu3 %v5806_v13  ;;  %v877_v13 = vunpack.c.h.b16 %v29_v3 }
  0x72   :  { %3517 = vmatpush.bf16.msrb.mxu0 %v5781_v14  ;;  %v5818_v14 = vld [vmem:[%s7416_s1 + $0x440] sm:$0xff] }
  0x73   :  { %3543 = vmatpush.bf16.msrb.mxu2 %v5797_v15  ;;  %v5834_v15 = vld [vmem:[%s7416_s1 + $0x4c0] sm:$0xff] }
  0x74   :  { %3530 = vmatpush.bf16.msrb.mxu1 %v5789_v16  ;;  %v923_v16 = vpack.c.b16 %v874_v6, %v874_v6  ;;  %v5866_v6 = vld [vmem:[%s7416_s1 + $0x5c0] sm:$0xff] }
  0x75   :  { %3556 = vmatpush.bf16.msrb.mxu3 %v5805_v17  ;;  %v925_v17 = vpack.c.b16 %v876_v7, %v876_v7 }
  0x76   :  { %3518 = vmatpush.bf16.msrb.mxu0 %v5780_v18  ;;  %v5857_v18 = vld [vmem:[%s7416_s1 + $0x578] sm:$0xff] }
  0x77   :  { %3544 = vmatpush.bf16.msrb.mxu2 %v5796_v19  ;;  %v5873_v19 = vld [vmem:[%s7416_s1 + $0x5f8] sm:$0xff] }
  0x78   :  { %3531 = vmatpush.bf16.msrb.mxu1 %v5788_v20  ;;  %v924_v20 = vpack.c.b16 %v875_v12, %v875_v12 }
  0x79   :  { %3557 = vmatpush.bf16.msrb.mxu3 %v5804_v21  ;;  %v926_v21 = vpack.c.b16 %v877_v13, %v877_v13  ;;  %v5880_v13 = vld [vmem:[%s7416_s1 + $0x630] sm:$0xff] }
  0x7a   :  { %3519 = vmatpush.bf16.msrb.mxu0 %v5779_v22  ;;  %v5848_v22 = vld [vmem:[%s7416_s1 + $0x530] sm:$0xff] }
  0x7b   :  { %3545 = vmatpush.bf16.msrb.mxu2 %v5795_v23  ;;  %v5864_v23 = vld [vmem:[%s7416_s1 + $0x5b0] sm:$0xff] }
  0x7c   :  { %3532 = vmatpush.bf16.msrb.mxu1 %v5787_v26  ;;  %v5847_v26 = vld [vmem:[%s7416_s1 + $0x528] sm:$0xff] }
  0x7d   :  { %3558 = vmatpush.bf16.msrb.mxu3 %v5803_v27  ;;  %v5863_v27 = vld [vmem:[%s7416_s1 + $0x5a8] sm:$0xff] }
  0x7e   :  { %3520 = vmatpush.bf16.msrb.mxu0 %v5778_v30  ;;  %v6082_v30 = vld [vmem:[%s7418_s2] ss:$0 sm:$0xff] }
  0x7f   :  { %3546 = vmatpush.bf16.msrb.mxu2 %v5794_v31  ;;  %v5846_v31 = vld [vmem:[%s7416_s1 + $0x520] sm:$0xff] }
  0x80   :  { %3533 = vmatpush.bf16.msrb.mxu1 %v5786_v36 }
  0x81   :  { %3559 = vmatpush.bf16.msrb.mxu3 %v5802_v37  ;;  %3521 = vmatmul.bf16.vlgmr.msrb.gmra.mxu0 %v919_v38  ;;  %v5845_v38 = vld [vmem:[%s7416_s1 + $0x518] sm:$0xff] }
  0x82   :  { %3565 = vmatpush.bf16.msra.mxu0 %v5817_v32  ;;  %3547 = vmatmul.bf16.vlgmr.msrb.gmra.mxu2 %v921_v39  ;;  %v5862_v32 = vld [vmem:[%s7416_s1 + $0x5a0] sm:$0xff]  ;;  %v5861_v39 = vld [vmem:[%s7416_s1 + $0x598] sm:$0xff] }
  0x83   :  { %3591 = vmatpush.bf16.msra.mxu2 %v5833_v33  ;;  %3534 = vmatmul.bf16.vlgmr.msrb.gmra.mxu1 %v920_v42  ;;  %v5869_v42 = vld [vmem:[%s7416_s1 + $0x5d8] sm:$0xff] }
  0x84   :  { %3578 = vmatpush.bf16.msra.mxu1 %v5825_v40  ;;  %3560 = vmatmul.bf16.vlgmr.msrb.gmra.mxu3 %v922_v43 }
  0x85   :  { %3604 = vmatpush.bf16.msra.mxu3 %v5841_v41  ;;  %v5853_v41 = vld [vmem:[%s7416_s1 + $0x558] sm:$0xff] }
  0x86   :  { %3566 = vmatpush.bf16.msra.mxu0 %v5816_v44  ;;  %v5844_v44 = vld [vmem:[%s7416_s1 + $0x510] sm:$0xff] }
  0x87   :  { %3592 = vmatpush.bf16.msra.mxu2 %v5832_v45  ;;  %v5860_v45 = vld [vmem:[%s7416_s1 + $0x590] sm:$0xff] }
  0x88   :  { %3579 = vmatpush.bf16.msra.mxu1 %v5824_v46 }
  0x89   :  { %3605 = vmatpush.bf16.msra.mxu3 %v5840_v47 }
  0x8a   :  { %3567 = vmatpush.bf16.msra.mxu0 %v5815_v48 }
  0x8b   :  { %3593 = vmatpush.bf16.msra.mxu2 %v5831_v49  ;;  %v5852_v49 = vld [vmem:[%s7416_s1 + $0x550] sm:$0xff] }
  0x8c   :  { %3580 = vmatpush.bf16.msra.mxu1 %v5823_v50  ;;  %v5868_v50 = vld [vmem:[%s7416_s1 + $0x5d0] sm:$0xff] }
  0x8d   :  { %3606 = vmatpush.bf16.msra.mxu3 %v5839_v51 }
  0x8e   :  { %3568 = vmatpush.bf16.msra.mxu0 %v5814_v52  ;;  %v5843_v52 = vld [vmem:[%s7416_s1 + $0x508] sm:$0xff] }
  0x8f   :  { %3594 = vmatpush.bf16.msra.mxu2 %v5830_v53 }
  0x90   :  { %3581 = vmatpush.bf16.msra.mxu1 %v5822_v54  ;;  %v5859_v54 = vld [vmem:[%s7416_s1 + $0x588] sm:$0xff] }
  0x91   :  { %3607 = vmatpush.bf16.msra.mxu3 %v5838_v55  ;;  %v30_v55 = vld [vmem:[%s7417_s0 + $0x50] sm:$0xff] }
  0x92   :  { %3569 = vmatpush.bf16.msra.mxu0 %v5813_v56  ;;  %v31_v56 = vld [vmem:[%s7417_s0 + $0x58] sm:$0xff]  ;;  %v879_v2 = vunpack.c.h.b16 %v30_v55 }
  0x93   :  { %3595 = vmatpush.bf16.msra.mxu2 %v5829_v57  ;;  %v5851_v57 = vld [vmem:[%s7416_s1 + $0x548] sm:$0xff]  ;;  %v881_v3 = vunpack.c.h.b16 %v31_v56 }
  0x94   :  { %3582 = vmatpush.bf16.msra.mxu1 %v5821_v58  ;;  %v5867_v58 = vld [vmem:[%s7416_s1 + $0x5c8] sm:$0xff] }
  0x95   :  { %3608 = vmatpush.bf16.msra.mxu3 %v5837_v59  ;;  %v878_v59 = vunpack.c.l.b16 %v30_v55  ;;  %v930_v12 = vpack.c.b16 %v881_v3, %v881_v3  ;;  %v5913_v55 = vld [vmem:[%s7416_s1 + $0x738] sm:$0xff]  ;;  %v5912_v3 = vld [vmem:[%s7416_s1 + $0x730] sm:$0xff] }
  0x96   :  { %3570 = vmatpush.bf16.msra.mxu0 %v5812_v60  ;;  %v880_v60 = vunpack.c.l.b16 %v31_v56  ;;  %v5929_v56 = vld [vmem:[%s7416_s1 + $0x7b8] sm:$0xff] }
  0x97   :  { %3596 = vmatpush.bf16.msra.mxu2 %v5828_v61  ;;  %v927_v7 = vpack.c.b16 %v878_v59, %v878_v59  ;;  %v5882_v59 = vld [vmem:[%s7416_s1 + $0x640] sm:$0xff] }
  0x98   :  { %3583 = vmatpush.bf16.msra.mxu1 %v5820_v62  ;;  %v5842_v62 = vld [vmem:[%s7416_s1 + $0x500] sm:$0xff] }
  0x99   :  { %3609 = vmatpush.bf16.msra.mxu3 %v5836_v63  ;;  %v5858_v63 = vld [vmem:[%s7416_s1 + $0x580] sm:$0xff] }
  0x9a   :  { %3571 = vmatpush.bf16.msra.mxu0 %v5811_v0  ;;  %v5881_v0 = vld [vmem:[%s7416_s1 + $0x638] sm:$0xff] }
  0x9b   :  { %3597 = vmatpush.bf16.msra.mxu2 %v5827_v1  ;;  %v5897_v1 = vld [vmem:[%s7416_s1 + $0x6b8] sm:$0xff] }
  0x9c   :  { %3584 = vmatpush.bf16.msra.mxu1 %v5819_v4 }
  0x9d   :  { %3610 = vmatpush.bf16.msra.mxu3 %v5835_v5  ;;  %v5850_v5 = vld [vmem:[%s7416_s1 + $0x540] sm:$0xff] }
  0x9e   :  { %3572 = vmatpush.bf16.msra.mxu0 %v5810_v8  ;;  %v3366_v33 = vpop.f32.mrf.mxu0  ;;  %v929_v8 = vpack.c.b16 %v880_v60, %v880_v60  ;;  %v5898_v60 = vld [vmem:[%s7416_s1 + $0x6c0] sm:$0xff] }
  0x9f   :  { %3598 = vmatpush.bf16.msra.mxu2 %v5826_v9  ;;  %v3367_v36 = vadd.f32 %v6082_v30, %v3366_v33  ;;  %v5889_v9 = vld [vmem:[%s7416_s1 + $0x678] sm:$0xff] }
  0xa0   :  { %3585 = vmatpush.bf16.msra.mxu1 %v5818_v14  ;;  %v3379_v37 = vpop.f32.mrf.mxu1  ;;  %v5896_v14 = vld [vmem:[%s7416_s1 + $0x6b0] sm:$0xff]  ;;  %v5893_v30 = vld [vmem:[%s7416_s1 + $0x698] sm:$0xff] }
  0xa1   :  { %3611 = vmatpush.bf16.msra.mxu3 %v5834_v15  ;;  %3573 = vmatmul.bf16.vlgmr.msra.gmra.mxu0 %v923_v16  ;;  %v3380_v40 = vadd.f32 %v3379_v37, %v3367_v36  ;;  %v5888_v15 = vld [vmem:[%s7416_s1 + $0x670] sm:$0xff] }
  0xa2   :  { %3617 = vmatpush.bf16.msrb.mxu0 %v5849_v10  ;;  %3599 = vmatmul.bf16.vlgmr.msra.gmra.mxu2 %v925_v17  ;;  %v5905_v10 = vld [vmem:[%s7416_s1 + $0x6f8] sm:$0xff]  ;;  %v5904_v16 = vld [vmem:[%s7416_s1 + $0x6f0] sm:$0xff]  ;;  %v5879_v17 = vld [vmem:[%s7416_s1 + $0x628] sm:$0xff] }
  0xa3   :  { %3643 = vmatpush.bf16.msrb.mxu2 %v5865_v11  ;;  %3586 = vmatmul.bf16.vlgmr.msra.gmra.mxu1 %v924_v20  ;;  %v928_v11 = vpack.c.b16 %v879_v2, %v879_v2  ;;  %v5903_v20 = vld [vmem:[%s7416_s1 + $0x6e8] sm:$0xff]  ;;  %v5892_v36 = vld [vmem:[%s7416_s1 + $0x690] sm:$0xff] }
  0xa4   :  { %3630 = vmatpush.bf16.msrb.mxu1 %v5857_v18  ;;  %3612 = vmatmul.bf16.vlgmr.msra.gmra.mxu3 %v926_v21  ;;  %v5895_v18 = vld [vmem:[%s7416_s1 + $0x6a8] sm:$0xff]  ;;  %v5878_v21 = vld [vmem:[%s7416_s1 + $0x620] sm:$0xff] }
  0xa5   :  { %3656 = vmatpush.bf16.msrb.mxu3 %v5873_v19  ;;  %v3392_v43 = vpop.f32.mrf.mxu2  ;;  %v5887_v19 = vld [vmem:[%s7416_s1 + $0x668] sm:$0xff] }
  0xa6   :  { %3618 = vmatpush.bf16.msrb.mxu0 %v5848_v22  ;;  %v3393_v46 = vadd.f32 %v3392_v43, %v3380_v40  ;;  %v3368_v48 = vpop.f32.mrf.mxu0  ;;  %v5894_v22 = vld [vmem:[%s7416_s1 + $0x6a0] sm:$0xff]  ;;  %v5884_v40 = vld [vmem:[%s7416_s1 + $0x650] sm:$0xff]  ;;  %v5875_v43 = vld [vmem:[%s7416_s1 + $0x608] sm:$0xff] }
  0xa7   :  { %3644 = vmatpush.bf16.msrb.mxu2 %v5864_v23  ;;  %v3405_v47 = vpop.f32.mrf.mxu3  ;;  %v5899_v48 = vld [vmem:[%s7416_s1 + $0x6c8] sm:$0xff] }
  0xa8   :  { %3631 = vmatpush.bf16.msrb.mxu1 %v5856_v24  ;;  %v6699_v51 = vadd.f32 %v3405_v47, %v3393_v46  ;;  %v3381_v53 = vpop.f32.mrf.mxu1  ;;  %v33_v46 = vld [vmem:[%s7417_s0 + $0x68] sm:$0xff] }
  0xa9   :  { %3657 = vmatpush.bf16.msrb.mxu3 %v5872_v25  ;;  %v5886_v25 = vld [vmem:[%s7416_s1 + $0x660] sm:$0xff]  ;;  %v5883_v47 = vld [vmem:[%s7416_s1 + $0x648] sm:$0xff] }
  0xaa   :  { %3619 = vmatpush.bf16.msrb.mxu0 %v5847_v26  ;;  %v5902_v26 = vld [vmem:[%s7416_s1 + $0x6e0] sm:$0xff] }
  0xab   :  { %3645 = vmatpush.bf16.msrb.mxu2 %v5863_v27  ;;  %v5890_v53 = vld [vmem:[%s7416_s1 + $0x680] sm:$0xff] }
  0xac   :  { %3632 = vmatpush.bf16.msrb.mxu1 %v5855_v28 }
  0xad   :  { %3658 = vmatpush.bf16.msrb.mxu3 %v5871_v29  ;;  %v3394_v61 = vpop.f32.mrf.mxu2  ;;  %v5877_v29 = vld [vmem:[%s7416_s1 + $0x618] sm:$0xff] }
  0xae   :  { %3620 = vmatpush.bf16.msrb.mxu0 %v5846_v31  ;;  %v5885_v31 = vld [vmem:[%s7416_s1 + $0x658] sm:$0xff] }
  0xaf   :  { %3646 = vmatpush.bf16.msrb.mxu2 %v5862_v32  ;;  %v3407_v4 = vpop.f32.mrf.mxu3  ;;  %v5901_v32 = vld [vmem:[%s7416_s1 + $0x6d8] sm:$0xff] }
  0xb0   :  { %3633 = vmatpush.bf16.msrb.mxu1 %v5854_v34  ;;  %v5928_v4 = vld [vmem:[%s7416_s1 + $0x7b0] sm:$0xff] }
  0xb1   :  { %3659 = vmatpush.bf16.msrb.mxu3 %v5870_v35  ;;  %v5876_v35 = vld [vmem:[%s7416_s1 + $0x610] sm:$0xff] }
  0xb2   :  { %3621 = vmatpush.bf16.msrb.mxu0 %v5845_v38 }
  0xb3   :  { %3647 = vmatpush.bf16.msrb.mxu2 %v5861_v39 }
  0xb4   :  { %3634 = vmatpush.bf16.msrb.mxu1 %v5853_v41  ;;  %v5900_v41 = vld [vmem:[%s7416_s1 + $0x6d0] sm:$0xff] }
  0xb5   :  { %3660 = vmatpush.bf16.msrb.mxu3 %v5869_v42 }
  0xb6   :  { %3622 = vmatpush.bf16.msrb.mxu0 %v5844_v44  ;;  %v5891_v44 = vld [vmem:[%s7416_s1 + $0x688] sm:$0xff] }
  0xb7   :  { %3648 = vmatpush.bf16.msrb.mxu2 %v5860_v45  ;;  %v32_v45 = vld [vmem:[%s7417_s0 + $0x60] sm:$0xff] }
  0xb8   :  { %3635 = vmatpush.bf16.msrb.mxu1 %v5852_v49 }
  0xb9   :  { %3661 = vmatpush.bf16.msrb.mxu3 %v5868_v50  ;;  %v882_v50 = vunpack.c.l.b16 %v32_v45 }
  0xba   :  { %3623 = vmatpush.bf16.msrb.mxu0 %v5843_v52  ;;  %v5874_v52 = vld [vmem:[%s7416_s1 + $0x600] sm:$0xff] }
  0xbb   :  { %3649 = vmatpush.bf16.msrb.mxu2 %v5859_v54  ;;  %v931_v61 = vpack.c.b16 %v882_v50, %v882_v50  ;;  %v5930_v50 = vld [vmem:[%s7416_s1 + $0x7c0] sm:$0xff] }
  0xbc   :  { %3636 = vmatpush.bf16.msrb.mxu1 %v5851_v57  ;;  %v883_v57 = vunpack.c.h.b16 %v32_v45  ;;  %v5945_v45 = vld [vmem:[%s7416_s1 + $0x838] sm:$0xff] }
  0xbd   :  { %3662 = vmatpush.bf16.msrb.mxu3 %v5867_v58  ;;  %v885_v58 = vunpack.c.h.b16 %v33_v46 }
  0xbe   :  { %3624 = vmatpush.bf16.msrb.mxu0 %v5842_v62  ;;  %v3418_v23 = vpop.f32.mrf.mxu0 }
  0xbf   :  { %3650 = vmatpush.bf16.msrb.mxu2 %v5858_v63  ;;  %v3419_v24 = vadd.f32 %v3418_v23, %v6699_v51  ;;  %v884_v51 = vunpack.c.l.b16 %v33_v46  ;;  %v5921_v63 = vld [vmem:[%s7416_s1 + $0x778] sm:$0xff]  ;;  %v934_v2 = vpack.c.b16 %v885_v58, %v885_v58  ;;  %v5960_v58 = vld [vmem:[%s7416_s1 + $0x8b0] sm:$0xff] }
  0xc0   :  { %3637 = vmatpush.bf16.msrb.mxu1 %v5850_v5  ;;  %v3431_v27 = vpop.f32.mrf.mxu1  ;;  %v5920_v5 = vld [vmem:[%s7416_s1 + $0x770] sm:$0xff]  ;;  %v5917_v23 = vld [vmem:[%s7416_s1 + $0x758] sm:$0xff] }
  0xc1   :  { %3663 = vmatpush.bf16.msrb.mxu3 %v5866_v6  ;;  %3625 = vmatmul.bf16.vlgmr.msrb.gmra.mxu0 %v927_v7  ;;  %v3432_v28 = vadd.f32 %v3431_v27, %v3419_v24  ;;  %v933_v62 = vpack.c.b16 %v884_v51, %v884_v51  ;;  %v5936_v6 = vld [vmem:[%s7416_s1 + $0x7f0] sm:$0xff]  ;;  %v5911_v7 = vld [vmem:[%s7416_s1 + $0x728] sm:$0xff]  ;;  %v5933_v24 = vld [vmem:[%s7416_s1 + $0x7d8] sm:$0xff] }
  0xc2   :  { %3669 = vmatpush.bf16.msra.mxu0 %v5881_v0  ;;  %3651 = vmatmul.bf16.vlgmr.msrb.gmra.mxu2 %v929_v8  ;;  %v5937_v0 = vld [vmem:[%s7416_s1 + $0x7f8] sm:$0xff]  ;;  %v5927_v8 = vld [vmem:[%s7416_s1 + $0x7a8] sm:$0xff] }
  0xc3   :  { %3695 = vmatpush.bf16.msra.mxu2 %v5897_v1  ;;  %3638 = vmatmul.bf16.vlgmr.msrb.gmra.mxu1 %v928_v11  ;;  %v932_v1 = vpack.c.b16 %v883_v57, %v883_v57  ;;  %v5961_v46 = vld [vmem:[%s7416_s1 + $0x8b8] sm:$0xff]  ;;  %v5944_v57 = vld [vmem:[%s7416_s1 + $0x830] sm:$0xff] }
  0xc4   :  { %3682 = vmatpush.bf16.msra.mxu1 %v5889_v9  ;;  %3664 = vmatmul.bf16.vlgmr.msrb.gmra.mxu3 %v930_v12  ;;  %v5919_v9 = vld [vmem:[%s7416_s1 + $0x768] sm:$0xff] }
  0xc5   :  { %3708 = vmatpush.bf16.msra.mxu3 %v5905_v10  ;;  %v3444_v33 = vpop.f32.mrf.mxu2  ;;  %v5935_v10 = vld [vmem:[%s7416_s1 + $0x7e8] sm:$0xff] }
  0xc6   :  { %3670 = vmatpush.bf16.msra.mxu0 %v5880_v13  ;;  %v3445_v34 = vadd.f32 %v3444_v33, %v3432_v28  ;;  %v3420_v38 = vpop.f32.mrf.mxu0  ;;  %v5910_v13 = vld [vmem:[%s7416_s1 + $0x720] sm:$0xff]  ;;  %v5908_v28 = vld [vmem:[%s7416_s1 + $0x710] sm:$0xff]  ;;  %v5907_v33 = vld [vmem:[%s7416_s1 + $0x708] sm:$0xff] }
  0xc7   :  { %3696 = vmatpush.bf16.msra.mxu2 %v5896_v14  ;;  %v3457_v37 = vpop.f32.mrf.mxu3  ;;  %v5926_v14 = vld [vmem:[%s7416_s1 + $0x7a0] sm:$0xff]  ;;  %v5915_v38 = vld [vmem:[%s7416_s1 + $0x748] sm:$0xff] }
  0xc8   :  { %3683 = vmatpush.bf16.msra.mxu1 %v5888_v15  ;;  %v6798_v39 = vadd.f32 %v3457_v37, %v3445_v34  ;;  %v3433_v42 = vpop.f32.mrf.mxu1  ;;  %v5923_v34 = vld [vmem:[%s7416_s1 + $0x788] sm:$0xff] }
  0xc9   :  { %3709 = vmatpush.bf16.msra.mxu3 %v5904_v16 }
  0xca   :  { %3671 = vmatpush.bf16.msra.mxu0 %v5879_v17  ;;  %v5918_v17 = vld [vmem:[%s7416_s1 + $0x760] sm:$0xff] }
  0xcb   :  { %3697 = vmatpush.bf16.msra.mxu2 %v5895_v18  ;;  %v5934_v18 = vld [vmem:[%s7416_s1 + $0x7e0] sm:$0xff] }
  0xcc   :  { %3684 = vmatpush.bf16.msra.mxu1 %v5887_v19  ;;  %v5909_v19 = vld [vmem:[%s7416_s1 + $0x718] sm:$0xff] }
  0xcd   :  { %3710 = vmatpush.bf16.msra.mxu3 %v5903_v20  ;;  %v3446_v49 = vpop.f32.mrf.mxu2  ;;  %v5925_v20 = vld [vmem:[%s7416_s1 + $0x798] sm:$0xff] }
  0xce   :  { %3672 = vmatpush.bf16.msra.mxu0 %v5878_v21  ;;  %v5914_v49 = vld [vmem:[%s7416_s1 + $0x740] sm:$0xff] }
  0xcf   :  { %3698 = vmatpush.bf16.msra.mxu2 %v5894_v22  ;;  %v3459_v54 = vpop.f32.mrf.mxu3 }
  0xd0   :  { %3685 = vmatpush.bf16.msra.mxu1 %v5886_v25  ;;  %v5969_v54 = vld [vmem:[%s7416_s1 + $0x8f8] sm:$0xff] }
  0xd1   :  { %3711 = vmatpush.bf16.msra.mxu3 %v5902_v26 }
  0xd2   :  { %3673 = vmatpush.bf16.msra.mxu0 %v5877_v29  ;;  %v5924_v29 = vld [vmem:[%s7416_s1 + $0x790] sm:$0xff] }
  0xd3   :  { %3699 = vmatpush.bf16.msra.mxu2 %v5893_v30 }
  0xd4   :  { %3686 = vmatpush.bf16.msra.mxu1 %v5885_v31  ;;  %v5916_v31 = vld [vmem:[%s7416_s1 + $0x750] sm:$0xff] }
  0xd5   :  { %3712 = vmatpush.bf16.msra.mxu3 %v5901_v32  ;;  %v5932_v32 = vld [vmem:[%s7416_s1 + $0x7d0] sm:$0xff] }
  0xd6   :  { %3674 = vmatpush.bf16.msra.mxu0 %v5876_v35  ;;  %v34_v35 = vld [vmem:[%s7417_s0 + $0x70] sm:$0xff] }
  0xd7   :  { %3700 = vmatpush.bf16.msra.mxu2 %v5892_v36  ;;  %v35_v36 = vld [vmem:[%s7417_s0 + $0x78] sm:$0xff] }
  0xd8   :  { %3687 = vmatpush.bf16.msra.mxu1 %v5884_v40  ;;  %v888_v42 = vunpack.c.l.b16 %v35_v36 }
  0xd9   :  { %3713 = vmatpush.bf16.msra.mxu3 %v5900_v41  ;;  %v886_v41 = vunpack.c.l.b16 %v34_v35 }
  0xda   :  { %3675 = vmatpush.bf16.msra.mxu0 %v5875_v43  ;;  %v5906_v43 = vld [vmem:[%s7416_s1 + $0x700] sm:$0xff] }
  0xdb   :  { %3701 = vmatpush.bf16.msra.mxu2 %v5891_v44  ;;  %v5922_v44 = vld [vmem:[%s7416_s1 + $0x780] sm:$0xff]  ;;  %v935_v51 = vpack.c.b16 %v886_v41, %v886_v41 }
  0xdc   :  { %3688 = vmatpush.bf16.msra.mxu1 %v5883_v47  ;;  %v887_v47 = vunpack.c.h.b16 %v34_v35  ;;  %v5977_v35 = vld [vmem:[%s7416_s1 + $0x938] sm:$0xff] }
  0xdd   :  { %3714 = vmatpush.bf16.msra.mxu3 %v5899_v48  ;;  %v889_v48 = vunpack.c.h.b16 %v35_v36  ;;  %v5993_v36 = vld [vmem:[%s7416_s1 + $0x9b8] sm:$0xff] }
  0xde   :  { %3676 = vmatpush.bf16.msra.mxu0 %v5874_v52  ;;  %v3470_v11 = vpop.f32.mrf.mxu0  ;;  %v937_v52 = vpack.c.b16 %v888_v42, %v888_v42 }
  0xdf   :  { %3702 = vmatpush.bf16.msra.mxu2 %v5890_v53  ;;  %v3471_v12 = vadd.f32 %v3470_v11, %v6798_v39  ;;  %v5931_v39 = vld [vmem:[%s7416_s1 + $0x7c8] sm:$0xff]  ;;  %v5953_v53 = vld [vmem:[%s7416_s1 + $0x878] sm:$0xff] }
  0xe0   :  { %3689 = vmatpush.bf16.msra.mxu1 %v5882_v59  ;;  %v3483_v15 = vpop.f32.mrf.mxu1  ;;  %v5952_v59 = vld [vmem:[%s7416_s1 + $0x870] sm:$0xff] }
  0xe1   :  { %3715 = vmatpush.bf16.msra.mxu3 %v5898_v60  ;;  %3677 = vmatmul.bf16.vlgmr.msra.gmra.mxu0 %v931_v61  ;;  %v3484_v16 = vadd.f32 %v3483_v15, %v3471_v12  ;;  %v5968_v60 = vld [vmem:[%s7416_s1 + $0x8f0] sm:$0xff]  ;;  %v5943_v61 = vld [vmem:[%s7416_s1 + $0x828] sm:$0xff] }
  0xe2   :  { %3721 = vmatpush.bf16.msrb.mxu0 %v5913_v55  ;;  %3703 = vmatmul.bf16.vlgmr.msra.gmra.mxu2 %v933_v62  ;;  %v936_v55 = vpack.c.b16 %v887_v47, %v887_v47  ;;  %v5959_v62 = vld [vmem:[%s7416_s1 + $0x8a8] sm:$0xff]  ;;  %v5976_v47 = vld [vmem:[%s7416_s1 + $0x930] sm:$0xff] }
  0xe3   :  { %3747 = vmatpush.bf16.msrb.mxu2 %v5929_v56  ;;  %3690 = vmatmul.bf16.vlgmr.msra.gmra.mxu1 %v932_v1  ;;  %v938_v56 = vpack.c.b16 %v889_v48, %v889_v48  ;;  %v5992_v48 = vld [vmem:[%s7416_s1 + $0x9b0] sm:$0xff] }
  0xe4   :  { %3734 = vmatpush.bf16.msrb.mxu1 %v5921_v63  ;;  %3716 = vmatmul.bf16.vlgmr.msra.gmra.mxu3 %v934_v2  ;;  %v5951_v63 = vld [vmem:[%s7416_s1 + $0x868] sm:$0xff] }
  0xe5   :  { %3760 = vmatpush.bf16.msrb.mxu3 %v5937_v0  ;;  %v3496_v21 = vpop.f32.mrf.mxu2  ;;  %v5967_v0 = vld [vmem:[%s7416_s1 + $0x8e8] sm:$0xff] }
  0xe6   :  { %3722 = vmatpush.bf16.msrb.mxu0 %v5912_v3  ;;  %v3497_v22 = vadd.f32 %v3496_v21, %v3484_v16  ;;  %v3472_v26 = vpop.f32.mrf.mxu0  ;;  %v5942_v3 = vld [vmem:[%s7416_s1 + $0x820] sm:$0xff]  ;;  %v5948_v21 = vld [vmem:[%s7416_s1 + $0x850] sm:$0xff] }
  0xe7   :  { %3748 = vmatpush.bf16.msrb.mxu2 %v5928_v4  ;;  %v3509_v25 = vpop.f32.mrf.mxu3  ;;  %v5958_v4 = vld [vmem:[%s7416_s1 + $0x8a0] sm:$0xff]  ;;  %v37_v26 = vld [vmem:[%s7417_s0 + $0x88] sm:$0xff] }
  0xe8   :  { %3735 = vmatpush.bf16.msrb.mxu1 %v5920_v5  ;;  %v6897_v27 = vadd.f32 %v3509_v25, %v3497_v22  ;;  %v3485_v30 = vpop.f32.mrf.mxu1  ;;  %v5964_v22 = vld [vmem:[%s7416_s1 + $0x8d0] sm:$0xff]  ;;  %v36_v25 = vld [vmem:[%s7417_s0 + $0x80] sm:$0xff] }
  0xe9   :  { %3761 = vmatpush.bf16.msrb.mxu3 %v5936_v6 }
  0xea   :  { %3723 = vmatpush.bf16.msrb.mxu0 %v5911_v7  ;;  %v5950_v7 = vld [vmem:[%s7416_s1 + $0x860] sm:$0xff] }
  0xeb   :  { %3749 = vmatpush.bf16.msrb.mxu2 %v5927_v8  ;;  %v5966_v8 = vld [vmem:[%s7416_s1 + $0x8e0] sm:$0xff] }
  0xec   :  { %3736 = vmatpush.bf16.msrb.mxu1 %v5919_v9  ;;  %v5941_v9 = vld [vmem:[%s7416_s1 + $0x818] sm:$0xff] }
  0xed   :  { %3762 = vmatpush.bf16.msrb.mxu3 %v5935_v10  ;;  %v3498_v37 = vpop.f32.mrf.mxu2  ;;  %v5957_v10 = vld [vmem:[%s7416_s1 + $0x898] sm:$0xff] }
  0xee   :  { %3724 = vmatpush.bf16.msrb.mxu0 %v5910_v13  ;;  %v5949_v13 = vld [vmem:[%s7416_s1 + $0x858] sm:$0xff]  ;;  %v891_v37 = vunpack.c.h.b16 %v36_v25 }
  0xef   :  { %3750 = vmatpush.bf16.msrb.mxu2 %v5926_v14  ;;  %v3511_v40 = vpop.f32.mrf.mxu3  ;;  %v5965_v14 = vld [vmem:[%s7416_s1 + $0x8d8] sm:$0xff] }
  0xf0   :  { %3737 = vmatpush.bf16.msrb.mxu1 %v5918_v17  ;;  %v5962_v40 = vld [vmem:[%s7416_s1 + $0x8c0] sm:$0xff] }
  0xf1   :  { %3763 = vmatpush.bf16.msrb.mxu3 %v5934_v18  ;;  %v5940_v18 = vld [vmem:[%s7416_s1 + $0x810] sm:$0xff] }
  0xf2   :  { %3725 = vmatpush.bf16.msrb.mxu0 %v5909_v19  ;;  %v5956_v19 = vld [vmem:[%s7416_s1 + $0x890] sm:$0xff] }
  0xf3   :  { %3751 = vmatpush.bf16.msrb.mxu2 %v5925_v20 }
  0xf4   :  { %3738 = vmatpush.bf16.msrb.mxu1 %v5917_v23  ;;  %v5939_v23 = vld [vmem:[%s7416_s1 + $0x808] sm:$0xff] }
  0xf5   :  { %3764 = vmatpush.bf16.msrb.mxu3 %v5933_v24  ;;  %v5955_v24 = vld [vmem:[%s7416_s1 + $0x888] sm:$0xff] }
  0xf6   :  { %3726 = vmatpush.bf16.msrb.mxu0 %v5908_v28  ;;  %v5947_v28 = vld [vmem:[%s7416_s1 + $0x848] sm:$0xff] }
  0xf7   :  { %3752 = vmatpush.bf16.msrb.mxu2 %v5924_v29  ;;  %v5963_v29 = vld [vmem:[%s7416_s1 + $0x8c8] sm:$0xff] }
  0xf8   :  { %3739 = vmatpush.bf16.msrb.mxu1 %v5916_v31  ;;  %v890_v31 = vunpack.c.l.b16 %v36_v25  ;;  %v6009_v25 = vld [vmem:[%s7416_s1 + $0xa38] sm:$0xff] }
  0xf9   :  { %3765 = vmatpush.bf16.msrb.mxu3 %v5932_v32  ;;  %v892_v32 = vunpack.c.l.b16 %v37_v26 }
  0xfa   :  { %3727 = vmatpush.bf16.msrb.mxu0 %v5907_v33  ;;  %v5938_v33 = vld [vmem:[%s7416_s1 + $0x800] sm:$0xff]  ;;  %v939_v41 = vpack.c.b16 %v890_v31, %v890_v31 }
  0xfb   :  { %3753 = vmatpush.bf16.msrb.mxu2 %v5923_v34  ;;  %v5954_v34 = vld [vmem:[%s7416_s1 + $0x880] sm:$0xff]  ;;  %v941_v42 = vpack.c.b16 %v892_v32, %v892_v32 }
  0xfc   :  { %3740 = vmatpush.bf16.msrb.mxu1 %v5915_v38  ;;  %v893_v38 = vunpack.c.h.b16 %v37_v26  ;;  %v6025_v26 = vld [vmem:[%s7416_s1 + $0xab8] sm:$0xff] }
  0xfd   :  { %3766 = vmatpush.bf16.msrb.mxu3 %v5931_v39  ;;  %v5946_v39 = vld [vmem:[%s7416_s1 + $0x840] sm:$0xff] }
  0xfe   :  { %3728 = vmatpush.bf16.msrb.mxu0 %v5906_v43  ;;  %v3522_v1 = vpop.f32.mrf.mxu0  ;;  %v5985_v43 = vld [vmem:[%s7416_s1 + $0x978] sm:$0xff] }
  0xff   :  { %3754 = vmatpush.bf16.msrb.mxu2 %v5922_v44  ;;  %v3523_v2 = vadd.f32 %v3522_v1, %v6897_v27  ;;  %v6001_v44 = vld [vmem:[%s7416_s1 + $0x9f8] sm:$0xff] }
 0x100   :  { %3741 = vmatpush.bf16.msrb.mxu1 %v5914_v49  ;;  %v3535_v5 = vpop.f32.mrf.mxu1  ;;  %v5984_v49 = vld [vmem:[%s7416_s1 + $0x970] sm:$0xff] }
 0x101   :  { %3767 = vmatpush.bf16.msrb.mxu3 %v5930_v50  ;;  %3729 = vmatmul.bf16.vlgmr.msrb.gmra.mxu0 %v935_v51  ;;  %v3536_v6 = vadd.f32 %v3535_v5, %v3523_v2  ;;  %v6000_v50 = vld [vmem:[%s7416_s1 + $0x9f0] sm:$0xff]  ;;  %v5975_v51 = vld [vmem:[%s7416_s1 + $0x928] sm:$0xff] }
 0x102   :  { %3773 = vmatpush.bf16.msra.mxu0 %v5945_v45  ;;  %3755 = vmatmul.bf16.vlgmr.msrb.gmra.mxu2 %v937_v52  ;;  %v940_v45 = vpack.c.b16 %v891_v37, %v891_v37  ;;  %v5991_v52 = vld [vmem:[%s7416_s1 + $0x9a8] sm:$0xff]  ;;  %v6008_v37 = vld [vmem:[%s7416_s1 + $0xa30] sm:$0xff] }
 0x103   :  { %3799 = vmatpush.bf16.msra.mxu2 %v5961_v46  ;;  %3742 = vmatmul.bf16.vlgmr.msrb.gmra.mxu1 %v936_v55  ;;  %v942_v46 = vpack.c.b16 %v893_v38, %v893_v38  ;;  %v6024_v38 = vld [vmem:[%s7416_s1 + $0xab0] sm:$0xff] }
 0x104   :  { %3786 = vmatpush.bf16.msra.mxu1 %v5953_v53  ;;  %3768 = vmatmul.bf16.vlgmr.msrb.gmra.mxu3 %v938_v56  ;;  %v5983_v53 = vld [vmem:[%s7416_s1 + $0x968] sm:$0xff] }
 0x105   :  { %3812 = vmatpush.bf16.msra.mxu3 %v5969_v54  ;;  %v3548_v11 = vpop.f32.mrf.mxu2  ;;  %v5999_v54 = vld [vmem:[%s7416_s1 + $0x9e8] sm:$0xff] }
 0x106   :  { %3774 = vmatpush.bf16.msra.mxu0 %v5944_v57  ;;  %v3549_v12 = vadd.f32 %v3548_v11, %v3536_v6  ;;  %v3524_v16 = vpop.f32.mrf.mxu0  ;;  %v5974_v57 = vld [vmem:[%s7416_s1 + $0x920] sm:$0xff]  ;;  %v5980_v11 = vld [vmem:[%s7416_s1 + $0x950] sm:$0xff] }
 0x107   :  { %3800 = vmatpush.bf16.msra.mxu2 %v5960_v58  ;;  %v3561_v15 = vpop.f32.mrf.mxu3  ;;  %v5990_v58 = vld [vmem:[%s7416_s1 + $0x9a0] sm:$0xff]  ;;  %v39_v16 = vld [vmem:[%s7417_s0 + $0x98] sm:$0xff] }
 0x108   :  { %3787 = vmatpush.bf16.msra.mxu1 %v5952_v59  ;;  %v7002_v17 = vadd.f32 %v3561_v15, %v3549_v12  ;;  %v3537_v20 = vpop.f32.mrf.mxu1  ;;  %v5996_v12 = vld [vmem:[%s7416_s1 + $0x9d0] sm:$0xff] }
 0x109   :  { %3813 = vmatpush.bf16.msra.mxu3 %v5968_v60  ;;  %v38_v15 = vld [vmem:[%s7417_s0 + $0x90] sm:$0xff] }
 0x10a   :  { %3775 = vmatpush.bf16.msra.mxu0 %v5943_v61  ;;  %v5982_v61 = vld [vmem:[%s7416_s1 + $0x960] sm:$0xff] }
 0x10b   :  { %3801 = vmatpush.bf16.msra.mxu2 %v5959_v62  ;;  %v5998_v62 = vld [vmem:[%s7416_s1 + $0x9e0] sm:$0xff] }
 0x10c   :  { %3788 = vmatpush.bf16.msra.mxu1 %v5951_v63  ;;  %v5973_v63 = vld [vmem:[%s7416_s1 + $0x918] sm:$0xff] }
 0x10d   :  { %3814 = vmatpush.bf16.msra.mxu3 %v5967_v0  ;;  %v3550_v27 = vpop.f32.mrf.mxu2  ;;  %v5989_v0 = vld [vmem:[%s7416_s1 + $0x998] sm:$0xff] }
 0x10e   :  { %3776 = vmatpush.bf16.msra.mxu0 %v5942_v3  ;;  %v5981_v3 = vld [vmem:[%s7416_s1 + $0x958] sm:$0xff]  ;;  %v895_v27 = vunpack.c.h.b16 %v38_v15 }
 0x10f   :  { %3802 = vmatpush.bf16.msra.mxu2 %v5958_v4  ;;  %v3563_v30 = vpop.f32.mrf.mxu3  ;;  %v5997_v4 = vld [vmem:[%s7416_s1 + $0x9d8] sm:$0xff] }
 0x110   :  { %3789 = vmatpush.bf16.msra.mxu1 %v5950_v7  ;;  %v5994_v30 = vld [vmem:[%s7416_s1 + $0x9c0] sm:$0xff] }
 0x111   :  { %3815 = vmatpush.bf16.msra.mxu3 %v5966_v8  ;;  %v5972_v8 = vld [vmem:[%s7416_s1 + $0x910] sm:$0xff] }
 0x112   :  { %3777 = vmatpush.bf16.msra.mxu0 %v5941_v9  ;;  %v5988_v9 = vld [vmem:[%s7416_s1 + $0x990] sm:$0xff] }
 0x113   :  { %3803 = vmatpush.bf16.msra.mxu2 %v5957_v10 }
 0x114   :  { %3790 = vmatpush.bf16.msra.mxu1 %v5949_v13  ;;  %v5971_v13 = vld [vmem:[%s7416_s1 + $0x908] sm:$0xff] }
 0x115   :  { %3816 = vmatpush.bf16.msra.mxu3 %v5965_v14  ;;  %v5987_v14 = vld [vmem:[%s7416_s1 + $0x988] sm:$0xff] }
 0x116   :  { %3778 = vmatpush.bf16.msra.mxu0 %v5940_v18  ;;  %v5979_v18 = vld [vmem:[%s7416_s1 + $0x948] sm:$0xff] }
 0x117   :  { %3804 = vmatpush.bf16.msra.mxu2 %v5956_v19  ;;  %v5995_v19 = vld [vmem:[%s7416_s1 + $0x9c8] sm:$0xff] }
 0x118   :  { %3791 = vmatpush.bf16.msra.mxu1 %v5948_v21  ;;  %v894_v21 = vunpack.c.l.b16 %v38_v15  ;;  %v6041_v15 = vld [vmem:[%s7416_s1 + $0xb38] sm:$0xff] }
 0x119   :  { %3817 = vmatpush.bf16.msra.mxu3 %v5964_v22  ;;  %v896_v22 = vunpack.c.l.b16 %v39_v16 }
 0x11a   :  { %3779 = vmatpush.bf16.msra.mxu0 %v5939_v23  ;;  %v5970_v23 = vld [vmem:[%s7416_s1 + $0x900] sm:$0xff]  ;;  %v943_v31 = vpack.c.b16 %v894_v21, %v894_v21 }
 0x11b   :  { %3805 = vmatpush.bf16.msra.mxu2 %v5955_v24  ;;  %v5986_v24 = vld [vmem:[%s7416_s1 + $0x980] sm:$0xff]  ;;  %v945_v32 = vpack.c.b16 %v896_v22, %v896_v22 }
 0x11c   :  { %3792 = vmatpush.bf16.msra.mxu1 %v5947_v28  ;;  %v897_v28 = vunpack.c.h.b16 %v39_v16  ;;  %v6057_v16 = vld [vmem:[%s7416_s1 + $0xbb8] sm:$0xff] }
 0x11d   :  { %3818 = vmatpush.bf16.msra.mxu3 %v5963_v29  ;;  %v5978_v29 = vld [vmem:[%s7416_s1 + $0x940] sm:$0xff] }
 0x11e   :  { %3780 = vmatpush.bf16.msra.mxu0 %v5938_v33  ;;  %v3574_v55 = vpop.f32.mrf.mxu0  ;;  %v6017_v33 = vld [vmem:[%s7416_s1 + $0xa78] sm:$0xff] }
 0x11f   :  { %3806 = vmatpush.bf16.msra.mxu2 %v5954_v34  ;;  %v3575_v56 = vadd.f32 %v3574_v55, %v7002_v17  ;;  %v6033_v34 = vld [vmem:[%s7416_s1 + $0xaf8] sm:$0xff] }
 0x120   :  { %3793 = vmatpush.bf16.msra.mxu1 %v5946_v39  ;;  %v3587_v59 = vpop.f32.mrf.mxu1  ;;  %v6016_v39 = vld [vmem:[%s7416_s1 + $0xa70] sm:$0xff] }
 0x121   :  { %3819 = vmatpush.bf16.msra.mxu3 %v5962_v40  ;;  %3781 = vmatmul.bf16.vlgmr.msra.gmra.mxu0 %v939_v41  ;;  %v3588_v60 = vadd.f32 %v3587_v59, %v3575_v56  ;;  %v6032_v40 = vld [vmem:[%s7416_s1 + $0xaf0] sm:$0xff]  ;;  %v6007_v41 = vld [vmem:[%s7416_s1 + $0xa28] sm:$0xff] }
 0x122   :  { %3825 = vmatpush.bf16.msrb.mxu0 %v5977_v35  ;;  %3807 = vmatmul.bf16.vlgmr.msra.gmra.mxu2 %v941_v42  ;;  %v944_v35 = vpack.c.b16 %v895_v27, %v895_v27  ;;  %v6023_v42 = vld [vmem:[%s7416_s1 + $0xaa8] sm:$0xff]  ;;  %v6040_v27 = vld [vmem:[%s7416_s1 + $0xb30] sm:$0xff] }
 0x123   :  { %3851 = vmatpush.bf16.msrb.mxu2 %v5993_v36  ;;  %3794 = vmatmul.bf16.vlgmr.msra.gmra.mxu1 %v940_v45  ;;  %v946_v36 = vpack.c.b16 %v897_v28, %v897_v28  ;;  %v6056_v28 = vld [vmem:[%s7416_s1 + $0xbb0] sm:$0xff] }
 0x124   :  { %3838 = vmatpush.bf16.msrb.mxu1 %v5985_v43  ;;  %3820 = vmatmul.bf16.vlgmr.msra.gmra.mxu3 %v942_v46  ;;  %v6015_v43 = vld [vmem:[%s7416_s1 + $0xa68] sm:$0xff] }
 0x125   :  { %3864 = vmatpush.bf16.msrb.mxu3 %v6001_v44  ;;  %v3600_v1 = vpop.f32.mrf.mxu2  ;;  %v6031_v44 = vld [vmem:[%s7416_s1 + $0xae8] sm:$0xff] }
 0x126   :  { %3826 = vmatpush.bf16.msrb.mxu0 %v5976_v47  ;;  %v3601_v2 = vadd.f32 %v3600_v1, %v3588_v60  ;;  %v3576_v6 = vpop.f32.mrf.mxu0  ;;  %v6006_v47 = vld [vmem:[%s7416_s1 + $0xa20] sm:$0xff]  ;;  %v6012_v1 = vld [vmem:[%s7416_s1 + $0xa50] sm:$0xff] }
 0x127   :  { %3852 = vmatpush.bf16.msrb.mxu2 %v5992_v48  ;;  %v3613_v5 = vpop.f32.mrf.mxu3  ;;  %v6022_v48 = vld [vmem:[%s7416_s1 + $0xaa0] sm:$0xff]  ;;  %v41_v6 = vld [vmem:[%s7417_s0 + $0xa8] sm:$0xff] }
 0x128   :  { %3839 = vmatpush.bf16.msrb.mxu1 %v5984_v49  ;;  %v7107_v7 = vadd.f32 %v3613_v5, %v3601_v2  ;;  %v3589_v10 = vpop.f32.mrf.mxu1  ;;  %v6028_v2 = vld [vmem:[%s7416_s1 + $0xad0] sm:$0xff]  ;;  %v40_v5 = vld [vmem:[%s7417_s0 + $0xa0] sm:$0xff] }
 0x129   :  { %3865 = vmatpush.bf16.msrb.mxu3 %v6000_v50 }
 0x12a   :  { %3827 = vmatpush.bf16.msrb.mxu0 %v5975_v51  ;;  %v6014_v51 = vld [vmem:[%s7416_s1 + $0xa60] sm:$0xff] }
 0x12b   :  { %3853 = vmatpush.bf16.msrb.mxu2 %v5991_v52  ;;  %v6030_v52 = vld [vmem:[%s7416_s1 + $0xae0] sm:$0xff] }
 0x12c   :  { %3840 = vmatpush.bf16.msrb.mxu1 %v5983_v53  ;;  %v6005_v53 = vld [vmem:[%s7416_s1 + $0xa18] sm:$0xff] }
 0x12d   :  { %3866 = vmatpush.bf16.msrb.mxu3 %v5999_v54  ;;  %v3602_v17 = vpop.f32.mrf.mxu2  ;;  %v6021_v54 = vld [vmem:[%s7416_s1 + $0xa98] sm:$0xff] }
 0x12e   :  { %3828 = vmatpush.bf16.msrb.mxu0 %v5974_v57  ;;  %v6013_v57 = vld [vmem:[%s7416_s1 + $0xa58] sm:$0xff]  ;;  %v899_v17 = vunpack.c.h.b16 %v40_v5 }
 0x12f   :  { %3854 = vmatpush.bf16.msrb.mxu2 %v5990_v58  ;;  %v3615_v20 = vpop.f32.mrf.mxu3  ;;  %v6029_v58 = vld [vmem:[%s7416_s1 + $0xad8] sm:$0xff] }
 0x130   :  { %3841 = vmatpush.bf16.msrb.mxu1 %v5982_v61  ;;  %v6026_v20 = vld [vmem:[%s7416_s1 + $0xac0] sm:$0xff] }
 0x131   :  { %3867 = vmatpush.bf16.msrb.mxu3 %v5998_v62  ;;  %v6004_v62 = vld [vmem:[%s7416_s1 + $0xa10] sm:$0xff] }
 0x132   :  { %3829 = vmatpush.bf16.msrb.mxu0 %v5973_v63  ;;  %v6020_v63 = vld [vmem:[%s7416_s1 + $0xa90] sm:$0xff] }
 0x133   :  { %3855 = vmatpush.bf16.msrb.mxu2 %v5989_v0 }
 0x134   :  { %3842 = vmatpush.bf16.msrb.mxu1 %v5981_v3  ;;  %v6003_v3 = vld [vmem:[%s7416_s1 + $0xa08] sm:$0xff] }
 0x135   :  { %3868 = vmatpush.bf16.msrb.mxu3 %v5997_v4  ;;  %v6019_v4 = vld [vmem:[%s7416_s1 + $0xa88] sm:$0xff] }
 0x136   :  { %3830 = vmatpush.bf16.msrb.mxu0 %v5972_v8  ;;  %v6011_v8 = vld [vmem:[%s7416_s1 + $0xa48] sm:$0xff] }
 0x137   :  { %3856 = vmatpush.bf16.msrb.mxu2 %v5988_v9  ;;  %v6027_v9 = vld [vmem:[%s7416_s1 + $0xac8] sm:$0xff] }
 0x138   :  { %3843 = vmatpush.bf16.msrb.mxu1 %v5980_v11  ;;  %v898_v11 = vunpack.c.l.b16 %v40_v5  ;;  %v6073_v5 = vld [vmem:[%s7416_s1 + $0xc38] sm:$0xff] }
 0x139   :  { %3869 = vmatpush.bf16.msrb.mxu3 %v5996_v12  ;;  %v900_v12 = vunpack.c.l.b16 %v41_v6 }
 0x13a   :  { %3831 = vmatpush.bf16.msrb.mxu0 %v5971_v13  ;;  %v6002_v13 = vld [vmem:[%s7416_s1 + $0xa00] sm:$0xff]  ;;  %v947_v21 = vpack.c.b16 %v898_v11, %v898_v11 }
 0x13b   :  { %3857 = vmatpush.bf16.msrb.mxu2 %v5987_v14  ;;  %v6018_v14 = vld [vmem:[%s7416_s1 + $0xa80] sm:$0xff]  ;;  %v949_v22 = vpack.c.b16 %v900_v12, %v900_v12 }
 0x13c   :  { %3844 = vmatpush.bf16.msrb.mxu1 %v5979_v18  ;;  %v901_v18 = vunpack.c.h.b16 %v41_v6 }
 0x13d   :  { %3870 = vmatpush.bf16.msrb.mxu3 %v5995_v19  ;;  %v6010_v19 = vld [vmem:[%s7416_s1 + $0xa40] sm:$0xff] }
 0x13e   :  { %3832 = vmatpush.bf16.msrb.mxu0 %v5970_v23  ;;  %v3626_v45 = vpop.f32.mrf.mxu0  ;;  %v6049_v23 = vld [vmem:[%s7416_s1 + $0xb78] sm:$0xff] }
 0x13f   :  { %3858 = vmatpush.bf16.msrb.mxu2 %v5986_v24  ;;  %v3627_v46 = vadd.f32 %v3626_v45, %v7107_v7  ;;  %v6065_v24 = vld [vmem:[%s7416_s1 + $0xbf8] sm:$0xff] }
 0x140   :  { %3845 = vmatpush.bf16.msrb.mxu1 %v5978_v29  ;;  %v3639_v49 = vpop.f32.mrf.mxu1  ;;  %v6048_v29 = vld [vmem:[%s7416_s1 + $0xb70] sm:$0xff] }
 0x141   :  { %3871 = vmatpush.bf16.msrb.mxu3 %v5994_v30  ;;  %3833 = vmatmul.bf16.vlgmr.msrb.gmra.mxu0 %v943_v31  ;;  %v3640_v50 = vadd.f32 %v3639_v49, %v3627_v46  ;;  %v6064_v30 = vld [vmem:[%s7416_s1 + $0xbf0] sm:$0xff]  ;;  %v6039_v31 = vld [vmem:[%s7416_s1 + $0xb28] sm:$0xff] }
 0x142   :  { %3877 = vmatpush.bf16.msra.mxu0 %v6009_v25  ;;  %3859 = vmatmul.bf16.vlgmr.msrb.gmra.mxu2 %v945_v32  ;;  %v948_v25 = vpack.c.b16 %v899_v17, %v899_v17  ;;  %v6055_v32 = vld [vmem:[%s7416_s1 + $0xba8] sm:$0xff] }
 0x143   :  { %3903 = vmatpush.bf16.msra.mxu2 %v6025_v26  ;;  %3846 = vmatmul.bf16.vlgmr.msrb.gmra.mxu1 %v944_v35  ;;  %v950_v26 = vpack.c.b16 %v901_v18, %v901_v18  ;;  %v6070_v18 = vld [vmem:[%s7416_s1 + $0xc20] sm:$0xff] }
 0x144   :  { %3890 = vmatpush.bf16.msra.mxu1 %v6017_v33  ;;  %3872 = vmatmul.bf16.vlgmr.msrb.gmra.mxu3 %v946_v36  ;;  %v6047_v33 = vld [vmem:[%s7416_s1 + $0xb68] sm:$0xff] }
 0x145   :  { %3916 = vmatpush.bf16.msra.mxu3 %v6033_v34  ;;  %v3652_v55 = vpop.f32.mrf.mxu2  ;;  %v6063_v34 = vld [vmem:[%s7416_s1 + $0xbe8] sm:$0xff] }
 0x146   :  { %3878 = vmatpush.bf16.msra.mxu0 %v6008_v37  ;;  %v3653_v56 = vadd.f32 %v3652_v55, %v3640_v50  ;;  %v3628_v60 = vpop.f32.mrf.mxu0  ;;  %v6038_v37 = vld [vmem:[%s7416_s1 + $0xb20] sm:$0xff]  ;;  %v6044_v55 = vld [vmem:[%s7416_s1 + $0xb50] sm:$0xff] }
 0x147   :  { %3904 = vmatpush.bf16.msra.mxu2 %v6024_v38  ;;  %v3665_v59 = vpop.f32.mrf.mxu3  ;;  %v6054_v38 = vld [vmem:[%s7416_s1 + $0xba0] sm:$0xff]  ;;  %v43_v60 = vld [vmem:[%s7417_s0 + $0xb8] sm:$0xff] }
 0x148   :  { %3891 = vmatpush.bf16.msra.mxu1 %v6016_v39  ;;  %v7212_v61 = vadd.f32 %v3665_v59, %v3653_v56  ;;  %v3641_v0 = vpop.f32.mrf.mxu1  ;;  %v6060_v56 = vld [vmem:[%s7416_s1 + $0xbd0] sm:$0xff] }
 0x149   :  { %3917 = vmatpush.bf16.msra.mxu3 %v6032_v40  ;;  %v42_v59 = vld [vmem:[%s7417_s0 + $0xb0] sm:$0xff] }
 0x14a   :  { %3879 = vmatpush.bf16.msra.mxu0 %v6007_v41  ;;  %v6046_v41 = vld [vmem:[%s7416_s1 + $0xb60] sm:$0xff]  ;;  %v903_v6 = vunpack.c.h.b16 %v42_v59 }
 0x14b   :  { %3905 = vmatpush.bf16.msra.mxu2 %v6023_v42  ;;  %v6062_v42 = vld [vmem:[%s7416_s1 + $0xbe0] sm:$0xff] }
 0x14c   :  { %3892 = vmatpush.bf16.msra.mxu1 %v6015_v43  ;;  %v6037_v43 = vld [vmem:[%s7416_s1 + $0xb18] sm:$0xff]  ;;  %v952_v12 = vpack.c.b16 %v903_v6, %v903_v6 }
 0x14d   :  { %3918 = vmatpush.bf16.msra.mxu3 %v6031_v44  ;;  %v3654_v7 = vpop.f32.mrf.mxu2  ;;  %v6053_v44 = vld [vmem:[%s7416_s1 + $0xb98] sm:$0xff] }
 0x14e   :  { %3880 = vmatpush.bf16.msra.mxu0 %v6006_v47  ;;  %v6045_v47 = vld [vmem:[%s7416_s1 + $0xb58] sm:$0xff]  ;;  %v905_v7 = vunpack.c.h.b16 %v43_v60 }
 0x14f   :  { %3906 = vmatpush.bf16.msra.mxu2 %v6022_v48  ;;  %v3667_v10 = vpop.f32.mrf.mxu3  ;;  %v6061_v48 = vld [vmem:[%s7416_s1 + $0xbd8] sm:$0xff] }
 0x150   :  { %3893 = vmatpush.bf16.msra.mxu1 %v6014_v51 }
 0x151   :  { %3919 = vmatpush.bf16.msra.mxu3 %v6030_v52  ;;  %v6036_v52 = vld [vmem:[%s7416_s1 + $0xb10] sm:$0xff] }
 0x152   :  { %3881 = vmatpush.bf16.msra.mxu0 %v6005_v53  ;;  %v6052_v53 = vld [vmem:[%s7416_s1 + $0xb90] sm:$0xff] }
 0x153   :  { %3907 = vmatpush.bf16.msra.mxu2 %v6021_v54 }
 0x154   :  { %3894 = vmatpush.bf16.msra.mxu1 %v6013_v57  ;;  %v6035_v57 = vld [vmem:[%s7416_s1 + $0xb08] sm:$0xff] }
 0x155   :  { %3920 = vmatpush.bf16.msra.mxu3 %v6029_v58  ;;  %v6051_v58 = vld [vmem:[%s7416_s1 + $0xb88] sm:$0xff] }
 0x156   :  { %3882 = vmatpush.bf16.msra.mxu0 %v6004_v62  ;;  %v6043_v62 = vld [vmem:[%s7416_s1 + $0xb48] sm:$0xff] }
 0x157   :  { %3908 = vmatpush.bf16.msra.mxu2 %v6020_v63  ;;  %v6059_v63 = vld [vmem:[%s7416_s1 + $0xbc8] sm:$0xff] }
 0x158   :  { %3895 = vmatpush.bf16.msra.mxu1 %v6012_v1  ;;  %v902_v1 = vunpack.c.l.b16 %v42_v59 }
 0x159   :  { %3921 = vmatpush.bf16.msra.mxu3 %v6028_v2  ;;  %v904_v2 = vunpack.c.l.b16 %v43_v60 }
 0x15a   :  { %3883 = vmatpush.bf16.msra.mxu0 %v6003_v3  ;;  %v6034_v3 = vld [vmem:[%s7416_s1 + $0xb00] sm:$0xff]  ;;  %v951_v10 = vpack.c.b16 %v902_v1, %v902_v1 }
 0x15b   :  { %3909 = vmatpush.bf16.msra.mxu2 %v6019_v4  ;;  %v6050_v4 = vld [vmem:[%s7416_s1 + $0xb80] sm:$0xff]  ;;  %v953_v11 = vpack.c.b16 %v904_v2, %v904_v2 }
 0x15c   :  { %3896 = vmatpush.bf16.msra.mxu1 %v6011_v8  ;;  %v6042_v8 = vld [vmem:[%s7416_s1 + $0xb40] sm:$0xff] }
 0x15d   :  { %3922 = vmatpush.bf16.msra.mxu3 %v6027_v9  ;;  %v6058_v9 = vld [vmem:[%s7416_s1 + $0xbc0] sm:$0xff] }
 0x15e   :  { %3884 = vmatpush.bf16.msra.mxu0 %v6002_v13  ;;  %v3678_v35 = vpop.f32.mrf.mxu0  ;;  %v954_v13 = vpack.c.b16 %v905_v7, %v905_v7 }
 0x15f   :  { %3910 = vmatpush.bf16.msra.mxu2 %v6018_v14  ;;  %v3679_v36 = vadd.f32 %v3678_v35, %v7212_v61  ;;  %v6072_v14 = vld [vmem:[%s7416_s1 + $0xc30] sm:$0xff] }
 0x160   :  { %3897 = vmatpush.bf16.msra.mxu1 %v6010_v19  ;;  %v3691_v39 = vpop.f32.mrf.mxu1 }
 0x161   :  { %3923 = vmatpush.bf16.msra.mxu3 %v6026_v20  ;;  %3885 = vmatmul.bf16.vlgmr.msra.gmra.mxu0 %v947_v21  ;;  %v3692_v40 = vadd.f32 %v3691_v39, %v3679_v36  ;;  %v6069_v21 = vld [vmem:[%s7416_s1 + $0xc18] sm:$0xff] }
 0x162   :  { %3929 = vmatpush.bf16.msrb.mxu0 %v6041_v15  ;;  %3911 = vmatmul.bf16.vlgmr.msra.gmra.mxu2 %v949_v22  ;;  %v6071_v15 = vld [vmem:[%s7416_s1 + $0xc28] sm:$0xff] }
 0x163   :  { %3955 = vmatpush.bf16.msrb.mxu2 %v6057_v16  ;;  %3898 = vmatmul.bf16.vlgmr.msra.gmra.mxu1 %v948_v25 }
 0x164   :  { %3942 = vmatpush.bf16.msrb.mxu1 %v6049_v23  ;;  %3924 = vmatmul.bf16.vlgmr.msra.gmra.mxu3 %v950_v26 }
 0x165   :  { %3968 = vmatpush.bf16.msrb.mxu3 %v6065_v24  ;;  %v3704_v45 = vpop.f32.mrf.mxu2 }
 0x166   :  { %3930 = vmatpush.bf16.msrb.mxu0 %v6040_v27  ;;  %v3705_v46 = vadd.f32 %v3704_v45, %v3692_v40  ;;  %v3680_v50 = vpop.f32.mrf.mxu0  ;;  %v6068_v27 = vld [vmem:[%s7416_s1 + $0xc10] sm:$0xff] }
 0x167   :  { %3956 = vmatpush.bf16.msrb.mxu2 %v6056_v28  ;;  %v3717_v49 = vpop.f32.mrf.mxu3 }
 0x168   :  { %3943 = vmatpush.bf16.msrb.mxu1 %v6048_v29  ;;  %v3718_v51 = vadd.f32 %v3717_v49, %v3705_v46  ;;  %v3693_v54 = vpop.f32.mrf.mxu1  ;;  %v6067_v29 = vld [vmem:[%s7416_s1 + $0xc08] sm:$0xff] }
 0x169   :  { %3969 = vmatpush.bf16.msrb.mxu3 %v6064_v30  ;;  %v44_v30 = vld [vmem:[%s7417_s0 + $0xc0] sm:$0xf] }
 0x16a   :  { %3931 = vmatpush.bf16.msrb.mxu0 %v6039_v31 }
 0x16b   :  { %3957 = vmatpush.bf16.msrb.mxu2 %v6055_v32 }
 0x16c   :  { %3944 = vmatpush.bf16.msrb.mxu1 %v6047_v33  ;;  %v906_v33 = vunpack.c.l.b16 %v44_v30 }
 0x16d   :  { %3970 = vmatpush.bf16.msrb.mxu3 %v6063_v34  ;;  %v3706_v61 = vpop.f32.mrf.mxu2  ;;  %v6066_v34 = vld [vmem:[%s7416_s1 + $0xc00] sm:$0xff] }
 0x16e   :  { %3932 = vmatpush.bf16.msrb.mxu0 %v6038_v37  ;;  %v955_v35 = vpack.c.b16 %v906_v33, %v906_v33  ;;  %v6081_v61 = vld [vmem:[%s7420_s3 + $0x38] sm:$0xff]  ;;  %v6083_v33 = vld [vmem:[%s7419_s4] ss:$0 sm:$0xff] }
 0x16f   :  { %3958 = vmatpush.bf16.msrb.mxu2 %v6054_v38  ;;  %v3719_v0 = vpop.f32.mrf.mxu3 }
 0x170   :  { %3945 = vmatpush.bf16.msrb.mxu1 %v6046_v41  ;;  %v6080_v0 = vld [vmem:[%s7420_s3 + $0x30] sm:$0xff] }
 0x171   :  { %3971 = vmatpush.bf16.msrb.mxu3 %v6062_v42 }
 0x172   :  { %3933 = vmatpush.bf16.msrb.mxu0 %v6037_v43 }
 0x173   :  { %3959 = vmatpush.bf16.msrb.mxu2 %v6053_v44 }
 0x174   :  { %3946 = vmatpush.bf16.msrb.mxu1 %v6045_v47 }
 0x175   :  { %3972 = vmatpush.bf16.msrb.mxu3 %v6061_v48 }
 0x176   :  { %3934 = vmatpush.bf16.msrb.mxu0 %v6036_v52 }
 0x177   :  { %3960 = vmatpush.bf16.msrb.mxu2 %v6052_v53 }
 0x178   :  { %3947 = vmatpush.bf16.msrb.mxu1 %v6044_v55 }
 0x179   :  { %3973 = vmatpush.bf16.msrb.mxu3 %v6060_v56 }
 0x17a   :  { %3935 = vmatpush.bf16.msrb.mxu0 %v6035_v57 }
 0x17b   :  { %3961 = vmatpush.bf16.msrb.mxu2 %v6051_v58 }
 0x17c   :  { %3948 = vmatpush.bf16.msrb.mxu1 %v6043_v62 }
 0x17d   :  { %3974 = vmatpush.bf16.msrb.mxu3 %v6059_v63 }
 0x17e   :  { %3936 = vmatpush.bf16.msrb.mxu0 %v6034_v3  ;;  %v3730_v16 = vpop.f32.mrf.mxu0  ;;  %v6079_v3 = vld [vmem:[%s7420_s3 + $0x28] sm:$0xff] }
 0x17f   :  { %3962 = vmatpush.bf16.msrb.mxu2 %v6050_v4  ;;  %v3731_v17 = vadd.f32 %v3730_v16, %v3718_v51 }
 0x180   :  { %3949 = vmatpush.bf16.msrb.mxu1 %v6042_v8  ;;  %v3743_v19 = vpop.f32.mrf.mxu1  ;;  %v6077_v8 = vld [vmem:[%s7420_s3 + $0x18] sm:$0xff] }
 0x181   :  { %3975 = vmatpush.bf16.msrb.mxu3 %v6058_v9  ;;  %3937 = vmatmul.bf16.vlgmr.msrb.gmra.mxu0 %v951_v10  ;;  %v3744_v20 = vadd.f32 %v3743_v19, %v3731_v17  ;;  %v6076_v9 = vld [vmem:[%s7420_s3 + $0x10] sm:$0xff]  ;;  %v6075_v10 = vld [vmem:[%s7420_s3 + $0x8] sm:$0xff] }
 0x182   :  { %3981 = vmatpush.bf16.msra.mxu0 %v6073_v5  ;;  %3963 = vmatmul.bf16.vlgmr.msrb.gmra.mxu2 %v953_v11  ;;  %v6078_v5 = vld [vmem:[%s7420_s3 + $0x20] sm:$0xff] }
 0x183   :  { %3950 = vmatmul.bf16.vlgmr.msrb.gmra.mxu1 %v952_v12  ;;  %v6074_v12 = vld [vmem:[%s7420_s3] sm:$0xff] }
 0x184   :  { %3976 = vmatmul.bf16.vlgmr.msrb.gmra.mxu3 %v954_v13  ;;  %4064 = vmatpush.bf16.msra.mxu1 %v6081_v61 }
 0x185   :  { %v3756_v22 = vpop.f32.mrf.mxu2 }
 0x186   :  { %3982 = vmatpush.bf16.msra.mxu0 %v6072_v14  ;;  %v3757_v23 = vadd.f32 %v3756_v22, %v3744_v20  ;;  %v3732_v25 = vpop.f32.mrf.mxu0 }
 0x187   :  { %v3769_v24 = vpop.f32.mrf.mxu3 }
 0x188   :  { %v3770_v26 = vadd.f32 %v3769_v24, %v3757_v23  ;;  %v3745_v28 = vpop.f32.mrf.mxu1  ;;  %4065 = vmatpush.bf16.msra.mxu1 %v6080_v0 }
 0x18a   :  { %3983 = vmatpush.bf16.msra.mxu0 %v6071_v15 }
 0x18c   :  { %4066 = vmatpush.bf16.msra.mxu1 %v6079_v3 }
 0x18d   :  { %v3758_v31 = vpop.f32.mrf.mxu2 }
 0x18e   :  { %3984 = vmatpush.bf16.msra.mxu0 %v6070_v18 }
 0x18f   :  { %v3771_v32 = vpop.f32.mrf.mxu3 }
 0x190   :  { %4067 = vmatpush.bf16.msra.mxu1 %v6078_v5 }
 0x192   :  { %3985 = vmatpush.bf16.msra.mxu0 %v6069_v21 }
 0x194   :  { %4068 = vmatpush.bf16.msra.mxu1 %v6077_v8 }
 0x196   :  { %3986 = vmatpush.bf16.msra.mxu0 %v6068_v27 }
 0x198   :  { %4069 = vmatpush.bf16.msra.mxu1 %v6076_v9 }
 0x19a   :  { %3987 = vmatpush.bf16.msra.mxu0 %v6067_v29 }
 0x19c   :  { %4070 = vmatpush.bf16.msra.mxu1 %v6075_v10 }
 0x19e   :  { %3988 = vmatpush.bf16.msra.mxu0 %v6066_v34  ;;  %v3782_v36 = vpop.f32.mrf.mxu0 }
 0x19f   :  { %v3783_v37 = vadd.f32 %v3782_v36, %v3770_v26 }
 0x1a0   :  { %v3795_v38 = vpop.f32.mrf.mxu1  ;;  %4071 = vmatpush.bf16.msra.mxu1 %v6074_v12 }
 0x1a1   :  { %3989 = vmatmul.bf16.vlgmr.msra.gmra.mxu0 %v955_v35  ;;  %v3796_v39 = vadd.f32 %v3795_v38, %v3783_v37 }
 0x1a5   :  { %v3808_v40 = vpop.f32.mrf.mxu2 }
 0x1a6   :  { %v3809_v41 = vadd.f32 %v3808_v40, %v3796_v39  ;;  %v3784_v43 = vpop.f32.mrf.mxu0 }
 0x1a7   :  { %v3821_v42 = vpop.f32.mrf.mxu3 }
 0x1a8   :  { %v3822_v44 = vadd.f32 %v3821_v42, %v3809_v41  ;;  %v3797_v45 = vpop.f32.mrf.mxu1 }
 0x1ad   :  { %v3810_v46 = vpop.f32.mrf.mxu2 }
 0x1af   :  { %v3823_v47 = vpop.f32.mrf.mxu3 }
 0x1be   :  { %v3834_v48 = vpop.f32.mrf.mxu0 }
 0x1bf   :  { %v3835_v49 = vadd.f32 %v3834_v48, %v3822_v44 }
 0x1c0   :  { %v3847_v50 = vpop.f32.mrf.mxu1 }
 0x1c1   :  { %v3848_v51 = vadd.f32 %v3847_v50, %v3835_v49 }
 0x1c5   :  { %v3860_v52 = vpop.f32.mrf.mxu2 }
 0x1c6   :  { %v3861_v53 = vadd.f32 %v3860_v52, %v3848_v51  ;;  %v3836_v55 = vpop.f32.mrf.mxu0 }
 0x1c7   :  { %v3873_v54 = vpop.f32.mrf.mxu3 }
 0x1c8   :  { %v3874_v56 = vadd.f32 %v3873_v54, %v3861_v53  ;;  %v3849_v57 = vpop.f32.mrf.mxu1 }
 0x1cd   :  { %v3862_v58 = vpop.f32.mrf.mxu2 }
 0x1cf   :  { %v3875_v59 = vpop.f32.mrf.mxu3 }
 0x1de   :  { %v3886_v60 = vpop.f32.mrf.mxu0 }
 0x1df   :  { %v3887_v15 = vadd.f32 %v3886_v60, %v3874_v56 }
 0x1e0   :  { %v3899_v62 = vpop.f32.mrf.mxu1 }
 0x1e1   :  { %v3900_v19 = vadd.f32 %v3899_v62, %v3887_v15 }
 0x1e5   :  { %v3912_v63 = vpop.f32.mrf.mxu2 }
 0x1e6   :  { %v3888_v2 = vpop.f32.mrf.mxu0  ;;  %v3913_v20 = vadd.f32 %v3912_v63, %v3900_v19 }
 0x1e7   :  { %v3925_v1 = vpop.f32.mrf.mxu3 }
 0x1e8   :  { %v3901_v4 = vpop.f32.mrf.mxu1  ;;  %v3926_v23 = vadd.f32 %v3925_v1, %v3913_v20 }
 0x1ed   :  { %v3914_v6 = vpop.f32.mrf.mxu2 }
 0x1ef   :  { %v3927_v7 = vpop.f32.mrf.mxu3 }
 0x1fe   :  { %v3938_v11 = vpop.f32.mrf.mxu0 }
 0x1ff   :  { %v3939_v24 = vadd.f32 %v3938_v11, %v3926_v23 }
 0x200   :  { %v3951_v13 = vpop.f32.mrf.mxu1 }
 0x201   :  { %v3952_v25 = vadd.f32 %v3951_v13, %v3939_v24 }
 0x205   :  { %v3964_v14 = vpop.f32.mrf.mxu2 }
 0x206   :  { %v3940_v17 = vpop.f32.mrf.mxu0  ;;  %v3965_v26 = vadd.f32 %v3964_v14, %v3952_v25 }
 0x207   :  { %v3977_v16 = vpop.f32.mrf.mxu3 }
 0x208   :  { %v3953_v18 = vpop.f32.mrf.mxu1  ;;  %v3978_v27 = vadd.f32 %v3977_v16, %v3965_v26 }
 0x20d   :  { %v3966_v21 = vpop.f32.mrf.mxu2 }
 0x20f   :  { %v3979_v22 = vpop.f32.mrf.mxu3 }
 0x21e   :  { %v3990_v28 = vpop.f32.mrf.mxu0 }
 0x21f   :  { %v3991_v29 = vadd.f32 %v3990_v28, %v3978_v27 }
 0x221   :  { %v3994_v30 = vmax.f32 %v3991_v29, 0.0 }
 0x223   :  { %v3995_v31 = vpack.c.bf16 %v3994_v30, %v3994_v30 }
 0x225   :  { %4072 = vmatmul.bf16.vlgmr.msra.gmra.mxu1 %v3995_v31 }
 0x226   :  { %v3992_v32 = vpop.f32.mrf.mxu0 }
 0x2a2   :  { %v4073_v34 = vpop.f32.mrf.mxu1 }
 0x2a3   :  { %v4074_v35 = vadd.f32 %v6083_v33, %v4073_v34 }
 0x2a5   :  { %4077 = vst [vmem:[%s7421_s5] sm:$0xff] %v4074_v35 }
 0x2aa   :  { %v4075_v36 = vpop.f32.mrf.mxu1 }

</bundles_post_ra>
